<compile_context>
chip_gen: v7x
topology: tpu7x:2x2x1
jax: 0.10.0
libtpu: 0.0.40
codegen_flags: <defaults>
</compile_context>

<pallas_src>
import math
import numpy as np
import jax
import jax.numpy as jnp
from jax.experimental import pallas as pl
from jax.experimental.pallas import tpu as pltpu

# ----------------------- small, module-consistent config -----------------------
BATCH = 2
INPUT_DIM = 160          # seq_len
SAMPLE_RATE = 16000
SINC_KERNEL = 17         # odd
SINC_FILTERS = 8
CNN_FILTERS = 8
CNN_KERNEL = 5
MAXPOOL = 3
HIDDEN_DIM = 32
NUM_CLASSES = 16

LN_EPS = 1e-6            # LayerNorm eps (added to std, torch-unbiased std)
BN_EPS = 1e-5            # BatchNorm1d eps (training-mode batch stats)
LRELU = 0.01

L_SINC = INPUT_DIM - SINC_KERNEL + 1                     # 144
DIM1 = L_SINC // MAXPOOL                                 # 48
L_C1 = DIM1 - CNN_KERNEL + 1                             # 44
DIM2 = L_C1 // MAXPOOL                                   # 14
L_C2 = DIM2 - CNN_KERNEL + 1                             # 10
DIM3 = L_C2 // MAXPOOL                                   # 3
DIM_OUT = DIM3 * CNN_FILTERS                             # 24

MXU_PREC = jax.lax.Precision.HIGHEST                     # keep f32-accurate matmuls


# ----------------------------- sinc filter bank (host glue) -----------------------------
def _hz_to_mel(hz):
    return 2595.0 * np.log10(1.0 + hz / 700.0)


def _mel_to_hz(mel):
    return 700.0 * (10.0 ** (mel / 2595.0) - 1.0)


def make_sinc_filters(out_channels, kernel_size, sample_rate):
    # Same math as sinc_Conv1d with fresh (f1, band) parameters.
    min_freq, min_f1, min_band = 30, 50, 50
    max_freq = sample_rate / 2 - (min_f1 + min_band)
    mel = np.linspace(_hz_to_mel(min_freq), _hz_to_mel(max_freq), out_channels + 1)
    freq_set = _mel_to_hz(mel)
    f1_param = freq_set[:-1][:, None]
    band_param = np.diff(freq_set)[:, None]

    n_lin = np.linspace(0.0, kernel_size / 2 - 1, int(kernel_size / 2))
    window = 0.54 - 0.46 * np.cos(2 * math.pi * n_lin / kernel_size)
    n = 2 * math.pi * np.arange(-(kernel_size - 1) / 2.0, 0.0)[None, :] / sample_rate

    f1 = min_f1 + np.abs(f1_param)
    f2 = np.clip(f1 + min_band + np.abs(band_param), min_f1, sample_rate / 2)

    low = f1 @ n
    high = f2 @ n
    g = (np.sin(high) - np.sin(low)) / (n / 2.0)
    band = (f2 - f1)[:, 0]
    left = g * window
    center = 2.0 * band[:, None]
    right = left[:, ::-1]
    band_pass = np.concatenate([left, center, right], axis=1)
    filters = band_pass / (2.0 * band[:, None])
    return jnp.asarray(filters, jnp.float32)       # (C, K)


# ----------------------------- in-kernel helpers -----------------------------
def _layernorm_last(x):
    # matches model.LayerNorm: gamma=1, beta=0, torch.std (unbiased), eps added to std.
    # Exact form kept intentionally (std + eps, not rsqrt(var + eps)).
    n = x.shape[-1]
    mean = jnp.mean(x, axis=-1, keepdims=True)
    var = jnp.sum((x - mean) ** 2, axis=-1, keepdims=True) / (n - 1)
    return (x - mean) / (jnp.sqrt(var) + LN_EPS)


def _leaky_relu(x):
    return jnp.where(x >= 0, x, LRELU * x)


# ----------------------------- the single fused kernel -----------------------------
def sincnet_kernel(x_ref, gsinc_ref, s0_ref, w1c_ref, b1c_ref, s1_ref,
                   w2c_ref, b2c_ref, s2_ref, esum_ref, w1hat_ref, bl1_ref,
                   wl2_ref, bl2_ref, wl3_ref, bl3_ref, wl4_ref, bl4_ref, o_ref):
    f32 = jnp.float32

    def mm(a, b):
        return jnp.dot(a, b, precision=MXU_PREC, preferred_element_type=f32)

    # ---- input LayerNorm over seq_len ----
    xln = _layernorm_last(x_ref[...])                                   # (B, 160)

    # ---- sinc conv as ONE matmul: batch-block-diag filter bank x im2col ----
    # cols0 rows are ordered k*B + b ; gsinc is kron(filters, I_B), rows c*B + b.
    cols0 = jnp.concatenate([xln[:, k:k + L_SINC] for k in range(SINC_KERNEL)],
                            axis=0)                                     # (B*K, 144)
    a0 = jnp.abs(mm(gsinc_ref[...], cols0))                             # (B*C, 144)

    # ---- max-pool(3) via exact 0/1 selection matmuls, then LN + LeakyReLU ----
    def pool_ln_act(a, s_ref):
        p = mm(a, s_ref[0])
        p = jnp.maximum(p, mm(a, s_ref[1]))
        p = jnp.maximum(p, mm(a, s_ref[2]))
        return _leaky_relu(_layernorm_last(p))

    # ---- Conv1d as ONE matmul per layer: block-diag weight x im2col ----
    def conv(h, w_ref, b_ref):
        lout = h.shape[-1] - CNN_KERNEL + 1
        cols = jnp.concatenate([h[:, k:k + lout] for k in range(CNN_KERNEL)],
                               axis=0)                                  # (ck*C*B, lout)
        return mm(w_ref[...], cols) + b_ref[...]

    h0 = pool_ln_act(a0, s0_ref)                                        # (16, 48)
    h1 = pool_ln_act(conv(h0, w1c_ref, b1c_ref), s1_ref)                # (16, 14)
    h2 = pool_ln_act(conv(h1, w2c_ref, b2c_ref), s2_ref)                # (16, 3)

    # ---- flatten + Linear1 with no reshape/transpose:
    #      sum_l h2[:, l] * W1_rows(c*3+l, replicated per batch), then row-sum per batch.
    m = h2[:, 0:1] * w1hat_ref[0]
    for l in range(1, DIM3):
        m = m + h2[:, l:l + 1] * w1hat_ref[l]                           # (16, H)
    z = mm(esum_ref[...], m) + bl1_ref[...]                             # (B, H)

    # ---- MLP: BatchNorm1d (training-mode batch stats) + LeakyReLU, then Linears ----
    def bn(hh):
        mu = jnp.mean(hh, axis=0, keepdims=True)
        var = jnp.mean((hh - mu) ** 2, axis=0, keepdims=True)
        return (hh - mu) * jax.lax.rsqrt(var + BN_EPS)

    g = _leaky_relu(bn(z))
    g = _leaky_relu(bn(mm(g, wl2_ref[...]) + bl2_ref[...]))
    g = _leaky_relu(bn(mm(g, wl3_ref[...]) + bl3_ref[...]))
    o_ref[...] = mm(g, wl4_ref[...]) + bl4_ref[...]                     # (B, 16)


# ----------------------------- pallas_call wrapper -----------------------------
def _full_spec(shape):
    nd = len(shape)
    return pl.BlockSpec(shape, lambda *_, nd=nd: (0,) * nd)


def sincnet_forward(x, kernel_params):
    args = (x,) + tuple(kernel_params)
    out_shape = (x.shape[0], NUM_CLASSES)
    return pl.pallas_call(
        sincnet_kernel,
        grid=(1,),
        in_specs=[_full_spec(a.shape) for a in args],
        out_specs=_full_spec(out_shape),
        out_shape=jax.ShapeDtypeStruct(out_shape, jnp.float32),
        compiler_params=pltpu.CompilerParams(dimension_semantics=("arbitrary",)),
    )(*args)


# ----------------------------- host-side parameter prep -----------------------------
def init_raw_params(key):
    ks = jax.random.split(key, 12)

    def lin(kw, kb, fan_in, fan_out):
        w = jax.random.normal(kw, (fan_in, fan_out), jnp.float32) / math.sqrt(fan_in)
        b = 0.01 * jax.random.normal(kb, (1, fan_out), jnp.float32)
        return w, b

    wc1 = jax.random.normal(ks[0], (CNN_FILTERS, SINC_FILTERS, CNN_KERNEL),
                            jnp.float32) / math.sqrt(SINC_FILTERS * CNN_KERNEL)
    bc1 = 0.01 * jax.random.normal(ks[1], (CNN_FILTERS,), jnp.float32)
    wc2 = jax.random.normal(ks[2], (CNN_FILTERS, CNN_FILTERS, CNN_KERNEL),
                            jnp.float32) / math.sqrt(CNN_FILTERS * CNN_KERNEL)
    bc2 = 0.01 * jax.random.normal(ks[3], (CNN_FILTERS,), jnp.float32)

    w1, b1 = lin(ks[4], ks[5], DIM_OUT, HIDDEN_DIM)
    w2, b2 = lin(ks[6], ks[7], HIDDEN_DIM, HIDDEN_DIM)
    w3, b3 = lin(ks[8], ks[9], HIDDEN_DIM, HIDDEN_DIM)
    w4, b4 = lin(ks[10], ks[11], HIDDEN_DIM, NUM_CLASSES)

    return dict(sinc=make_sinc_filters(SINC_FILTERS, SINC_KERNEL, SAMPLE_RATE),
                wc1=wc1, bc1=bc1, wc2=wc2, bc2=bc2,
                w1=w1, b1=b1, w2=w2, b2=b2, w3=w3, b3=b3, w4=w4, b4=b4)


def prepare_kernel_inputs(raw):
    """Host-side layout prep (pure glue): block-diagonal weights, pool selectors,
    replicated first-Linear weights and row-sum indicator."""
    eye_b = jnp.eye(BATCH, dtype=jnp.float32)

    def conv_weight_bd(w):                      # (Cout, Cin, K) -> (Cout*B, K*Cin*B)
        return jnp.concatenate(
            [jnp.kron(w[:, :, k], eye_b) for k in range(w.shape[-1])], axis=1)

    def pool_selectors(length):                 # (3, L, L//3) exact 0/1 selection
        p_len = length // MAXPOOL
        r = np.arange(length)[None, :, None]
        p = np.arange(p_len)[None, None, :]
        o = np.arange(MAXPOOL)[:, None, None]
        return jnp.asarray((r == MAXPOOL * p + o).astype(np.float32))

    g_sinc = jnp.kron(raw["sinc"], eye_b)                                # (B*C, B*K)
    w1r = raw["w1"].reshape(CNN_FILTERS, DIM3, HIDDEN_DIM)               # rows c*3+l
    w1hat = jnp.stack([jnp.repeat(w1r[:, l, :], BATCH, axis=0) for l in range(DIM3)],
                      axis=0)                                            # (3, B*C, H)
    esum = jnp.kron(jnp.ones((1, CNN_FILTERS), jnp.float32), eye_b)      # (B, B*C)

    return (
        g_sinc,
        pool_selectors(L_SINC),
        conv_weight_bd(raw["wc1"]), jnp.repeat(raw["bc1"], BATCH)[:, None],
        pool_selectors(L_C1),
        conv_weight_bd(raw["wc2"]), jnp.repeat(raw["bc2"], BATCH)[:, None],
        pool_selectors(L_C2),
        esum, w1hat, raw["b1"],
        raw["w2"], raw["b2"], raw["w3"], raw["b3"], raw["w4"], raw["b4"],
    )


# ----------------------------- pure-JAX reference (host) for self-check -----------------------------
def sincnet_reference(x, raw):
    def ln(v):
        n = v.shape[-1]
        m = jnp.mean(v, axis=-1, keepdims=True)
        sd = jnp.sqrt(jnp.sum((v - m) ** 2, axis=-1, keepdims=True) / (n - 1))
        return (v - m) / (sd + LN_EPS)

    def lrelu(v):
        return jnp.where(v >= 0, v, LRELU * v)

    def conv1d(h, w, b):                         # h (B,Cin,L), w (Cout,Cin,K), b (Cout,)
        k_sz = w.shape[-1]
        lout = h.shape[-1] - k_sz + 1
        out = jnp.zeros((h.shape[0], w.shape[0], lout), jnp.float32)
        for k in range(k_sz):
            out = out + jnp.einsum("oc,bcl->bol", w[:, :, k], h[:, :, k:k + lout],
                                   precision="highest")
        return out + b[None, :, None]

    def pool3(h):
        p = h.shape[-1] // MAXPOOL
        return jnp.max(h[:, :, :p * MAXPOOL].reshape(h.shape[0], h.shape[1], p, MAXPOOL),
                       axis=-1)

    def bn(z):
        m = jnp.mean(z, axis=0, keepdims=True)
        v = jnp.mean((z - m) ** 2, axis=0, keepdims=True)
        return (z - m) * jax.lax.rsqrt(v + BN_EPS)

    batch = x.shape[0]
    h = ln(x)[:, None, :]
    h = jnp.abs(conv1d(h, raw["sinc"][:, None, :], jnp.zeros((SINC_FILTERS,), jnp.float32)))
    h = lrelu(ln(pool3(h)))
    h = lrelu(ln(pool3(conv1d(h, raw["wc1"], raw["bc1"]))))
    h = lrelu(ln(pool3(conv1d(h, raw["wc2"], raw["bc2"]))))
    g = h.reshape(batch, -1)
    for w, b in ((raw["w1"], raw["b1"]), (raw["w2"], raw["b2"]), (raw["w3"], raw["b3"])):
        g = lrelu(bn(jnp.dot(g, w, precision="highest") + b))
    return jnp.dot(g, raw["w4"], precision="highest") + raw["b4"]


if __name__ == "__main__":
    key = jax.random.PRNGKey(0)
    k_in, k_par = jax.random.split(key)
    x = jax.random.normal(k_in, (BATCH, INPUT_DIM), jnp.float32)

    raw = init_raw_params(k_par)
    kernel_inputs = prepare_kernel_inputs(raw)

    out = jax.block_until_ready(sincnet_forward(x, kernel_inputs))
    assert out.shape == (BATCH, NUM_CLASSES), out.shape
    assert bool(jnp.all(jnp.isfinite(out)))

    ref = sincnet_reference(x, raw)
    max_diff = float(jnp.max(jnp.abs(out - ref)))
    assert bool(jnp.allclose(out, ref, rtol=3e-2, atol=3e-2)), max_diff

    print("KERNEL_OK")
</pallas_src>

<mosaic_0001>
module attributes {stable_mosaic.version = 11 : i64} {
  func.func @sincnet_kernel(%arg0: i32, %arg1: memref<2x160xf32, #tpu.memory_space<vmem>>, %arg2: memref<16x34xf32, #tpu.memory_space<vmem>>, %arg3: memref<3x144x48xf32, #tpu.memory_space<vmem>>, %arg4: memref<16x80xf32, #tpu.memory_space<vmem>>, %arg5: memref<16x1xf32, #tpu.memory_space<vmem>>, %arg6: memref<3x44x14xf32, #tpu.memory_space<vmem>>, %arg7: memref<16x80xf32, #tpu.memory_space<vmem>>, %arg8: memref<16x1xf32, #tpu.memory_space<vmem>>, %arg9: memref<3x10x3xf32, #tpu.memory_space<vmem>>, %arg10: memref<2x16xf32, #tpu.memory_space<vmem>>, %arg11: memref<3x16x32xf32, #tpu.memory_space<vmem>>, %arg12: memref<1x32xf32, #tpu.memory_space<vmem>>, %arg13: memref<32x32xf32, #tpu.memory_space<vmem>>, %arg14: memref<1x32xf32, #tpu.memory_space<vmem>>, %arg15: memref<32x32xf32, #tpu.memory_space<vmem>>, %arg16: memref<1x32xf32, #tpu.memory_space<vmem>>, %arg17: memref<32x16xf32, #tpu.memory_space<vmem>>, %arg18: memref<1x16xf32, #tpu.memory_space<vmem>>, %arg19: memref<2x16xf32, #tpu.memory_space<vmem>>) attributes {dimension_semantics = [#tpu.dimension_semantics<arbitrary>], iteration_bounds = array<i64: 1>, scalar_prefetch = 0 : i64, scratch_operands = 0 : i64, tpu.core_type = #tpu.core_type<tc>, window_params = [{pipeline_mode = #tpu.pipeline_mode<synchronous>, transform_indices = @transform_0, window_bounds = array<i64: 2, 160>}, {pipeline_mode = #tpu.pipeline_mode<synchronous>, transform_indices = @transform_1, window_bounds = array<i64: 16, 34>}, {pipeline_mode = #tpu.pipeline_mode<synchronous>, transform_indices = @transform_2, window_bounds = array<i64: 3, 144, 48>}, {pipeline_mode = #tpu.pipeline_mode<synchronous>, transform_indices = @transform_3, window_bounds = array<i64: 16, 80>}, {pipeline_mode = #tpu.pipeline_mode<synchronous>, transform_indices = @transform_4, window_bounds = array<i64: 16, 1>}, {pipeline_mode = #tpu.pipeline_mode<synchronous>, transform_indices = @transform_5, window_bounds = array<i64: 3, 44, 14>}, {pipeline_mode = #tpu.pipeline_mode<synchronous>, transform_indices = @transform_6, window_bounds = array<i64: 16, 80>}, {pipeline_mode = #tpu.pipeline_mode<synchronous>, transform_indices = @transform_7, window_bounds = array<i64: 16, 1>}, {pipeline_mode = #tpu.pipeline_mode<synchronous>, transform_indices = @transform_8, window_bounds = array<i64: 3, 10, 3>}, {pipeline_mode = #tpu.pipeline_mode<synchronous>, transform_indices = @transform_9, window_bounds = array<i64: 2, 16>}, {pipeline_mode = #tpu.pipeline_mode<synchronous>, transform_indices = @transform_10, window_bounds = array<i64: 3, 16, 32>}, {pipeline_mode = #tpu.pipeline_mode<synchronous>, transform_indices = @transform_11, window_bounds = array<i64: 1, 32>}, {pipeline_mode = #tpu.pipeline_mode<synchronous>, transform_indices = @transform_12, window_bounds = array<i64: 32, 32>}, {pipeline_mode = #tpu.pipeline_mode<synchronous>, transform_indices = @transform_13, window_bounds = array<i64: 1, 32>}, {pipeline_mode = #tpu.pipeline_mode<synchronous>, transform_indices = @transform_14, window_bounds = array<i64: 32, 32>}, {pipeline_mode = #tpu.pipeline_mode<synchronous>, transform_indices = @transform_15, window_bounds = array<i64: 1, 32>}, {pipeline_mode = #tpu.pipeline_mode<synchronous>, transform_indices = @transform_16, window_bounds = array<i64: 32, 16>}, {pipeline_mode = #tpu.pipeline_mode<synchronous>, transform_indices = @transform_17, window_bounds = array<i64: 1, 16>}, {pipeline_mode = #tpu.pipeline_mode<synchronous>, transform_indices = @transform_18, window_bounds = array<i64: 2, 16>}]} {
    %c0 = arith.constant 0 : index
    %c0_0 = arith.constant 0 : index
    %0 = vector.load %arg1[%c0, %c0_0] : memref<2x160xf32, #tpu.memory_space<vmem>>, vector<2x160xf32>
    %cst = arith.constant dense<0.000000e+00> : vector<2xf32>
    %1 = vector.multi_reduction <add>, %0, %cst [1] : vector<2x160xf32> to vector<2xf32>
    %2 = vector.shape_cast %1 : vector<2xf32> to vector<2x1xf32>
    %cst_1 = arith.constant 1.600000e+02 : f32
    %3 = vector.broadcast %cst_1 : f32 to vector<2x1xf32>
    %4 = arith.divf %2, %3 : vector<2x1xf32>
    %5 = vector.broadcast %4 : vector<2x1xf32> to vector<2x160xf32>
    %6 = arith.subf %0, %5 : vector<2x160xf32>
    %7 = arith.mulf %6, %6 : vector<2x160xf32>
    %cst_2 = arith.constant dense<0.000000e+00> : vector<2xf32>
    %8 = vector.multi_reduction <add>, %7, %cst_2 [1] : vector<2x160xf32> to vector<2xf32>
    %9 = vector.shape_cast %8 : vector<2xf32> to vector<2x1xf32>
    %cst_3 = arith.constant 1.590000e+02 : f32
    %10 = vector.broadcast %cst_3 : f32 to vector<2x1xf32>
    %11 = arith.divf %9, %10 : vector<2x1xf32>
    %12 = vector.broadcast %4 : vector<2x1xf32> to vector<2x160xf32>
    %13 = arith.subf %0, %12 : vector<2x160xf32>
    %14 = math.sqrt %11 : vector<2x1xf32>
    %cst_4 = arith.constant 9.99999997E-7 : f32
    %15 = vector.broadcast %cst_4 : f32 to vector<2x1xf32>
    %16 = arith.addf %14, %15 : vector<2x1xf32>
    %17 = vector.broadcast %16 : vector<2x1xf32> to vector<2x160xf32>
    %18 = arith.divf %13, %17 : vector<2x160xf32>
    %19 = vector.extract_strided_slice %18 {offsets = [0, 0], sizes = [2, 144], strides = [1, 1]} : vector<2x160xf32> to vector<2x144xf32>
    %20 = vector.extract_strided_slice %18 {offsets = [0, 1], sizes = [2, 144], strides = [1, 1]} : vector<2x160xf32> to vector<2x144xf32>
    %21 = vector.extract_strided_slice %18 {offsets = [0, 2], sizes = [2, 144], strides = [1, 1]} : vector<2x160xf32> to vector<2x144xf32>
    %22 = vector.extract_strided_slice %18 {offsets = [0, 3], sizes = [2, 144], strides = [1, 1]} : vector<2x160xf32> to vector<2x144xf32>
    %23 = vector.extract_strided_slice %18 {offsets = [0, 4], sizes = [2, 144], strides = [1, 1]} : vector<2x160xf32> to vector<2x144xf32>
    %24 = vector.extract_strided_slice %18 {offsets = [0, 5], sizes = [2, 144], strides = [1, 1]} : vector<2x160xf32> to vector<2x144xf32>
    %25 = vector.extract_strided_slice %18 {offsets = [0, 6], sizes = [2, 144], strides = [1, 1]} : vector<2x160xf32> to vector<2x144xf32>
    %26 = vector.extract_strided_slice %18 {offsets = [0, 7], sizes = [2, 144], strides = [1, 1]} : vector<2x160xf32> to vector<2x144xf32>
    %27 = vector.extract_strided_slice %18 {offsets = [0, 8], sizes = [2, 144], strides = [1, 1]} : vector<2x160xf32> to vector<2x144xf32>
    %28 = vector.extract_strided_slice %18 {offsets = [0, 9], sizes = [2, 144], strides = [1, 1]} : vector<2x160xf32> to vector<2x144xf32>
    %29 = vector.extract_strided_slice %18 {offsets = [0, 10], sizes = [2, 144], strides = [1, 1]} : vector<2x160xf32> to vector<2x144xf32>
    %30 = vector.extract_strided_slice %18 {offsets = [0, 11], sizes = [2, 144], strides = [1, 1]} : vector<2x160xf32> to vector<2x144xf32>
    %31 = vector.extract_strided_slice %18 {offsets = [0, 12], sizes = [2, 144], strides = [1, 1]} : vector<2x160xf32> to vector<2x144xf32>
    %32 = vector.extract_strided_slice %18 {offsets = [0, 13], sizes = [2, 144], strides = [1, 1]} : vector<2x160xf32> to vector<2x144xf32>
    %33 = vector.extract_strided_slice %18 {offsets = [0, 14], sizes = [2, 144], strides = [1, 1]} : vector<2x160xf32> to vector<2x144xf32>
    %34 = vector.extract_strided_slice %18 {offsets = [0, 15], sizes = [2, 144], strides = [1, 1]} : vector<2x160xf32> to vector<2x144xf32>
    %35 = vector.extract_strided_slice %18 {offsets = [0, 16], sizes = [2, 144], strides = [1, 1]} : vector<2x160xf32> to vector<2x144xf32>
    %36 = tpu.concatenate %19, %20, %21, %22, %23, %24, %25, %26, %27, %28, %29, %30, %31, %32, %33, %34 in 0 : vector<2x144xf32>, vector<2x144xf32>, vector<2x144xf32>, vector<2x144xf32>, vector<2x144xf32>, vector<2x144xf32>, vector<2x144xf32>, vector<2x144xf32>, vector<2x144xf32>, vector<2x144xf32>, vector<2x144xf32>, vector<2x144xf32>, vector<2x144xf32>, vector<2x144xf32>, vector<2x144xf32>, vector<2x144xf32> -> vector<32x144xf32>
    %37 = tpu.concatenate %36, %35 in 0 : vector<32x144xf32>, vector<2x144xf32> -> vector<34x144xf32>
    %c0_5 = arith.constant 0 : index
    %c0_6 = arith.constant 0 : index
    %38 = vector.load %arg2[%c0_5, %c0_6] : memref<16x34xf32, #tpu.memory_space<vmem>>, vector<16x34xf32>
    %cst_7 = arith.constant dense<0.000000e+00> : vector<16x144xf32>
    %39 = tpu.matmul %38, %37, %cst_7 {dimension_numbers = #tpu.dot_dimension_numbers<[1], [0], [0], [1], [0, 0, 1, 1], [], []>, precision = #tpu.contract_precision<fp32>} : vector<16x34xf32>, vector<34x144xf32>, vector<16x144xf32> -> vector<16x144xf32>
    %40 = math.absf %39 : vector<16x144xf32>
    %c0_8 = arith.constant 0 : index
    %c0_9 = arith.constant 0 : index
    %c0_10 = arith.constant 0 : index
    %41 = vector.load %arg3[%c0_8, %c0_9, %c0_10] : memref<3x144x48xf32, #tpu.memory_space<vmem>>, vector<1x144x48xf32>
    %42 = vector.shape_cast %41 : vector<1x144x48xf32> to vector<144x48xf32>
    %cst_11 = arith.constant dense<0.000000e+00> : vector<16x48xf32>
    %43 = tpu.matmul %40, %42, %cst_11 {dimension_numbers = #tpu.dot_dimension_numbers<[1], [0], [0], [1], [0, 0, 1, 1], [], []>, precision = #tpu.contract_precision<fp32>} : vector<16x144xf32>, vector<144x48xf32>, vector<16x48xf32> -> vector<16x48xf32>
    %c1 = arith.constant 1 : index
    %c0_12 = arith.constant 0 : index
    %c0_13 = arith.constant 0 : index
    %44 = vector.load %arg3[%c1, %c0_12, %c0_13] : memref<3x144x48xf32, #tpu.memory_space<vmem>>, vector<1x144x48xf32>
    %45 = vector.shape_cast %44 : vector<1x144x48xf32> to vector<144x48xf32>
    %cst_14 = arith.constant dense<0.000000e+00> : vector<16x48xf32>
    %46 = tpu.matmul %40, %45, %cst_14 {dimension_numbers = #tpu.dot_dimension_numbers<[1], [0], [0], [1], [0, 0, 1, 1], [], []>, precision = #tpu.contract_precision<fp32>} : vector<16x144xf32>, vector<144x48xf32>, vector<16x48xf32> -> vector<16x48xf32>
    %47 = arith.maximumf %43, %46 : vector<16x48xf32>
    %c2 = arith.constant 2 : index
    %c0_15 = arith.constant 0 : index
    %c0_16 = arith.constant 0 : index
    %48 = vector.load %arg3[%c2, %c0_15, %c0_16] : memref<3x144x48xf32, #tpu.memory_space<vmem>>, vector<1x144x48xf32>
    %49 = vector.shape_cast %48 : vector<1x144x48xf32> to vector<144x48xf32>
    %cst_17 = arith.constant dense<0.000000e+00> : vector<16x48xf32>
    %50 = tpu.matmul %40, %49, %cst_17 {dimension_numbers = #tpu.dot_dimension_numbers<[1], [0], [0], [1], [0, 0, 1, 1], [], []>, precision = #tpu.contract_precision<fp32>} : vector<16x144xf32>, vector<144x48xf32>, vector<16x48xf32> -> vector<16x48xf32>
    %51 = arith.maximumf %47, %50 : vector<16x48xf32>
    %cst_18 = arith.constant dense<0.000000e+00> : vector<16xf32>
    %52 = vector.multi_reduction <add>, %51, %cst_18 [1] : vector<16x48xf32> to vector<16xf32>
    %53 = vector.shape_cast %52 : vector<16xf32> to vector<16x1xf32>
    %cst_19 = arith.constant 4.800000e+01 : f32
    %54 = vector.broadcast %cst_19 : f32 to vector<16x1xf32>
    %55 = arith.divf %53, %54 : vector<16x1xf32>
    %56 = vector.broadcast %55 : vector<16x1xf32> to vector<16x48xf32>
    %57 = arith.subf %51, %56 : vector<16x48xf32>
    %58 = arith.mulf %57, %57 : vector<16x48xf32>
    %cst_20 = arith.constant dense<0.000000e+00> : vector<16xf32>
    %59 = vector.multi_reduction <add>, %58, %cst_20 [1] : vector<16x48xf32> to vector<16xf32>
    %60 = vector.shape_cast %59 : vector<16xf32> to vector<16x1xf32>
    %cst_21 = arith.constant 4.700000e+01 : f32
    %61 = vector.broadcast %cst_21 : f32 to vector<16x1xf32>
    %62 = arith.divf %60, %61 : vector<16x1xf32>
    %63 = vector.broadcast %55 : vector<16x1xf32> to vector<16x48xf32>
    %64 = arith.subf %51, %63 : vector<16x48xf32>
    %65 = math.sqrt %62 : vector<16x1xf32>
    %cst_22 = arith.constant 9.99999997E-7 : f32
    %66 = vector.broadcast %cst_22 : f32 to vector<16x1xf32>
    %67 = arith.addf %65, %66 : vector<16x1xf32>
    %68 = vector.broadcast %67 : vector<16x1xf32> to vector<16x48xf32>
    %69 = arith.divf %64, %68 : vector<16x48xf32>
    %cst_23 = arith.constant 0.000000e+00 : f32
    %70 = vector.broadcast %cst_23 : f32 to vector<16x48xf32>
    %71 = arith.cmpf oge, %69, %70 : vector<16x48xf32>
    %cst_24 = arith.constant 0.00999999977 : f32
    %72 = vector.broadcast %cst_24 : f32 to vector<16x48xf32>
    %73 = arith.mulf %72, %69 : vector<16x48xf32>
    %74 = arith.select %71, %69, %73 : vector<16x48xi1>, vector<16x48xf32>
    %75 = vector.extract_strided_slice %74 {offsets = [0, 0], sizes = [16, 44], strides = [1, 1]} : vector<16x48xf32> to vector<16x44xf32>
    %76 = vector.extract_strided_slice %74 {offsets = [0, 1], sizes = [16, 44], strides = [1, 1]} : vector<16x48xf32> to vector<16x44xf32>
    %77 = vector.extract_strided_slice %74 {offsets = [0, 2], sizes = [16, 44], strides = [1, 1]} : vector<16x48xf32> to vector<16x44xf32>
    %78 = vector.extract_strided_slice %74 {offsets = [0, 3], sizes = [16, 44], strides = [1, 1]} : vector<16x48xf32> to vector<16x44xf32>
    %79 = vector.extract_strided_slice %74 {offsets = [0, 4], sizes = [16, 44], strides = [1, 1]} : vector<16x48xf32> to vector<16x44xf32>
    %80 = tpu.concatenate %75, %76, %77, %78, %79 in 0 : vector<16x44xf32>, vector<16x44xf32>, vector<16x44xf32>, vector<16x44xf32>, vector<16x44xf32> -> vector<80x44xf32>
    %c0_25 = arith.constant 0 : index
    %c0_26 = arith.constant 0 : index
    %81 = vector.load %arg4[%c0_25, %c0_26] : memref<16x80xf32, #tpu.memory_space<vmem>>, vector<16x80xf32>
    %cst_27 = arith.constant dense<0.000000e+00> : vector<16x44xf32>
    %82 = tpu.matmul %81, %80, %cst_27 {dimension_numbers = #tpu.dot_dimension_numbers<[1], [0], [0], [1], [0, 0, 1, 1], [], []>, precision = #tpu.contract_precision<fp32>} : vector<16x80xf32>, vector<80x44xf32>, vector<16x44xf32> -> vector<16x44xf32>
    %c0_28 = arith.constant 0 : index
    %c0_29 = arith.constant 0 : index
    %83 = vector.load %arg5[%c0_28, %c0_29] : memref<16x1xf32, #tpu.memory_space<vmem>>, vector<16x1xf32>
    %84 = vector.broadcast %83 : vector<16x1xf32> to vector<16x44xf32>
    %85 = arith.addf %82, %84 : vector<16x44xf32>
    %c0_30 = arith.constant 0 : index
    %c0_31 = arith.constant 0 : index
    %c0_32 = arith.constant 0 : index
    %86 = vector.load %arg6[%c0_30, %c0_31, %c0_32] : memref<3x44x14xf32, #tpu.memory_space<vmem>>, vector<1x44x14xf32>
    %87 = vector.shape_cast %86 : vector<1x44x14xf32> to vector<44x14xf32>
    %cst_33 = arith.constant dense<0.000000e+00> : vector<16x14xf32>
    %88 = tpu.matmul %85, %87, %cst_33 {dimension_numbers = #tpu.dot_dimension_numbers<[1], [0], [0], [1], [0, 0, 1, 1], [], []>, precision = #tpu.contract_precision<fp32>} : vector<16x44xf32>, vector<44x14xf32>, vector<16x14xf32> -> vector<16x14xf32>
    %c1_34 = arith.constant 1 : index
    %c0_35 = arith.constant 0 : index
    %c0_36 = arith.constant 0 : index
    %89 = vector.load %arg6[%c1_34, %c0_35, %c0_36] : memref<3x44x14xf32, #tpu.memory_space<vmem>>, vector<1x44x14xf32>
    %90 = vector.shape_cast %89 : vector<1x44x14xf32> to vector<44x14xf32>
    %cst_37 = arith.constant dense<0.000000e+00> : vector<16x14xf32>
    %91 = tpu.matmul %85, %90, %cst_37 {dimension_numbers = #tpu.dot_dimension_numbers<[1], [0], [0], [1], [0, 0, 1, 1], [], []>, precision = #tpu.contract_precision<fp32>} : vector<16x44xf32>, vector<44x14xf32>, vector<16x14xf32> -> vector<16x14xf32>
    %92 = arith.maximumf %88, %91 : vector<16x14xf32>
    %c2_38 = arith.constant 2 : index
    %c0_39 = arith.constant 0 : index
    %c0_40 = arith.constant 0 : index
    %93 = vector.load %arg6[%c2_38, %c0_39, %c0_40] : memref<3x44x14xf32, #tpu.memory_space<vmem>>, vector<1x44x14xf32>
    %94 = vector.shape_cast %93 : vector<1x44x14xf32> to vector<44x14xf32>
    %cst_41 = arith.constant dense<0.000000e+00> : vector<16x14xf32>
    %95 = tpu.matmul %85, %94, %cst_41 {dimension_numbers = #tpu.dot_dimension_numbers<[1], [0], [0], [1], [0, 0, 1, 1], [], []>, precision = #tpu.contract_precision<fp32>} : vector<16x44xf32>, vector<44x14xf32>, vector<16x14xf32> -> vector<16x14xf32>
    %96 = arith.maximumf %92, %95 : vector<16x14xf32>
    %cst_42 = arith.constant dense<0.000000e+00> : vector<16xf32>
    %97 = vector.multi_reduction <add>, %96, %cst_42 [1] : vector<16x14xf32> to vector<16xf32>
    %98 = vector.shape_cast %97 : vector<16xf32> to vector<16x1xf32>
    %cst_43 = arith.constant 1.400000e+01 : f32
    %99 = vector.broadcast %cst_43 : f32 to vector<16x1xf32>
    %100 = arith.divf %98, %99 : vector<16x1xf32>
    %101 = vector.broadcast %100 : vector<16x1xf32> to vector<16x14xf32>
    %102 = arith.subf %96, %101 : vector<16x14xf32>
    %103 = arith.mulf %102, %102 : vector<16x14xf32>
    %cst_44 = arith.constant dense<0.000000e+00> : vector<16xf32>
    %104 = vector.multi_reduction <add>, %103, %cst_44 [1] : vector<16x14xf32> to vector<16xf32>
    %105 = vector.shape_cast %104 : vector<16xf32> to vector<16x1xf32>
    %cst_45 = arith.constant 1.300000e+01 : f32
    %106 = vector.broadcast %cst_45 : f32 to vector<16x1xf32>
    %107 = arith.divf %105, %106 : vector<16x1xf32>
    %108 = vector.broadcast %100 : vector<16x1xf32> to vector<16x14xf32>
    %109 = arith.subf %96, %108 : vector<16x14xf32>
    %110 = math.sqrt %107 : vector<16x1xf32>
    %cst_46 = arith.constant 9.99999997E-7 : f32
    %111 = vector.broadcast %cst_46 : f32 to vector<16x1xf32>
    %112 = arith.addf %110, %111 : vector<16x1xf32>
    %113 = vector.broadcast %112 : vector<16x1xf32> to vector<16x14xf32>
    %114 = arith.divf %109, %113 : vector<16x14xf32>
    %cst_47 = arith.constant 0.000000e+00 : f32
    %115 = vector.broadcast %cst_47 : f32 to vector<16x14xf32>
    %116 = arith.cmpf oge, %114, %115 : vector<16x14xf32>
    %cst_48 = arith.constant 0.00999999977 : f32
    %117 = vector.broadcast %cst_48 : f32 to vector<16x14xf32>
    %118 = arith.mulf %117, %114 : vector<16x14xf32>
    %119 = arith.select %116, %114, %118 : vector<16x14xi1>, vector<16x14xf32>
    %120 = vector.extract_strided_slice %119 {offsets = [0, 0], sizes = [16, 10], strides = [1, 1]} : vector<16x14xf32> to vector<16x10xf32>
    %121 = vector.extract_strided_slice %119 {offsets = [0, 1], sizes = [16, 10], strides = [1, 1]} : vector<16x14xf32> to vector<16x10xf32>
    %122 = vector.extract_strided_slice %119 {offsets = [0, 2], sizes = [16, 10], strides = [1, 1]} : vector<16x14xf32> to vector<16x10xf32>
    %123 = vector.extract_strided_slice %119 {offsets = [0, 3], sizes = [16, 10], strides = [1, 1]} : vector<16x14xf32> to vector<16x10xf32>
    %124 = vector.extract_strided_slice %119 {offsets = [0, 4], sizes = [16, 10], strides = [1, 1]} : vector<16x14xf32> to vector<16x10xf32>
    %125 = tpu.concatenate %120, %121, %122, %123, %124 in 0 : vector<16x10xf32>, vector<16x10xf32>, vector<16x10xf32>, vector<16x10xf32>, vector<16x10xf32> -> vector<80x10xf32>
    %c0_49 = arith.constant 0 : index
    %c0_50 = arith.constant 0 : index
    %126 = vector.load %arg7[%c0_49, %c0_50] : memref<16x80xf32, #tpu.memory_space<vmem>>, vector<16x80xf32>
    %cst_51 = arith.constant dense<0.000000e+00> : vector<16x10xf32>
    %127 = tpu.matmul %126, %125, %cst_51 {dimension_numbers = #tpu.dot_dimension_numbers<[1], [0], [0], [1], [0, 0, 1, 1], [], []>, precision = #tpu.contract_precision<fp32>} : vector<16x80xf32>, vector<80x10xf32>, vector<16x10xf32> -> vector<16x10xf32>
    %c0_52 = arith.constant 0 : index
    %c0_53 = arith.constant 0 : index
    %128 = vector.load %arg8[%c0_52, %c0_53] : memref<16x1xf32, #tpu.memory_space<vmem>>, vector<16x1xf32>
    %129 = vector.broadcast %128 : vector<16x1xf32> to vector<16x10xf32>
    %130 = arith.addf %127, %129 : vector<16x10xf32>
    %c0_54 = arith.constant 0 : index
    %c0_55 = arith.constant 0 : index
    %c0_56 = arith.constant 0 : index
    %131 = vector.load %arg9[%c0_54, %c0_55, %c0_56] : memref<3x10x3xf32, #tpu.memory_space<vmem>>, vector<1x10x3xf32>
    %132 = vector.shape_cast %131 : vector<1x10x3xf32> to vector<10x3xf32>
    %cst_57 = arith.constant dense<0.000000e+00> : vector<16x3xf32>
    %133 = tpu.matmul %130, %132, %cst_57 {dimension_numbers = #tpu.dot_dimension_numbers<[1], [0], [0], [1], [0, 0, 1, 1], [], []>, precision = #tpu.contract_precision<fp32>} : vector<16x10xf32>, vector<10x3xf32>, vector<16x3xf32> -> vector<16x3xf32>
    %c1_58 = arith.constant 1 : index
    %c0_59 = arith.constant 0 : index
    %c0_60 = arith.constant 0 : index
    %134 = vector.load %arg9[%c1_58, %c0_59, %c0_60] : memref<3x10x3xf32, #tpu.memory_space<vmem>>, vector<1x10x3xf32>
    %135 = vector.shape_cast %134 : vector<1x10x3xf32> to vector<10x3xf32>
    %cst_61 = arith.constant dense<0.000000e+00> : vector<16x3xf32>
    %136 = tpu.matmul %130, %135, %cst_61 {dimension_numbers = #tpu.dot_dimension_numbers<[1], [0], [0], [1], [0, 0, 1, 1], [], []>, precision = #tpu.contract_precision<fp32>} : vector<16x10xf32>, vector<10x3xf32>, vector<16x3xf32> -> vector<16x3xf32>
    %137 = arith.maximumf %133, %136 : vector<16x3xf32>
    %c2_62 = arith.constant 2 : index
    %c0_63 = arith.constant 0 : index
    %c0_64 = arith.constant 0 : index
    %138 = vector.load %arg9[%c2_62, %c0_63, %c0_64] : memref<3x10x3xf32, #tpu.memory_space<vmem>>, vector<1x10x3xf32>
    %139 = vector.shape_cast %138 : vector<1x10x3xf32> to vector<10x3xf32>
    %cst_65 = arith.constant dense<0.000000e+00> : vector<16x3xf32>
    %140 = tpu.matmul %130, %139, %cst_65 {dimension_numbers = #tpu.dot_dimension_numbers<[1], [0], [0], [1], [0, 0, 1, 1], [], []>, precision = #tpu.contract_precision<fp32>} : vector<16x10xf32>, vector<10x3xf32>, vector<16x3xf32> -> vector<16x3xf32>
    %141 = arith.maximumf %137, %140 : vector<16x3xf32>
    %cst_66 = arith.constant dense<0.000000e+00> : vector<16xf32>
    %142 = vector.multi_reduction <add>, %141, %cst_66 [1] : vector<16x3xf32> to vector<16xf32>
    %143 = vector.shape_cast %142 : vector<16xf32> to vector<16x1xf32>
    %cst_67 = arith.constant 3.000000e+00 : f32
    %144 = vector.broadcast %cst_67 : f32 to vector<16x1xf32>
    %145 = arith.divf %143, %144 : vector<16x1xf32>
    %146 = vector.broadcast %145 : vector<16x1xf32> to vector<16x3xf32>
    %147 = arith.subf %141, %146 : vector<16x3xf32>
    %148 = arith.mulf %147, %147 : vector<16x3xf32>
    %cst_68 = arith.constant dense<0.000000e+00> : vector<16xf32>
    %149 = vector.multi_reduction <add>, %148, %cst_68 [1] : vector<16x3xf32> to vector<16xf32>
    %150 = vector.shape_cast %149 : vector<16xf32> to vector<16x1xf32>
    %cst_69 = arith.constant 2.000000e+00 : f32
    %151 = vector.broadcast %cst_69 : f32 to vector<16x1xf32>
    %152 = arith.divf %150, %151 : vector<16x1xf32>
    %153 = vector.broadcast %145 : vector<16x1xf32> to vector<16x3xf32>
    %154 = arith.subf %141, %153 : vector<16x3xf32>
    %155 = math.sqrt %152 : vector<16x1xf32>
    %cst_70 = arith.constant 9.99999997E-7 : f32
    %156 = vector.broadcast %cst_70 : f32 to vector<16x1xf32>
    %157 = arith.addf %155, %156 : vector<16x1xf32>
    %158 = vector.broadcast %157 : vector<16x1xf32> to vector<16x3xf32>
    %159 = arith.divf %154, %158 : vector<16x3xf32>
    %cst_71 = arith.constant 0.000000e+00 : f32
    %160 = vector.broadcast %cst_71 : f32 to vector<16x3xf32>
    %161 = arith.cmpf oge, %159, %160 : vector<16x3xf32>
    %cst_72 = arith.constant 0.00999999977 : f32
    %162 = vector.broadcast %cst_72 : f32 to vector<16x3xf32>
    %163 = arith.mulf %162, %159 : vector<16x3xf32>
    %164 = arith.select %161, %159, %163 : vector<16x3xi1>, vector<16x3xf32>
    %165 = vector.extract_strided_slice %164 {offsets = [0, 0], sizes = [16, 1], strides = [1, 1]} : vector<16x3xf32> to vector<16x1xf32>
    %c0_73 = arith.constant 0 : index
    %c0_74 = arith.constant 0 : index
    %c0_75 = arith.constant 0 : index
    %166 = vector.load %arg11[%c0_73, %c0_74, %c0_75] : memref<3x16x32xf32, #tpu.memory_space<vmem>>, vector<1x16x32xf32>
    %167 = vector.shape_cast %166 : vector<1x16x32xf32> to vector<16x32xf32>
    %168 = vector.broadcast %165 : vector<16x1xf32> to vector<16x32xf32>
    %169 = arith.mulf %168, %167 : vector<16x32xf32>
    %170 = vector.extract_strided_slice %164 {offsets = [0, 1], sizes = [16, 1], strides = [1, 1]} : vector<16x3xf32> to vector<16x1xf32>
    %c1_76 = arith.constant 1 : index
    %c0_77 = arith.constant 0 : index
    %c0_78 = arith.constant 0 : index
    %171 = vector.load %arg11[%c1_76, %c0_77, %c0_78] : memref<3x16x32xf32, #tpu.memory_space<vmem>>, vector<1x16x32xf32>
    %172 = vector.shape_cast %171 : vector<1x16x32xf32> to vector<16x32xf32>
    %173 = vector.broadcast %170 : vector<16x1xf32> to vector<16x32xf32>
    %174 = arith.mulf %173, %172 : vector<16x32xf32>
    %175 = arith.addf %169, %174 : vector<16x32xf32>
    %176 = vector.extract_strided_slice %164 {offsets = [0, 2], sizes = [16, 1], strides = [1, 1]} : vector<16x3xf32> to vector<16x1xf32>
    %c2_79 = arith.constant 2 : index
    %c0_80 = arith.constant 0 : index
    %c0_81 = arith.constant 0 : index
    %177 = vector.load %arg11[%c2_79, %c0_80, %c0_81] : memref<3x16x32xf32, #tpu.memory_space<vmem>>, vector<1x16x32xf32>
    %178 = vector.shape_cast %177 : vector<1x16x32xf32> to vector<16x32xf32>
    %179 = vector.broadcast %176 : vector<16x1xf32> to vector<16x32xf32>
    %180 = arith.mulf %179, %178 : vector<16x32xf32>
    %181 = arith.addf %175, %180 : vector<16x32xf32>
    %c0_82 = arith.constant 0 : index
    %c0_83 = arith.constant 0 : index
    %182 = vector.load %arg10[%c0_82, %c0_83] : memref<2x16xf32, #tpu.memory_space<vmem>>, vector<2x16xf32>
    %cst_84 = arith.constant dense<0.000000e+00> : vector<2x32xf32>
    %183 = tpu.matmul %182, %181, %cst_84 {dimension_numbers = #tpu.dot_dimension_numbers<[1], [0], [0], [1], [0, 0, 1, 1], [], []>, precision = #tpu.contract_precision<fp32>} : vector<2x16xf32>, vector<16x32xf32>, vector<2x32xf32> -> vector<2x32xf32>
    %c0_85 = arith.constant 0 : index
    %c0_86 = arith.constant 0 : index
    %184 = vector.load %arg12[%c0_85, %c0_86] : memref<1x32xf32, #tpu.memory_space<vmem>>, vector<1x32xf32>
    %185 = vector.broadcast %184 : vector<1x32xf32> to vector<2x32xf32>
    %186 = arith.addf %183, %185 : vector<2x32xf32>
    %cst_87 = arith.constant dense<0.000000e+00> : vector<32xf32>
    %187 = vector.multi_reduction <add>, %186, %cst_87 [0] : vector<2x32xf32> to vector<32xf32>
    %188 = vector.shape_cast %187 : vector<32xf32> to vector<1x32xf32>
    %cst_88 = arith.constant 2.000000e+00 : f32
    %189 = vector.broadcast %cst_88 : f32 to vector<1x32xf32>
    %190 = arith.divf %188, %189 : vector<1x32xf32>
    %191 = vector.broadcast %190 : vector<1x32xf32> to vector<2x32xf32>
    %192 = arith.subf %186, %191 : vector<2x32xf32>
    %193 = arith.mulf %192, %192 : vector<2x32xf32>
    %cst_89 = arith.constant dense<0.000000e+00> : vector<32xf32>
    %194 = vector.multi_reduction <add>, %193, %cst_89 [0] : vector<2x32xf32> to vector<32xf32>
    %195 = vector.shape_cast %194 : vector<32xf32> to vector<1x32xf32>
    %cst_90 = arith.constant 2.000000e+00 : f32
    %196 = vector.broadcast %cst_90 : f32 to vector<1x32xf32>
    %197 = arith.divf %195, %196 : vector<1x32xf32>
    %198 = vector.broadcast %190 : vector<1x32xf32> to vector<2x32xf32>
    %199 = arith.subf %186, %198 : vector<2x32xf32>
    %cst_91 = arith.constant 9.99999974E-6 : f32
    %200 = vector.broadcast %cst_91 : f32 to vector<1x32xf32>
    %201 = arith.addf %197, %200 : vector<1x32xf32>
    %202 = math.rsqrt %201 : vector<1x32xf32>
    %203 = vector.broadcast %202 : vector<1x32xf32> to vector<2x32xf32>
    %204 = arith.mulf %199, %203 : vector<2x32xf32>
    %cst_92 = arith.constant 0.000000e+00 : f32
    %205 = vector.broadcast %cst_92 : f32 to vector<2x32xf32>
    %206 = arith.cmpf oge, %204, %205 : vector<2x32xf32>
    %cst_93 = arith.constant 0.00999999977 : f32
    %207 = vector.broadcast %cst_93 : f32 to vector<2x32xf32>
    %208 = arith.mulf %207, %204 : vector<2x32xf32>
    %209 = arith.select %206, %204, %208 : vector<2x32xi1>, vector<2x32xf32>
    %c0_94 = arith.constant 0 : index
    %c0_95 = arith.constant 0 : index
    %210 = vector.load %arg13[%c0_94, %c0_95] : memref<32x32xf32, #tpu.memory_space<vmem>>, vector<32x32xf32>
    %cst_96 = arith.constant dense<0.000000e+00> : vector<2x32xf32>
    %211 = tpu.matmul %209, %210, %cst_96 {dimension_numbers = #tpu.dot_dimension_numbers<[1], [0], [0], [1], [0, 0, 1, 1], [], []>, precision = #tpu.contract_precision<fp32>} : vector<2x32xf32>, vector<32x32xf32>, vector<2x32xf32> -> vector<2x32xf32>
    %c0_97 = arith.constant 0 : index
    %c0_98 = arith.constant 0 : index
    %212 = vector.load %arg14[%c0_97, %c0_98] : memref<1x32xf32, #tpu.memory_space<vmem>>, vector<1x32xf32>
    %213 = vector.broadcast %212 : vector<1x32xf32> to vector<2x32xf32>
    %214 = arith.addf %211, %213 : vector<2x32xf32>
    %cst_99 = arith.constant dense<0.000000e+00> : vector<32xf32>
    %215 = vector.multi_reduction <add>, %214, %cst_99 [0] : vector<2x32xf32> to vector<32xf32>
    %216 = vector.shape_cast %215 : vector<32xf32> to vector<1x32xf32>
    %cst_100 = arith.constant 2.000000e+00 : f32
    %217 = vector.broadcast %cst_100 : f32 to vector<1x32xf32>
    %218 = arith.divf %216, %217 : vector<1x32xf32>
    %219 = vector.broadcast %218 : vector<1x32xf32> to vector<2x32xf32>
    %220 = arith.subf %214, %219 : vector<2x32xf32>
    %221 = arith.mulf %220, %220 : vector<2x32xf32>
    %cst_101 = arith.constant dense<0.000000e+00> : vector<32xf32>
    %222 = vector.multi_reduction <add>, %221, %cst_101 [0] : vector<2x32xf32> to vector<32xf32>
    %223 = vector.shape_cast %222 : vector<32xf32> to vector<1x32xf32>
    %cst_102 = arith.constant 2.000000e+00 : f32
    %224 = vector.broadcast %cst_102 : f32 to vector<1x32xf32>
    %225 = arith.divf %223, %224 : vector<1x32xf32>
    %226 = vector.broadcast %218 : vector<1x32xf32> to vector<2x32xf32>
    %227 = arith.subf %214, %226 : vector<2x32xf32>
    %cst_103 = arith.constant 9.99999974E-6 : f32
    %228 = vector.broadcast %cst_103 : f32 to vector<1x32xf32>
    %229 = arith.addf %225, %228 : vector<1x32xf32>
    %230 = math.rsqrt %229 : vector<1x32xf32>
    %231 = vector.broadcast %230 : vector<1x32xf32> to vector<2x32xf32>
    %232 = arith.mulf %227, %231 : vector<2x32xf32>
    %cst_104 = arith.constant 0.000000e+00 : f32
    %233 = vector.broadcast %cst_104 : f32 to vector<2x32xf32>
    %234 = arith.cmpf oge, %232, %233 : vector<2x32xf32>
    %cst_105 = arith.constant 0.00999999977 : f32
    %235 = vector.broadcast %cst_105 : f32 to vector<2x32xf32>
    %236 = arith.mulf %235, %232 : vector<2x32xf32>
    %237 = arith.select %234, %232, %236 : vector<2x32xi1>, vector<2x32xf32>
    %c0_106 = arith.constant 0 : index
    %c0_107 = arith.constant 0 : index
    %238 = vector.load %arg15[%c0_106, %c0_107] : memref<32x32xf32, #tpu.memory_space<vmem>>, vector<32x32xf32>
    %cst_108 = arith.constant dense<0.000000e+00> : vector<2x32xf32>
    %239 = tpu.matmul %237, %238, %cst_108 {dimension_numbers = #tpu.dot_dimension_numbers<[1], [0], [0], [1], [0, 0, 1, 1], [], []>, precision = #tpu.contract_precision<fp32>} : vector<2x32xf32>, vector<32x32xf32>, vector<2x32xf32> -> vector<2x32xf32>
    %c0_109 = arith.constant 0 : index
    %c0_110 = arith.constant 0 : index
    %240 = vector.load %arg16[%c0_109, %c0_110] : memref<1x32xf32, #tpu.memory_space<vmem>>, vector<1x32xf32>
    %241 = vector.broadcast %240 : vector<1x32xf32> to vector<2x32xf32>
    %242 = arith.addf %239, %241 : vector<2x32xf32>
    %cst_111 = arith.constant dense<0.000000e+00> : vector<32xf32>
    %243 = vector.multi_reduction <add>, %242, %cst_111 [0] : vector<2x32xf32> to vector<32xf32>
    %244 = vector.shape_cast %243 : vector<32xf32> to vector<1x32xf32>
    %cst_112 = arith.constant 2.000000e+00 : f32
    %245 = vector.broadcast %cst_112 : f32 to vector<1x32xf32>
    %246 = arith.divf %244, %245 : vector<1x32xf32>
    %247 = vector.broadcast %246 : vector<1x32xf32> to vector<2x32xf32>
    %248 = arith.subf %242, %247 : vector<2x32xf32>
    %249 = arith.mulf %248, %248 : vector<2x32xf32>
    %cst_113 = arith.constant dense<0.000000e+00> : vector<32xf32>
    %250 = vector.multi_reduction <add>, %249, %cst_113 [0] : vector<2x32xf32> to vector<32xf32>
    %251 = vector.shape_cast %250 : vector<32xf32> to vector<1x32xf32>
    %cst_114 = arith.constant 2.000000e+00 : f32
    %252 = vector.broadcast %cst_114 : f32 to vector<1x32xf32>
    %253 = arith.divf %251, %252 : vector<1x32xf32>
    %254 = vector.broadcast %246 : vector<1x32xf32> to vector<2x32xf32>
    %255 = arith.subf %242, %254 : vector<2x32xf32>
    %cst_115 = arith.constant 9.99999974E-6 : f32
    %256 = vector.broadcast %cst_115 : f32 to vector<1x32xf32>
    %257 = arith.addf %253, %256 : vector<1x32xf32>
    %258 = math.rsqrt %257 : vector<1x32xf32>
    %259 = vector.broadcast %258 : vector<1x32xf32> to vector<2x32xf32>
    %260 = arith.mulf %255, %259 : vector<2x32xf32>
    %cst_116 = arith.constant 0.000000e+00 : f32
    %261 = vector.broadcast %cst_116 : f32 to vector<2x32xf32>
    %262 = arith.cmpf oge, %260, %261 : vector<2x32xf32>
    %cst_117 = arith.constant 0.00999999977 : f32
    %263 = vector.broadcast %cst_117 : f32 to vector<2x32xf32>
    %264 = arith.mulf %263, %260 : vector<2x32xf32>
    %265 = arith.select %262, %260, %264 : vector<2x32xi1>, vector<2x32xf32>
    %c0_118 = arith.constant 0 : index
    %c0_119 = arith.constant 0 : index
    %266 = vector.load %arg17[%c0_118, %c0_119] : memref<32x16xf32, #tpu.memory_space<vmem>>, vector<32x16xf32>
    %cst_120 = arith.constant dense<0.000000e+00> : vector<2x16xf32>
    %267 = tpu.matmul %265, %266, %cst_120 {dimension_numbers = #tpu.dot_dimension_numbers<[1], [0], [0], [1], [0, 0, 1, 1], [], []>, precision = #tpu.contract_precision<fp32>} : vector<2x32xf32>, vector<32x16xf32>, vector<2x16xf32> -> vector<2x16xf32>
    %c0_121 = arith.constant 0 : index
    %c0_122 = arith.constant 0 : index
    %268 = vector.load %arg18[%c0_121, %c0_122] : memref<1x16xf32, #tpu.memory_space<vmem>>, vector<1x16xf32>
    %269 = vector.broadcast %268 : vector<1x16xf32> to vector<2x16xf32>
    %270 = arith.addf %267, %269 : vector<2x16xf32>
    %c0_123 = arith.constant 0 : index
    %c0_124 = arith.constant 0 : index
    %271 = vector.load %arg19[%c0_123, %c0_124] : memref<2x16xf32, #tpu.memory_space<vmem>>, vector<2x16xf32>
    tpu.vector_store %arg19[%c0_123, %c0_124], %270 {strides = array<i32>} : memref<2x16xf32, #tpu.memory_space<vmem>>, vector<2x16xf32>,
    return
  }
  func.func @transform_0(%arg0: i32) -> (i32, i32) {
    %c0_i32 = arith.constant 0 : i32
    %c0_i32_0 = arith.constant 0 : i32
    %c0_i32_1 = arith.constant 0 : i32
    return %c0_i32, %c0_i32_0 : i32, i32
  }
  func.func @transform_1(%arg0: i32) -> (i32, i32) {
    %c0_i32 = arith.constant 0 : i32
    %c0_i32_0 = arith.constant 0 : i32
    %c0_i32_1 = arith.constant 0 : i32
    return %c0_i32, %c0_i32_0 : i32, i32
  }
  func.func @transform_2(%arg0: i32) -> (i32, i32, i32) {
    %c0_i32 = arith.constant 0 : i32
    %c0_i32_0 = arith.constant 0 : i32
    %c0_i32_1 = arith.constant 0 : i32
    %c0_i32_2 = arith.constant 0 : i32
    return %c0_i32, %c0_i32_0, %c0_i32_1 : i32, i32, i32
  }
  func.func @transform_3(%arg0: i32) -> (i32, i32) {
    %c0_i32 = arith.constant 0 : i32
    %c0_i32_0 = arith.constant 0 : i32
    %c0_i32_1 = arith.constant 0 : i32
    return %c0_i32, %c0_i32_0 : i32, i32
  }
  func.func @transform_4(%arg0: i32) -> (i32, i32) {
    %c0_i32 = arith.constant 0 : i32
    %c0_i32_0 = arith.constant 0 : i32
    %c0_i32_1 = arith.constant 0 : i32
    return %c0_i32, %c0_i32_0 : i32, i32
  }
  func.func @transform_5(%arg0: i32) -> (i32, i32, i32) {
    %c0_i32 = arith.constant 0 : i32
    %c0_i32_0 = arith.constant 0 : i32
    %c0_i32_1 = arith.constant 0 : i32
    %c0_i32_2 = arith.constant 0 : i32
    return %c0_i32, %c0_i32_0, %c0_i32_1 : i32, i32, i32
  }
  func.func @transform_6(%arg0: i32) -> (i32, i32) {
    %c0_i32 = arith.constant 0 : i32
    %c0_i32_0 = arith.constant 0 : i32
    %c0_i32_1 = arith.constant 0 : i32
    return %c0_i32, %c0_i32_0 : i32, i32
  }
  func.func @transform_7(%arg0: i32) -> (i32, i32) {
    %c0_i32 = arith.constant 0 : i32
    %c0_i32_0 = arith.constant 0 : i32
    %c0_i32_1 = arith.constant 0 : i32
    return %c0_i32, %c0_i32_0 : i32, i32
  }
  func.func @transform_8(%arg0: i32) -> (i32, i32, i32) {
    %c0_i32 = arith.constant 0 : i32
    %c0_i32_0 = arith.constant 0 : i32
    %c0_i32_1 = arith.constant 0 : i32
    %c0_i32_2 = arith.constant 0 : i32
    return %c0_i32, %c0_i32_0, %c0_i32_1 : i32, i32, i32
  }
  func.func @transform_9(%arg0: i32) -> (i32, i32) {
    %c0_i32 = arith.constant 0 : i32
    %c0_i32_0 = arith.constant 0 : i32
    %c0_i32_1 = arith.constant 0 : i32
    return %c0_i32, %c0_i32_0 : i32, i32
  }
  func.func @transform_10(%arg0: i32) -> (i32, i32, i32) {
    %c0_i32 = arith.constant 0 : i32
    %c0_i32_0 = arith.constant 0 : i32
    %c0_i32_1 = arith.constant 0 : i32
    %c0_i32_2 = arith.constant 0 : i32
    return %c0_i32, %c0_i32_0, %c0_i32_1 : i32, i32, i32
  }
  func.func @transform_11(%arg0: i32) -> (i32, i32) {
    %c0_i32 = arith.constant 0 : i32
    %c0_i32_0 = arith.constant 0 : i32
    %c0_i32_1 = arith.constant 0 : i32
    return %c0_i32, %c0_i32_0 : i32, i32
  }
  func.func @transform_12(%arg0: i32) -> (i32, i32) {
    %c0_i32 = arith.constant 0 : i32
    %c0_i32_0 = arith.constant 0 : i32
    %c0_i32_1 = arith.constant 0 : i32
    return %c0_i32, %c0_i32_0 : i32, i32
  }
  func.func @transform_13(%arg0: i32) -> (i32, i32) {
    %c0_i32 = arith.constant 0 : i32
    %c0_i32_0 = arith.constant 0 : i32
    %c0_i32_1 = arith.constant 0 : i32
    return %c0_i32, %c0_i32_0 : i32, i32
  }
  func.func @transform_14(%arg0: i32) -> (i32, i32) {
    %c0_i32 = arith.constant 0 : i32
    %c0_i32_0 = arith.constant 0 : i32
    %c0_i32_1 = arith.constant 0 : i32
    return %c0_i32, %c0_i32_0 : i32, i32
  }
  func.func @transform_15(%arg0: i32) -> (i32, i32) {
    %c0_i32 = arith.constant 0 : i32
    %c0_i32_0 = arith.constant 0 : i32
    %c0_i32_1 = arith.constant 0 : i32
    return %c0_i32, %c0_i32_0 : i32, i32
  }
  func.func @transform_16(%arg0: i32) -> (i32, i32) {
    %c0_i32 = arith.constant 0 : i32
    %c0_i32_0 = arith.constant 0 : i32
    %c0_i32_1 = arith.constant 0 : i32
    return %c0_i32, %c0_i32_0 : i32, i32
  }
  func.func @transform_17(%arg0: i32) -> (i32, i32) {
    %c0_i32 = arith.constant 0 : i32
    %c0_i32_0 = arith.constant 0 : i32
    %c0_i32_1 = arith.constant 0 : i32
    return %c0_i32, %c0_i32_0 : i32, i32
  }
  func.func @transform_18(%arg0: i32) -> (i32, i32) {
    %c0_i32 = arith.constant 0 : i32
    %c0_i32_0 = arith.constant 0 : i32
    %c0_i32_1 = arith.constant 0 : i32
    return %c0_i32, %c0_i32_0 : i32, i32
  }
}

</mosaic_0001>

<bundles_post_ra>
// kernel: tpu_custom_call.1
= control target key start
LH: loop header
LB: loop body
LE: loop exit
PB: predicated region body
PF: predicated region fallthrough
CT: control target
= control target key end

     0   :  { %s15589_s0 = inlined_call_operand.vmem [shape: f32[2,160], index: 0, kind: input, shape index: {}]   ;;  %s15590_s1 = inlined_call_operand.vmem [shape: f32[16,34], index: 1, kind: input, shape index: {}]   ;;  %s15591_s2 = inlined_call_operand.vmem [shape: f32[3,144,48], index: 2, kind: input, shape index: {}]   ;;  %s15592_s3 = inlined_call_operand.vmem [shape: f32[16,80], index: 3, kind: input, shape index: {}]   ;;  %s15593_s4 = inlined_call_operand.vmem [shape: f32[16,1], index: 4, kind: input, shape index: {}]   ;;  %s15594_s5 = inlined_call_operand.vmem [shape: f32[3,44,14], index: 5, kind: input, shape index: {}]   ;;  %s15595_s6 = inlined_call_operand.vmem [shape: f32[16,80], index: 6, kind: input, shape index: {}]   ;;  %s15596_s7 = inlined_call_operand.vmem [shape: f32[16,1], index: 7, kind: input, shape index: {}]   ;;  %s15597_s8 = inlined_call_operand.vmem [shape: f32[3,10,3], index: 8, kind: input, shape index: {}]   ;;  %s15598_s9 = inlined_call_operand.vmem [shape: f32[2,16], index: 9, kind: input, shape index: {}]   ;;  %s15599_s10 = inlined_call_operand.vmem [shape: f32[3,16,32], index: 10, kind: input, shape index: {}]   ;;  %s15600_s11 = inlined_call_operand.vmem [shape: f32[1,32], index: 11, kind: input, shape index: {}]   ;;  %s15601_s12 = inlined_call_operand.vmem [shape: f32[32,32], index: 12, kind: input, shape index: {}]   ;;  %s15602_s13 = inlined_call_operand.vmem [shape: f32[1,32], index: 13, kind: input, shape index: {}]   ;;  %s15603_s14 = inlined_call_operand.vmem [shape: f32[32,32], index: 14, kind: input, shape index: {}]   ;;  %s15604_s15 = inlined_call_operand.vmem [shape: f32[1,32], index: 15, kind: input, shape index: {}]   ;;  %s15605_s16 = inlined_call_operand.vmem [shape: f32[32,16], index: 16, kind: input, shape index: {}]   ;;  %s15606_s17 = inlined_call_operand.vmem [shape: f32[1,16], index: 17, kind: input, shape index: {}]   ;;  %s15607_s18 = inlined_call_operand.hbm [shape: f32[2,16], index: 18, kind: output, shape index: {}]  }
   0x1   :  { %15740 = sst [smem:[#allocation41_spill]] %s15589_s0 }
   0x2   :  { %15741 = sst [smem:[#allocation42_spill]] %s15590_s1 }
   0x3   :  { %15742 = sst [smem:[#allocation43_spill]] %s15591_s2 }
   0x4   :  { %v65_v0 = vlaneseq  ;;  %v12927_v1 = vmov 1983009808  }
   0x5   :  { %v63_v2 = vunpack.c.l.s4 %v12927_v1 }
   0x6   :  { %23 = vsyncpa [#allocation3], 0  ;;  %v66_v3 = vshrl.u32 %v65_v0, 7  ;;  %s15743_s29 = sld [smem:[#allocation41_spill]]  ;;  %vm72_vm0 = vcmask 1041408   ;;  %vm15638_vm1 = vcmask 254976  }
   0x7   :  { %v64_v4 = vunpack.c.0.s8 %v63_v2  ;;  %v12928_v12 = vmov 269488144   ;;  %s12929_s30 = smov 126   ;;  %s15610_s0 = smov 124   ;;  %v15624_v44 = vmov 0.0   ;;  %v15621_v52 = vmov 0.0|0.0  }
   0x8   :  { %v83_v13 = vunpack.c.l.s4 %v12928_v12  ;;  %s12931_s19 = smov 120   ;;  %s12932_s1 = smov 122   ;;  %390 = vmatprep.mubr.f32.mxu0 %v15624_v44  ;;  %11489 = vmatprep.subr.bf16.mxu1 %v15621_v52  ;;  %vm305_vm4 = vcmask 277504   ;;  %vm153_vm5 = vcmask 1039360   ;;  %vm179_vm6 = vcmask 1014784  }
   0x9   :  { %v67_v6 = vsub.s32 %v64_v4, %v66_v3  ;;  %s12933_s20 = smov 116   ;;  %s12934_s21 = smov 118   ;;  %vm273_vm7 = vcmask 1043456   ;;  %vm211_vm8 = vcmask 982016   ;;  %vm162_vm9 = vcmask 1031168  }
   0xa   :  { %v84_v14 = vunpack.c.0.s8 %v83_v13  ;;  %s12935_s22 = smov 127   ;;  %s12936_s2 = smov 114   ;;  %vm195_vm10 = vcmask 998400   ;;  %vm219_vm11 = vcmask 973824   ;;  %vm243_vm12 = vcmask 949248  }
   0xb   :  { %s12937_s23 = smov 125   ;;  %s12938_s24 = smov 121   ;;  %vm276_vm13 = vcmask 1045504   ;;  %vm251_vm14 = vcmask 941056   ;;  %vm227_vm15 = vcmask 965632  }
   0xc   :  { %v60_v5 = vld [vmem:[%s15743_s29] sm:$0xf]  ;;  %v87_v15 = vsub.s32 %v84_v14, %v66_v3  ;;  %s12939_s25 = smov 123   ;;  %s12940_s26 = smov 117  }
   0xd   :  { %v68_v7 = vrot.slane %v60_v5, %v67_v6  ;;  %s12941_s27 = smov 119   ;;  %s12942_s28 = smov 115  }
   0xe   :  { %s12943_s29 = smov 113  }
   0xf   :  { %v69_v8 = vcombine.high %v68_v7, %v68_v7  ;;  %v73_v9 = vsel %vm72_vm0, %v68_v7, 0.0 }
  0x11   :  { %v75_v10 = vsel %vm15638_vm1, %v69_v8, 0.0 }
  0x12   :  { %v76_v11 = vadd.f32 %v75_v10, %v73_v9 }
  0x14   :  { %77 = vadd.xlane.f32.xlu0 %v76_v11 }
  0xa1   :  { %v78_v16 = vpop.xlane.xlu0 %77 }
  0xa2   :  { %v80_v17 = vmul.f32 0.00625, %v78_v16 }
  0xa4   :  { %v88_v18 = vrot.slane %v80_v17, %v87_v15 }
  0xa6   :  { %v90_v19 = vsub.f32 %v60_v5, %v88_v18 }
  0xa8   :  { %v91_v20 = vmul.f32 %v90_v19, %v90_v19 }
  0xaa   :  { %v99_v21 = vrot.slane %v91_v20, %v67_v6 }
  0xac   :  { %v100_v22 = vcombine.high %v99_v21, %v99_v21  ;;  %v103_v23 = vsel %vm72_vm0, %v99_v21, 0.0 }
  0xae   :  { %v104_v24 = vsel %vm15638_vm1, %v100_v22, 0.0  ;;  %vm259_vm1 = vcmask 932864  }
  0xaf   :  { %v105_v25 = vadd.f32 %v104_v24, %v103_v23 }
  0xb1   :  { %106 = vadd.xlane.f32.xlu0 %v105_v25 }
 0x13e   :  { %v107_v26 = vpop.xlane.xlu0 %106 }
 0x13f   :  { %v109_v27 = vmul.f32 0.006289308, %v107_v26 }
 0x141   :  { %12869 = vrsqrt.f32 %v109_v27  ;;  %vm112_vm2 = vcmp.eq.f32.partialorder %v109_v27, inf  ;;  %v115_v30 = vand.u32 2147483648, %v109_v27  ;;  %vm114_vm3 = vcmp.eq.f32.partialorder %v109_v27, 0.0 }
 0x14b   :  { %v12870_v28 = vpop.eup %12869 }
 0x14c   :  { %v111_v29 = vmul.f32 %v12870_v28, %v109_v27 }
 0x14e   :  { %v113_v31 = vsel %vm112_vm2, %v109_v27, %v111_v29  ;;  %vm187_vm2 = vcmask 1006592  }
 0x14f   :  { %v116_v32 = vsel %vm114_vm3, %v115_v30, %v113_v31  ;;  %vm171_vm3 = vcmask 1022976  }
 0x150   :  { %v117_v33 = vadd.f32 1e-06, %v116_v32 }
 0x152   :  { %v125_v34 = vrot.slane %v117_v33, %v87_v15 }
 0x154   :  { %12871 = vrcp.f32 %v125_v34 }
 0x15e   :  { %v12872_v35 = vpop.eup %12871 }
 0x15f   :  { %v128_v36 = vmul.f32 %v12872_v35, %v90_v19 }
 0x161   :  { %v13054_v37 = vrot.slane %v128_v36, %v67_v6  ;;  %v140_v38 = vcombine.low %v128_v36, %v128_v36 }
 0x163   :  { %160 = vrot.lane.b32.xlu1 %v13054_v37, %s12929_s30  ;;  %175 = vrot.lane.b32.xlu0 %v13054_v37, %s15610_s0  ;;  %v147_v39 = vrot.slane %v140_v38, %v67_v6  ;;  %v13068_v40 = vcombine.high %v13054_v37, %v13054_v37  ;;  %v157_v41 = vcombine.low %v13054_v37, %v13054_v37 }
 0x165   :  { %v148_v42 = vcombine.high %v147_v39, %v147_v39  ;;  %v166_v43 = vcombine.low %v147_v39, %v147_v39 }
 0x167   :  { %207 = vrot.lane.b32.xlu1 %v13054_v37, %s12931_s19  ;;  %193 = vrot.lane.b32.xlu0 %v13054_v37, %s12932_s1 }
 0x16b   :  { %239 = vrot.lane.b32.xlu1 %v13054_v37, %s12933_s20  ;;  %225 = vrot.lane.b32.xlu0 %v13054_v37, %s12934_s21 }
 0x16f   :  { %149 = vrot.lane.b32.xlu1 %v147_v39, %s12935_s22  ;;  %257 = vrot.lane.b32.xlu0 %v13054_v37, %s12936_s2 }
 0x173   :  { %169 = vrot.lane.b32.xlu0 %v147_v39, %s12937_s23  ;;  %177 = vrot.lane.b32.xlu1 %v13068_v40, %s15610_s0  ;;  %s12944_s0 = smov 112  }
 0x177   :  { %201 = vrot.lane.b32.xlu0 %v147_v39, %s12938_s24  ;;  %183 = vrot.lane.b32.xlu1 %v147_v39, %s12939_s25 }
 0x17b   :  { %209 = vrot.lane.b32.xlu0 %v13068_v40, %s12931_s19  ;;  %158 = vrot.lane.b32.xlu1 %v157_v41, %s12929_s30 }
 0x17f   :  { %241 = vrot.lane.b32.xlu0 %v13068_v40, %s12933_s20  ;;  %191 = vrot.lane.b32.xlu1 %v157_v41, %s12932_s1  ;;  %s15744_s20 = sld [smem:[#allocation43_spill]] }
 0x183   :  { %233 = vrot.lane.b32.xlu0 %v147_v39, %s12940_s26  ;;  %215 = vrot.lane.b32.xlu1 %v147_v39, %s12941_s27 }
 0x185   :  { %v938_v49 = vld [vmem:[%s15744_s20] sm:$0xff]  ;;  %v939_v50 = vld [vmem:[%s15744_s20 + $0x8] sm:$0xff]  ;;  %v13100_v51 = vld [vmem:[%s15744_s20 + $0x90] sm:$0xff] }
 0x186   :  { %v964_v53 = vand.u32 4294901760, %v938_v49  ;;  %v967_v54 = vand.u32 4294901760, %v939_v50  ;;  %v13106_v55 = vld [vmem:[%s15744_s20 + $0x98] sm:$0xff]  ;;  %v15623_v56 = vand.u32 4294901760, %v13100_v51  ;;  %v940_v57 = vld [vmem:[%s15744_s20 + $0x10] sm:$0xff]  ;;  %v13123_v0 = vld [vmem:[%s15744_s20 + $0xa0] sm:$0xff] }
 0x187   :  { %217 = vrot.lane.b32.xlu0 %v148_v42, %s12941_s27  ;;  %247 = vrot.lane.b32.xlu1 %v147_v39, %s12942_s28  ;;  %v941_v58 = vld [vmem:[%s15744_s20 + $0x18] sm:$0xff]  ;;  %v15620_v61 = vand.u32 4294901760, %v13106_v55  ;;  %v970_v62 = vand.u32 4294901760, %v940_v57  ;;  %v13128_v1 = vld [vmem:[%s15744_s20 + $0xa8] sm:$0xff]  ;;  %v15619_v14 = vand.u32 4294901760, %v13123_v0 }
 0x188   :  { %v973_v63 = vand.u32 4294901760, %v941_v58  ;;  %v942_v2 = vld [vmem:[%s15744_s20 + $0x20] sm:$0xff]  ;;  %v13133_v3 = vpack.c.bf16 %v967_v54, %v964_v53  ;;  %v13135_v4 = vsub.f32 %v938_v49, %v964_v53  ;;  %v13137_v5 = vsub.f32 %v939_v50, %v967_v54  ;;  %v943_v7 = vld [vmem:[%s15744_s20 + $0x28] sm:$0xff]  ;;  %v13150_v8 = vld [vmem:[%s15744_s20 + $0xb0] sm:$0xff] }
 0x189   :  { %v13142_v6 = vsub.f32 %v13100_v51, %v15623_v56  ;;  %v13155_v9 = vsub.f32 %v13106_v55, %v15620_v61  ;;  %v13159_v11 = vsub.f32 %v940_v57, %v970_v62  ;;  %v13164_v12 = vld [vmem:[%s15744_s20 + $0xb8] sm:$0xff]  ;;  %v15618_v15 = vand.u32 4294901760, %v13128_v1  ;;  %v944_v21 = vld [vmem:[%s15744_s20 + $0x30] sm:$0xff]  ;;  %v13199_v27 = vld [vmem:[%s15744_s20 + $0xc0] sm:$0xff] }
 0x18a   :  { %15745 = vst [vmem:[#allocation5_spill] sm:$0xff] %v13133_v3  ;;  %v13157_v10 = vpack.c.bf16 %v973_v63, %v970_v62  ;;  %11491 = vmatpush1.bf16.msra.mxu1 %v13133_v3  ;;  %v13167_v13 = vsub.f32 %v941_v58, %v973_v63  ;;  %v976_v16 = vand.u32 4294901760, %v942_v2  ;;  %v979_v19 = vand.u32 4294901760, %v943_v7  ;;  %v945_v22 = vld [vmem:[%s15744_s20 + $0x38] sm:$0xff]  ;;  %v13204_v28 = vld [vmem:[%s15744_s20 + $0xc8] sm:$0xff] }
 0x18b   :  { %249 = vrot.lane.b32.xlu0 %v148_v42, %s12942_s28  ;;  %223 = vrot.lane.b32.xlu1 %v157_v41, %s12934_s21  ;;  %v15616_v20 = vand.u32 4294901760, %v13150_v8  ;;  %v13186_v23 = vsub.f32 %v13123_v0, %v15619_v14  ;;  %v13191_v24 = vsub.f32 %v13128_v1, %v15618_v15  ;;  %v15615_v26 = vand.u32 4294901760, %v13164_v12  ;;  %v13246_v53 = vld [vmem:[%s15744_s20 + $0xd8] sm:$0xff]  ;;  %s15758_s28 = sld [smem:[#allocation42_spill]]  ;;  %s12951_s21 = smov [#allocation2]  }
 0x18c   :  { %15746 = vst [vmem:[#allocation6_spill] sm:$0xff] %v13157_v10  ;;  %11492 = vmatprep.subr.bf16.mxu1 %v15621_v52  ;;  %v13193_v25 = vsub.f32 %v942_v2, %v976_v16  ;;  %v13206_v29 = vsub.f32 %v943_v7, %v979_v19  ;;  %v13214_v31 = vpack.c.bf16 %v979_v19, %v976_v16  ;;  %v982_v33 = vand.u32 4294901760, %v944_v21 }
 0x18d   :  { %v13211_v30 = vsub.f32 %v13150_v8, %v15616_v20  ;;  %v13219_v32 = vsub.f32 %v13164_v12, %v15615_v26  ;;  %v985_v34 = vand.u32 4294901760, %v945_v22  ;;  %v15613_v38 = vand.u32 4294901760, %v13199_v27 }
 0x18e   :  { %11494 = vmatpush1.bf16.msra.mxu1 %v13157_v10  ;;  %15747 = vst [vmem:[#allocation7_spill] sm:$0xff] %v13214_v31  ;;  %v13239_v49 = vsub.f32 %v944_v21, %v982_v33  ;;  %v15617_v21 = vand.u32 4294901760, %v13246_v53 }
 0x18f   :  { %265 = vrot.lane.b32.xlu0 %v147_v39, %s12943_s29  ;;  %255 = vrot.lane.b32.xlu1 %v157_v41, %s12936_s2  ;;  %v15612_v39 = vand.u32 4294901760, %v13204_v28  ;;  %v946_v41 = vld [vmem:[%s15744_s20 + $0x40] sm:$0xff]  ;;  %v13241_v50 = vsub.f32 %v945_v22, %v985_v34  ;;  %v13251_v54 = vsub.f32 %v13199_v27, %v15613_v38  ;;  %v13259_v62 = vpack.c.bf16 %v985_v34, %v982_v33 }
 0x190   :  { %11495 = vmatprep.subr.bf16.mxu1 %v15621_v52  ;;  %15748 = vst [vmem:[#allocation8_spill] sm:$0xff] %v13239_v49  ;;  %v988_v58 = vand.u32 4294901760, %v946_v41  ;;  %v13278_v33 = vsub.f32 %v13246_v53, %v15617_v21  ;;  %v15760_v49 = vmov 0.0  }
 0x191   :  { %15749 = vst [vmem:[#allocation9_spill] sm:$0xff] %v13241_v50  ;;  %15750 = vst [vmem:[#allocation10_spill] sm:$0xff] %v13251_v54  ;;  %v13256_v57 = vsub.f32 %v13204_v28, %v15612_v39  ;;  %v303_v14 = vld [vmem:[%s15758_s28] sm:$0xff] }
 0x192   :  { %11497 = vmatpush1.bf16.msra.mxu1 %v13214_v31  ;;  %15752 = vst [vmem:[#allocation12_spill] sm:$0xff] %v13259_v62  ;;  %v13265_v19 = vsub.f32 %v946_v41, %v988_v58  ;;  %15756 = vst [vmem:[#allocation16_spill] sm:$0xff] %v13278_v33  ;;  %v307_v56 = vsel %vm305_vm4, %v303_v14, 0 }
 0x193   :  { %299 = vrot.lane.b32.xlu0 %v13068_v40, %s12944_s0  ;;  %151 = vrot.lane.b32.xlu1 %v148_v42, %s12935_s22  ;;  %15751 = vst [vmem:[#allocation11_spill] sm:$0xff] %v13256_v57  ;;  %v13309_v10 = vand.u32 4294901760, %v307_v56 }
 0x194   :  { %11498 = vmatprep.subr.bf16.mxu1 %v15621_v52  ;;  %15753 = vst [vmem:[#allocation13_spill] sm:$0xff] %v13265_v19 }
 0x196   :  { %11500 = vmatpush1.bf16.msra.mxu1 %v13259_v62 }
 0x197   :  { %185 = vrot.lane.b32.xlu1 %v148_v42, %s12939_s25  ;;  %v947_v42 = vld [vmem:[%s15744_s20 + $0x48] sm:$0xff]  ;;  %11501 = vmatprep.subr.bf16.mxu1 %v15621_v52 }
 0x198   :  { %v991_v63 = vand.u32 4294901760, %v947_v42 }
 0x19a   :  { %v13268_v22 = vsub.f32 %v947_v42, %v991_v63  ;;  %v13281_v34 = vpack.c.bf16 %v991_v63, %v988_v58 }
 0x19b   :  { %167 = vrot.lane.b32.xlu1 %v166_v43, %s12937_s23 }
 0x19c   :  { %15754 = vst [vmem:[#allocation14_spill] sm:$0xff] %v13268_v22  ;;  %15757 = vst [vmem:[#allocation17_spill] sm:$0xff] %v13281_v34  ;;  %11503 = vmatpush1.bf16.msra.mxu1 %v13281_v34 }
 0x19d   :  { %11504 = vmatprep.subr.bf16.mxu1 %v15621_v52 }
 0x19f   :  { %199 = vrot.lane.b32.xlu1 %v166_v43, %s12938_s24  ;;  %s15919_s24 = smov 124  }
 0x1a3   :  { %231 = vrot.lane.b32.xlu1 %v166_v43, %s12940_s26 }
 0x1a7   :  { %263 = vrot.lane.b32.xlu1 %v166_v43, %s12943_s29  ;;  %v13237_v43 = vld [vmem:[%s15744_s20 + $0xd0] sm:$0xff] }
 0x1a8   :  { %v15614_v2 = vand.u32 4294901760, %v13237_v43 }
 0x1aa   :  { %v13273_v39 = vsub.f32 %v13237_v43, %v15614_v2 }
 0x1ab   :  { %297 = vrot.lane.b32.xlu1 %v13054_v37, %s12944_s0 }
 0x1ac   :  { %15755 = vst [vmem:[#allocation15_spill] sm:$0xff] %v13273_v39 }
 0x1d5   :  { %v13083_v45 = vpop.permute.xlu1 %160  ;;  %v13085_v46 = vpop.permute.xlu0 %175 }
 0x1d9   :  { %v13087_v47 = vpop.permute.xlu1 %207  ;;  %v13089_v48 = vpop.permute.xlu0 %193 }
 0x1dd   :  { %v13115_v59 = vpop.permute.xlu1 %239  ;;  %v13117_v60 = vpop.permute.xlu0 %225 }
 0x1e1   :  { %v13171_v17 = vpop.permute.xlu1 %149  ;;  %v13173_v18 = vpop.permute.xlu0 %257 }
 0x1e5   :  { %v13221_v35 = vpop.permute.xlu0 %169  ;;  %v13223_v36 = vpop.permute.xlu1 %177 }
 0x1e9   :  { %v13262_v7 = vpop.permute.xlu0 %201  ;;  %v184_v16 = vpop.permute.xlu1 %183 }
 0x1ed   :  { %v13283_v41 = vpop.permute.xlu0 %209  ;;  %v159_v38 = vpop.permute.xlu1 %158 }
 0x1ee   :  { %v163_v57 = vsel %vm162_vm9, %v159_v38, %v13083_v45  ;;  %vm267_vm9 = vcmask 924672  }
 0x1f1   :  { %v192_v42 = vpop.permute.xlu1 %191  ;;  %v13288_v2 = vpop.permute.xlu0 %241 }
 0x1f5   :  { %v216_v26 = vpop.permute.xlu1 %215  ;;  %v13290_v20 = vpop.permute.xlu0 %233 }
 0x1f9   :  { %v13292_v21 = vpop.permute.xlu1 %247  ;;  %v218_v58 = vpop.permute.xlu0 %217 }
 0x1fa   :  { %v286_v62 = vsel %vm72_vm0, %v13283_v41, %v218_v58 }
 0x1fd   :  { %v224_v15 = vpop.permute.xlu1 %223  ;;  %v13299_v61 = vpop.permute.xlu0 %249 }
 0x1fe   :  { %v292_v14 = vsel %vm72_vm0, %v13288_v2, %v13299_v61 }
 0x201   :  { %v13294_v63 = vpop.permute.xlu1 %255 }
 0x205   :  { %v152_v52 = vpop.permute.xlu1 %151 }
 0x206   :  { %v272_v44 = vsel %vm72_vm0, %v13068_v40, %v152_v52  ;;  %v154_v31 = vsel %vm153_vm5, %v13171_v17, %v152_v52  ;;  %v288_v52 = vsel %vm273_vm7, %v286_v62, %v13117_v60  ;;  %v13320_v17 = vpop.permute.xlu0 %265  ;;  %vm203_vm5 = vcmask 990208  }
 0x207   :  { %v275_v34 = vsel %vm273_vm7, %v272_v44, %v13083_v45  ;;  %v271_v33 = vsel %vm72_vm0, %v13054_v37, %v154_v31  ;;  %v13332_v62 = vsub.f32 %v307_v56, %v13309_v10  ;;  %v294_v37 = vsel %vm273_vm7, %v292_v14, %v13173_v18 }
 0x208   :  { %v278_v44 = vsel %vm276_vm13, %v275_v34, %v13221_v35  ;;  %v180_v34 = vsel %vm179_vm6, %v13085_v46, %v13223_v36  ;;  %v304_v46 = vld [vmem:[%s15758_s28 + $0x8] sm:$0xff]  ;;  %v296_v56 = vsel %vm276_vm13, %v294_v37, %v13320_v17  ;;  %vm235_vm6 = vcmask 957440  }
 0x209   :  { %v186_v40 = vpop.permute.xlu1 %185  ;;  %v316_v31 = vand.u32 4294901760, %v278_v44  ;;  %v196_v14 = vsel %vm195_vm10, %v192_v42, %v13089_v48  ;;  %v310_v37 = vsel %vm305_vm4, %v304_v46, 0  ;;  %v15643_v42 = vand.u32 4294901760, %v13332_v62 }
 0x20a   :  { %v280_v3 = vsel %vm72_vm0, %v13223_v36, %v186_v40  ;;  %v188_v22 = vsel %vm187_vm2, %v184_v16, %v186_v40  ;;  %v290_v36 = vsel %vm276_vm13, %v288_v52, %v13290_v20  ;;  %v220_v52 = vsel %vm219_vm11, %v216_v26, %v218_v58 }
 0x20b   :  { %v282_v39 = vsel %vm273_vm7, %v280_v3, %v13089_v48  ;;  %v279_v38 = vsel %vm72_vm0, %v180_v34, %v188_v22  ;;  %v324_v34 = vand.u32 4294901760, %v290_v36  ;;  %vm956_vm4 = vcmask 130048  }
 0x20c   :  { %v284_v19 = vsel %vm276_vm13, %v282_v39, %v13262_v7  ;;  %v274_v39 = vsel %vm273_vm7, %v271_v33, %v163_v57  ;;  %v228_v57 = vsel %vm227_vm15, %v224_v15, %v13117_v60  ;;  %v328_v33 = vand.u32 4294901760, %v296_v56  ;;  %v300_v60 = vpop.permute.xlu0 %299 }
 0x20d   :  { %v168_v3 = vpop.permute.xlu1 %167  ;;  %v320_v54 = vand.u32 4294901760, %v284_v19  ;;  %v281_v48 = vsel %vm273_vm7, %v279_v38, %v196_v14  ;;  %vm3302_vm15 = vcmask 654336  }
 0x20e   :  { %v172_v45 = vsel %vm171_vm3, %v168_v3, %v13221_v35  ;;  %v212_v3 = vsel %vm211_vm8, %v13087_v47, %v13283_v41  ;;  %v244_v47 = vsel %vm243_vm12, %v13115_v59, %v13288_v2  ;;  %v252_v41 = vsel %vm251_vm14, %v13292_v21, %v13299_v61 }
 0x20f   :  { %v277_v16 = vsel %vm276_vm13, %v274_v39, %v172_v45  ;;  %v13350_v40 = vpack.c.bf16 %v320_v54, %v316_v31  ;;  %v285_v58 = vsel %vm72_vm0, %v212_v3, %v220_v52  ;;  %v13367_v15 = vsub.f32 %v284_v19, %v320_v54 }
 0x210   :  { %v318_v35 = vand.u32 4294901760, %v277_v16  ;;  %v13370_v39 = vand.u32 4294901760, %v310_v37  ;;  %v13379_v38 = vsub.f32 %v296_v56, %v328_v33  ;;  %v13383_v54 = vsub.f32 %v278_v44, %v316_v31 }
 0x211   :  { %11442 = vmatprep.subr.bf16.mxu0 %v13350_v40  ;;  %v200_v22 = vpop.permute.xlu1 %199  ;;  %v13385_v52 = vsub.f32 %v290_v36, %v324_v34  ;;  %v260_v2 = vsel %vm259_vm1, %v13294_v63, %v13173_v18  ;;  %v13398_v44 = vpack.c.bf16 %v328_v33, %v324_v34  ;;  %v15646_v31 = vand.u32 4294901760, %v13367_v15 }
 0x212   :  { %v204_v26 = vsel %vm203_vm5, %v200_v22, %v13262_v7  ;;  %v287_v7 = vsel %vm273_vm7, %v285_v58, %v228_v57  ;;  %v13381_v14 = vsub.f32 %v277_v16, %v318_v35  ;;  %v314_v22 = vsel %vm72_vm0, %v300_v60, 0 }
 0x213   :  { %v283_v46 = vsel %vm276_vm13, %v281_v48, %v204_v26  ;;  %v291_v36 = vsel %vm72_vm0, %v244_v47, %v252_v41  ;;  %v15647_v57 = vand.u32 4294901760, %v13379_v38  ;;  %v15648_v33 = vand.u32 4294901760, %v13383_v54 }
 0x214   :  { %v322_v45 = vand.u32 4294901760, %v283_v46  ;;  %v15645_v18 = vand.u32 4294901760, %v13381_v14  ;;  %v293_v34 = vsel %vm273_vm7, %v291_v36, %v260_v2  ;;  %vm301_vm1 = vcmask 916480  }
 0x215   :  { %v232_v19 = vpop.permute.xlu1 %231  ;;  %v428_v58 = vsub.f32 %v13367_v15, %v15646_v31  ;;  %v416_v2 = vsub.f32 %v13383_v54, %v15648_v33  ;;  %vm3213_vm8 = vcmask 392192   ;;  %vm3921_vm3 = vcmask 359424  }
 0x216   :  { %v13388_v3 = vsub.f32 %v283_v46, %v322_v45  ;;  %v236_v59 = vsel %vm235_vm6, %v232_v19, %v13290_v20  ;;  %v13392_v61 = vpack.c.bf16 %v322_v45, %v318_v35  ;;  %v13405_v20 = vsub.f32 %v310_v37, %v13370_v39 }
 0x217   :  { %v289_v21 = vsel %vm276_vm13, %v287_v7, %v236_v59  ;;  %v13408_v35 = vand.u32 4294901760, %v314_v22  ;;  %v15649_v46 = vand.u32 4294901760, %v13385_v52  ;;  %v394_v7 = vsub.f32 %v13332_v62, %v15643_v42 }
 0x218   :  { %v15644_v56 = vand.u32 4294901760, %v13388_v3  ;;  %v326_v16 = vand.u32 4294901760, %v289_v21  ;;  %11444 = vmatpush1.bf16.msra.mxu0 %v13392_v61  ;;  %v422_v19 = vsub.f32 %v13381_v14, %v15645_v18  ;;  %v429_v42 = vand.u32 4294901760, %v428_v58 }
 0x219   :  { %11446 = vmatprep.subr.bf16.mxu0 %v13398_v44  ;;  %v264_v63 = vpop.permute.xlu1 %263  ;;  %v13431_v45 = vsub.f32 %v314_v22, %v13408_v35 }
 0x21a   :  { %v13414_v48 = vsub.f32 %v289_v21, %v326_v16  ;;  %v268_v26 = vsel %vm267_vm9, %v264_v63, %v13320_v17  ;;  %v434_v47 = vsub.f32 %v13388_v3, %v15644_v56  ;;  %v15650_v17 = vand.u32 4294901760, %v13405_v20 }
 0x21b   :  { %v295_v37 = vsel %vm276_vm13, %v293_v34, %v268_v26  ;;  %v452_v21 = vsub.f32 %v13379_v38, %v15647_v57  ;;  %v440_v56 = vsub.f32 %v13385_v52, %v15649_v46  ;;  %v395_v57 = vand.u32 4294901760, %v394_v7 }
 0x21c   :  { %v330_v41 = vand.u32 4294901760, %v295_v37  ;;  %v15651_v36 = vand.u32 4294901760, %v13414_v48  ;;  %v435_v33 = vand.u32 4294901760, %v434_v47  ;;  %v405_v58 = vsub.f32 %v13405_v20, %v15650_v17 }
 0x21d   :  { %v298_v59 = vpop.permute.xlu1 %297  ;;  %v423_v7 = vand.u32 4294901760, %v422_v19 }
 0x21e   :  { %v13443_v63 = vsub.f32 %v295_v37, %v330_v41  ;;  %v302_v34 = vsel %vm301_vm1, %v298_v59, %v300_v60  ;;  %v13445_v22 = vpack.c.bf16 %v330_v41, %v326_v16  ;;  %v417_v60 = vand.u32 4294901760, %v416_v2 }
 0x21f   :  { %v312_v26 = vsel %vm72_vm0, %v302_v34, 0  ;;  %v453_v16 = vand.u32 4294901760, %v452_v21  ;;  %v446_v41 = vsub.f32 %v13414_v48, %v15651_v36  ;;  %v441_v21 = vand.u32 4294901760, %v440_v56 }
 0x220   :  { %v15653_v18 = vand.u32 4294901760, %v13443_v63  ;;  %v13452_v31 = vand.u32 4294901760, %v312_v26  ;;  %11448 = vmatpush1.bf16.msra.mxu0 %v13445_v22  ;;  %v11449_v2 = vpack.c.bf16 %v429_v42, %v417_v60  ;;  %v11451_v46 = vpack.c.bf16 %v435_v33, %v423_v7 }
 0x221   :  { %333 = vmatprep.subr.mxu0 %v13408_v35  ;;  %v11453_v37 = vpack.c.bf16 %v453_v16, %v441_v21  ;;  %v15759_v36 = vand.u32 4294901760, %v13431_v45  ;;  %v11457_v33 = vpack.c.bf16 %v13367_v15, %v13383_v54  ;;  %v15763_v16 = vand.u32 4294901760, %v13381_v14 }
 0x222   :  { %v458_v59 = vsub.f32 %v13443_v63, %v15653_v18  ;;  %v13467_v47 = vsub.f32 %v312_v26, %v13452_v31  ;;  %v406_v18 = vand.u32 4294901760, %v405_v58  ;;  %v447_v26 = vand.u32 4294901760, %v446_v41 }
 0x223   :  { %v464_v50 = vsub.f32 %v13431_v45, %v15759_v36  ;;  %v15762_v36 = vand.u32 4294901760, %v13367_v15  ;;  %v15765_v41 = vand.u32 4294901760, %v13332_v62  ;;  %v15768_v15 = vand.u32 4294901760, %v13414_v48 }
 0x224   :  { %v469_v34 = vand.u32 4294901760, %v13467_v47  ;;  %335 = vmatpush1.msra.mxu0 %v13452_v31  ;;  %v459_v17 = vand.u32 4294901760, %v458_v59  ;;  %v15766_v59 = vand.u32 4294901760, %v13385_v52 }
 0x225   :  { %11450 = vmatprep.subr.bf16.mxu0 %v11449_v2  ;;  %396 = vmatmul.mubr.f32.vlgmr.msra.gmra.mrb[0].mxu0 %v395_v57  ;;  %v465_v19 = vand.u32 4294901760, %v464_v50  ;;  %v11463_v50 = vpack.c.bf16 %v13443_v63, %v13414_v48 }
 0x226   :  { %11452 = vmatpush1.bf16.msra.mxu0 %v11451_v46  ;;  %401 = vmatprep.mubr.f32.mxu0 %v15760_v49  ;;  %v11455_v42 = vpack.c.bf16 %v459_v17, %v447_v26  ;;  %v470_v56 = vsub.f32 %v13467_v47, %v469_v34  ;;  %v11459_v46 = vpack.c.bf16 %v13388_v3, %v13381_v14  ;;  %v15769_v14 = vand.u32 4294901760, %v13443_v63  ;;  %v951_v26 = vld [vmem:[%s15744_s20 + $0x68] sm:$0xff] }
 0x227   :  { %11454 = vmatprep.subr.bf16.mxu0 %v11453_v37  ;;  %v11461_v17 = vpack.c.bf16 %v13379_v38, %v13385_v52  ;;  %v15764_v37 = vand.u32 4294901760, %v13388_v3  ;;  %v15770_v3 = vand.u32 4294901760, %v13405_v20 }
 0x228   :  { %v471_v57 = vand.u32 4294901760, %v470_v56 }
 0x229   :  { %407 = vmatmul.mubr.f32.gmra.mrb[2].mxu0 %v406_v18  ;;  %v15761_v18 = vand.u32 4294901760, %v13383_v54  ;;  %v11475_v58 = vpack.c.bf16 %v15764_v37, %v15763_v16  ;;  %v11479_v54 = vpack.c.bf16 %v15769_v14, %v15768_v15 }
 0x22a   :  { %11456 = vmatpush1.bf16.msra.mxu0 %v11455_v42  ;;  %527 = vmatprep.mubr.f32.mxu0 %v15760_v49  ;;  %v10013_v42 = vld [vmem:[%s15744_s20 + $0xf0] sm:$0xff] }
 0x22b   :  { %466 = vmatprep.subr.mxu0 %v465_v19  ;;  %v11473_v60 = vpack.c.bf16 %v15762_v36, %v15761_v18  ;;  %v1003_v19 = vand.u32 4294901760, %v951_v26  ;;  %v952_v18 = vld [vmem:[%s15744_s20 + $0x70] sm:$0xff]  ;;  %v953_v36 = vld [vmem:[%s15744_s20 + $0x78] sm:$0xff] }
 0x22e   :  { %472 = vmatpush1.msra.mxu0 %v471_v57  ;;  %v10014_v57 = vld [vmem:[%s15744_s20 + $0xf8] sm:$0xff] }
 0x22f   :  { %11458 = vmatprep.subr.bf16.mxu0 %v11457_v33  ;;  %529 = vmatmul.mubr.f32.vlgmr.msra.gmra.mrb[0].mxu0 %v13309_v10  ;;  %v1755_v33 = vand.u32 4294901760, %v10013_v42 }
 0x230   :  { %11460 = vmatpush1.bf16.msra.mxu0 %v11459_v46  ;;  %534 = vmatprep.mubr.f32.mxu0 %v15760_v49  ;;  %v1758_v46 = vand.u32 4294901760, %v10014_v57 }
 0x231   :  { %11462 = vmatprep.subr.bf16.mxu0 %v11461_v17 }
 0x233   :  { %536 = vmatmul.mubr.f32.gmra.mrb[2].mxu0 %v13370_v39 }
 0x234   :  { %11464 = vmatpush1.bf16.msra.mxu0 %v11463_v50  ;;  %626 = vmatprep.mubr.f32.mxu0 %v15760_v49  ;;  %v13613_v50 = vpack.c.bf16 %v1758_v46, %v1755_v33 }
 0x235   :  { %568 = vmatprep.subr.mxu0 %v13431_v45 }
 0x236   :  { %15791 = vst [vmem:[#allocation26_spill] sm:$0xff] %v13613_v50 }
 0x238   :  { %571 = vmatpush1.msra.mxu0 %v13467_v47  ;;  %v15767_v47 = vand.u32 4294901760, %v13379_v38  ;;  %v15772_v38 = vand.u32 4294901760, %v13100_v51  ;;  %v15779_v51 = vand.u32 4294901760, %v13150_v8  ;;  %v15785_v8 = vand.u32 4294901760, %v13237_v43  ;;  %v10011_v43 = vld [vmem:[%s15744_s20 + $0xe0] sm:$0xff] }
 0x239   :  { %11466 = vmatprep.subr.bf16.mxu0 %v13350_v40  ;;  %629 = vmatmul.mubr.f32.vlgmr.msra.gmra.mrb[0].mxu0 %v13332_v62  ;;  %v15771_v62 = vand.u32 4294901760, %v13431_v45  ;;  %v10012_v45 = vld [vmem:[%s15744_s20 + $0xe8] sm:$0xff]  ;;  %v1749_v63 = vand.u32 4294901760, %v10011_v43 }
 0x23a   :  { %11468 = vmatpush1.bf16.msra.mxu0 %v13392_v61  ;;  %634 = vmatprep.mubr.f32.mxu0 %v15760_v49  ;;  %v11477_v7 = vpack.c.bf16 %v15767_v47, %v15766_v59  ;;  %v10016_v59 = vld [vmem:[%s15744_s20 + $0x108] sm:$0xff]  ;;  %v1006_v47 = vand.u32 4294901760, %v952_v18 }
 0x23b   :  { %11470 = vmatprep.subr.bf16.mxu0 %v13398_v44  ;;  %v1764_v14 = vand.u32 4294901760, %v10016_v59 }
 0x23d   :  { %637 = vmatmul.mubr.f32.gmra.mrb[2].mxu0 %v13405_v20  ;;  %v15777_v20 = vand.u32 4294901760, %v13128_v1  ;;  %v15783_v1 = vand.u32 4294901760, %v13204_v28  ;;  %v949_v28 = vld [vmem:[%s15744_s20 + $0x58] sm:$0xff] }
 0x23e   :  { %11472 = vmatpush1.bf16.msra.mxu0 %v13445_v22  ;;  %717 = vmatprep.mubr.f32.mxu0 %v15760_v49  ;;  %v997_v48 = vand.u32 4294901760, %v949_v28 }
 0x23f   :  { %660 = vmatprep.subr.mxu0 %v13408_v35 }
 0x240   :  { %v13626_v37 = vsub.f32 %v949_v28, %v997_v48 }
 0x242   :  { %662 = vmatpush1.msra.mxu0 %v13452_v31 }
 0x243   :  { %11474 = vmatprep.subr.bf16.mxu0 %v11473_v60  ;;  %721 = vmatmul.mubr.f32.vlgmr.msra.gmra.mrb[0].mxu0 %v15765_v41  ;;  %v10015_v60 = vld [vmem:[%s15744_s20 + $0x100] sm:$0xff] }
 0x244   :  { %11476 = vmatpush1.bf16.msra.mxu0 %v11475_v58  ;;  %726 = vmatprep.mubr.f32.mxu0 %v15760_v49  ;;  %v13628_v58 = vsub.f32 %v10011_v43, %v1749_v63  ;;  %v1761_v15 = vand.u32 4294901760, %v10015_v60 }
 0x245   :  { %11478 = vmatprep.subr.bf16.mxu0 %v11477_v7  ;;  %v1009_v7 = vand.u32 4294901760, %v953_v36 }
 0x246   :  { %v13669_v28 = vsub.f32 %v10015_v60, %v1761_v15 }
 0x247   :  { %730 = vmatmul.mubr.f32.gmra.mrb[2].mxu0 %v15770_v3  ;;  %v13641_v3 = vpack.c.bf16 %v1764_v14, %v1761_v15 }
 0x248   :  { %11480 = vmatpush1.bf16.msra.mxu0 %v11479_v54  ;;  %830 = vmatprep.mubr.f32.mxu0 %v15760_v49  ;;  %v13639_v54 = vpack.c.bf16 %v1009_v7, %v1006_v47  ;;  %15794 = vst [vmem:[#allocation29_spill] sm:$0xff] %v13669_v28 }
 0x249   :  { %771 = vmatprep.subr.mxu0 %v15771_v62  ;;  %15793 = vst [vmem:[#allocation28_spill] sm:$0xff] %v13641_v3  ;;  %v954_v62 = vld [vmem:[%s15744_s20 + $0x80] sm:$0xff] }
 0x24a   :  { %15792 = vst [vmem:[#allocation27_spill] sm:$0xff] %v13639_v54 }
 0x24c   :  { %775 = vmatpush1.msra.mxu0 %v469_v34  ;;  %v950_v34 = vld [vmem:[%s15744_s20 + $0x60] sm:$0xff] }
 0x24d   :  { %11482 = vmatprep.subr.bf16.mxu0 %v13350_v40  ;;  %832 = vmatmul.mubr.f32.vlgmr.msra.gmra.mrb[0].mxu0 %v13309_v10  ;;  %v15773_v40 = vand.u32 4294901760, %v13106_v55  ;;  %v15780_v55 = vand.u32 4294901760, %v13164_v12  ;;  %v15786_v12 = vand.u32 4294901760, %v13246_v53  ;;  %v1000_v56 = vand.u32 4294901760, %v950_v34 }
 0x24e   :  { %11484 = vmatpush1.bf16.msra.mxu0 %v13392_v61  ;;  %837 = vmatprep.mubr.f32.mxu0 %v15760_v49  ;;  %v15775_v61 = vmov 0.0|0.0  }
 0x24f   :  { %11486 = vmatprep.subr.bf16.mxu0 %v13398_v44  ;;  %v13538_v52 = vpack.c.bf16 %v15773_v40, %v15772_v38  ;;  %v15776_v44 = vand.u32 4294901760, %v13123_v0  ;;  %v15782_v0 = vand.u32 4294901760, %v13199_v27  ;;  %v948_v27 = vld [vmem:[%s15744_s20 + $0x50] sm:$0xff]  ;;  %v13611_v17 = vpack.c.bf16 %v1003_v19, %v1000_v56  ;;  %v955_v38 = vld [vmem:[%s15744_s20 + $0x88] sm:$0xff] }
 0x250   :  { %v994_v53 = vand.u32 4294901760, %v948_v27  ;;  %v10017_v40 = vld [vmem:[%s15744_s20 + $0x110] sm:$0xff] }
 0x251   :  { %839 = vmatmul.mubr.f32.gmra.mrb[2].mxu0 %v13370_v39  ;;  %15774 = vst [vmem:[#allocation18_spill] sm:$0xff] %v13538_v52  ;;  %15790 = vst [vmem:[#allocation25_spill] sm:$0xff] %v13611_v17  ;;  %v1767_v43 = vand.u32 4294901760, %v10017_v40 }
 0x252   :  { %11488 = vmatpush1.bf16.msra.mxu0 %v13445_v22  ;;  %919 = vmatprep.mubr.f32.mxu0 %v15760_v49  ;;  %v1752_v22 = vand.u32 4294901760, %v10012_v45  ;;  %v13591_v2 = vpack.c.bf16 %v997_v48, %v994_v53  ;;  %v13624_v16 = vsub.f32 %v948_v27, %v994_v53  ;;  %v13667_v27 = vsub.f32 %v953_v36, %v1009_v7 }
 0x253   :  { %862 = vmatprep.subr.mxu0 %v13408_v35  ;;  %v13549_v35 = vpack.c.bf16 %v15777_v20, %v15776_v44  ;;  %v13652_v44 = vsub.f32 %v950_v34, %v1000_v56  ;;  %v13654_v20 = vsub.f32 %v951_v26, %v1003_v19  ;;  %v13672_v53 = vsub.f32 %v10016_v59, %v1764_v14 }
 0x254   :  { %15788 = vst [vmem:[#allocation23_spill] sm:$0xff] %v13591_v2  ;;  %v13593_v21 = vpack.c.bf16 %v1752_v22, %v1749_v63  ;;  %11506 = vmatpush1.bf16.msra.mxu1 %v13591_v2  ;;  %v13630_v41 = vsub.f32 %v10012_v45, %v1752_v22  ;;  %v13681_v34 = vsub.f32 %v10017_v40, %v1767_v43  ;;  %v15663_v26 = vand.u32 4294901760, %v13135_v4 }
 0x255   :  { %15778 = vst [vmem:[#allocation19_spill] sm:$0xff] %v13549_v35  ;;  %11507 = vmatprep.subr.bf16.mxu1 %v15775_v61  ;;  %v15661_v56 = vand.u32 4294901760, %v13142_v6  ;;  %v15657_v19 = vand.u32 4294901760, %v13155_v9  ;;  %v15658_v40 = vand.u32 4294901760, %v13191_v24 }
 0x256   :  { %864 = vmatpush1.msra.mxu0 %v13452_v31  ;;  %v13566_v31 = vpack.c.bf16 %v15783_v1, %v15782_v0  ;;  %15789 = vst [vmem:[#allocation24_spill] sm:$0xff] %v13593_v21  ;;  %v1012_v0 = vand.u32 4294901760, %v954_v62  ;;  %v1015_v1 = vand.u32 4294901760, %v955_v38  ;;  %15798 = vst [vmem:[#allocation33_spill] sm:$0xff] %v13681_v34  ;;  %v1080_v36 = vsub.f32 %v13135_v4, %v15663_v26 }
 0x257   :  { %921 = vmatmul.mubr.f32.vlgmr.msra.gmra.mrb[0].mxu0 %v13309_v10  ;;  %11651 = vmatprep.subr.bf16.mxu0 %v15775_v61  ;;  %v13558_v10 = vpack.c.bf16 %v15780_v55, %v15779_v51  ;;  %v13656_v51 = vsub.f32 %v10013_v42, %v1755_v33  ;;  %v13658_v55 = vsub.f32 %v10014_v57, %v1758_v46  ;;  %v15662_v42 = vand.u32 4294901760, %v13137_v5 }
 0x258   :  { %926 = vmatprep.mubr.f32.mxu0 %v15760_v49  ;;  %11653 = vmatpush1.bf16.msra.mxu0 %v13538_v52  ;;  %15784 = vst [vmem:[#allocation21_spill] sm:$0xff] %v13566_v31  ;;  %v13675_v48 = vpack.c.bf16 %v1015_v1, %v1012_v0  ;;  %v13677_v45 = vsub.f32 %v954_v62, %v1012_v0  ;;  %v15656_v57 = vand.u32 4294901760, %v13159_v11  ;;  %v15655_v33 = vand.u32 4294901760, %v13167_v13 }
 0x259   :  { %11654 = vmatprep.subr.bf16.mxu0 %v15775_v61  ;;  %15781 = vst [vmem:[#allocation20_spill] sm:$0xff] %v13558_v10  ;;  %11509 = vmatpush1.bf16.msra.mxu1 %v13611_v17  ;;  %v13679_v63 = vsub.f32 %v955_v38, %v1015_v1  ;;  %v1087_v60 = vsub.f32 %v13137_v5, %v15662_v42  ;;  %v1081_v14 = vand.u32 4294901760, %v1080_v36  ;;  %v15659_v38 = vand.u32 4294901760, %v13186_v23 }
 0x25a   :  { %11510 = vmatprep.subr.bf16.mxu1 %v15775_v61  ;;  %15795 = vst [vmem:[#allocation30_spill] sm:$0xff] %v13675_v48  ;;  %15796 = vst [vmem:[#allocation31_spill] sm:$0xff] %v13677_v45  ;;  %v1835_v59 = vsub.f32 %v13142_v6, %v15661_v56  ;;  %v1094_v7 = vsub.f32 %v13159_v11, %v15656_v57  ;;  %v1101_v15 = vsub.f32 %v13167_v13, %v15655_v33  ;;  %v15803_v56 = vld [vmem:[#allocation10_spill] sm:$0xff] }
 0x25b   :  { %928 = vmatmul.mubr.f32.gmra.mrb[2].mxu0 %v13370_v39  ;;  %v13574_v39 = vpack.c.bf16 %v15786_v12, %v15785_v8  ;;  %v10018_v8 = vld [vmem:[%s15744_s20 + $0x118] sm:$0xff]  ;;  %v13665_v12 = vsub.f32 %v952_v18, %v1006_v47  ;;  %15797 = vst [vmem:[#allocation32_spill] sm:$0xff] %v13679_v63  ;;  %v1842_v47 = vsub.f32 %v13155_v9, %v15657_v19  ;;  %v1088_v62 = vand.u32 4294901760, %v1087_v60 }
 0x25c   :  { %11656 = vmatpush1.bf16.msra.mxu0 %v13549_v35  ;;  %v1770_v22 = vand.u32 4294901760, %v10018_v8  ;;  %v1836_v0 = vand.u32 4294901760, %v1835_v59  ;;  %v1849_v33 = vsub.f32 %v13186_v23, %v15659_v38  ;;  %v1856_v36 = vsub.f32 %v13191_v24, %v15658_v40 }
 0x25d   :  { %11657 = vmatprep.subr.bf16.mxu0 %v15775_v61  ;;  %15787 = vst [vmem:[#allocation22_spill] sm:$0xff] %v13574_v39  ;;  %11512 = vmatpush1.bf16.msra.mxu1 %v13639_v54  ;;  %v1843_v1 = vand.u32 4294901760, %v1842_v47  ;;  %v15660_v60 = vand.u32 4294901760, %v13193_v25  ;;  %v15665_v59 = vand.u32 4294901760, %v13206_v29  ;;  %v15666_v47 = vand.u32 4294901760, %v13211_v30  ;;  %v15806_v54 = vld [vmem:[#allocation14_spill] sm:$0xff] }
 0x25e   :  { %11513 = vmatprep.subr.bf16.mxu1 %v15775_v61  ;;  %v13690_v46 = vpack.c.bf16 %v1770_v22, %v1767_v43  ;;  %v13692_v18 = vsub.f32 %v10018_v8, %v1770_v22  ;;  %v1095_v8 = vand.u32 4294901760, %v1094_v7  ;;  %v1102_v43 = vand.u32 4294901760, %v1101_v15 }
 0x25f   :  { %v13717_v22 = vpack.c.bf16 %v1088_v62, %v1081_v14  ;;  %v13726_v57 = vpack.c.bf16 %v1843_v1, %v1836_v0  ;;  %v1850_v7 = vand.u32 4294901760, %v1849_v33  ;;  %v1857_v15 = vand.u32 4294901760, %v1856_v36  ;;  %v15801_v1 = vld [vmem:[#allocation8_spill] sm:$0xff] }
 0x260   :  { %11659 = vmatpush1.bf16.msra.mxu0 %v13558_v10  ;;  %15799 = vst [vmem:[#allocation34_spill] sm:$0xff] %v13690_v46  ;;  %15800 = vst [vmem:[#allocation35_spill] sm:$0xff] %v13692_v18  ;;  %v13728_v19 = vpack.c.bf16 %v1102_v43, %v1095_v8  ;;  %v1108_v14 = vsub.f32 %v13193_v25, %v15660_v60  ;;  %v15669_v62 = vand.u32 4294901760, %v13219_v32  ;;  %v15678_v8 = vand.u32 4294901760, %v15801_v1  ;;  %v15802_v43 = vld [vmem:[#allocation9_spill] sm:$0xff] }
 0x261   :  { %11660 = vmatprep.subr.bf16.mxu0 %v15775_v61  ;;  %11515 = vmatpush1.bf16.msra.mxu1 %v13675_v48  ;;  %v1115_v40 = vsub.f32 %v13206_v29, %v15665_v59  ;;  %v1863_v0 = vsub.f32 %v13211_v30, %v15666_v47  ;;  %v15682_v38 = vand.u32 4294901760, %v15802_v43  ;;  %v13744_v33 = vpack.c.bf16 %v1857_v15, %v1850_v7  ;;  %v15804_v15 = vld [vmem:[#allocation11_spill] sm:$0xff] }
 0x262   :  { %11516 = vmatprep.subr.bf16.mxu1 %v15775_v61  ;;  %v1109_v36 = vand.u32 4294901760, %v1108_v14  ;;  %v1870_v60 = vsub.f32 %v13219_v32, %v15669_v62  ;;  %v15681_v42 = vand.u32 4294901760, %v15803_v56  ;;  %v1122_v59 = vsub.f32 %v15801_v1, %v15678_v8  ;;  %v15805_v62 = vld [vmem:[#allocation13_spill] sm:$0xff] }
 0x263   :  { %v1116_v26 = vand.u32 4294901760, %v1115_v40  ;;  %v1864_v49 = vand.u32 4294901760, %v1863_v0  ;;  %v1129_v47 = vsub.f32 %v15802_v43, %v15682_v38  ;;  %v15685_v14 = vand.u32 4294901760, %v15804_v15 }
 0x264   :  { %11662 = vmatpush1.bf16.msra.mxu0 %v13566_v31  ;;  %v1877_v7 = vsub.f32 %v15803_v56, %v15681_v42  ;;  %v15689_v48 = vand.u32 4294901760, %v15805_v62  ;;  %v1123_v40 = vand.u32 4294901760, %v1122_v59  ;;  %v15807_v59 = vld [vmem:[#allocation15_spill] sm:$0xff]  ;;  %v15703_v10 = vand.u32 4294901760, %v13652_v44 }
 0x265   :  { %11663 = vmatprep.subr.bf16.mxu0 %v15775_v61  ;;  %v1130_v0 = vand.u32 4294901760, %v1129_v47  ;;  %v15692_v47 = vand.u32 4294901760, %v15807_v59  ;;  %v15712_v52 = vand.u32 4294901760, %v13669_v28 }
 0x266   :  { %v1878_v17 = vand.u32 4294901760, %v1877_v7  ;;  %v1136_v42 = vsub.f32 %v15805_v62, %v15689_v48 }
 0x267   :  { %v13772_v38 = vpack.c.bf16 %v1130_v0, %v1123_v40  ;;  %v1891_v40 = vsub.f32 %v15807_v59, %v15692_v47 }
 0x268   :  { %11665 = vmatpush1.bf16.msra.mxu0 %v13574_v39  ;;  %v1137_v7 = vand.u32 4294901760, %v1136_v42 }
 0x269   :  { %11666 = vmatprep.subr.bf16.mxu0 %v15775_v61  ;;  %v1892_v47 = vand.u32 4294901760, %v1891_v40 }
 0x26c   :  { %11668 = vmatpush1.bf16.msra.mxu0 %v13593_v21  ;;  %v15696_v21 = vand.u32 4294901760, %v13624_v16 }
 0x26d   :  { %11669 = vmatprep.subr.bf16.mxu0 %v15775_v61 }
 0x26e   :  { %v1150_v42 = vsub.f32 %v13624_v16, %v15696_v21 }
 0x270   :  { %11671 = vmatpush1.bf16.msra.mxu0 %v13613_v50  ;;  %v15688_v50 = vand.u32 4294901760, %v15806_v54 }
 0x271   :  { %11672 = vmatprep.subr.bf16.mxu0 %v15775_v61 }
 0x274   :  { %11674 = vmatpush1.bf16.msra.mxu0 %v13641_v3  ;;  %v13761_v3 = vpack.c.bf16 %v1116_v26, %v1109_v36  ;;  %v1143_v26 = vsub.f32 %v15806_v54, %v15688_v50  ;;  %v15808_v36 = vld [vmem:[#allocation16_spill] sm:$0xff]  ;;  %v15704_v50 = vand.u32 4294901760, %v13628_v58 }
 0x275   :  { %11675 = vmatprep.subr.bf16.mxu0 %v15775_v61 }
 0x276   :  { %v1144_v2 = vand.u32 4294901760, %v1143_v26  ;;  %v15702_v26 = vand.u32 4294901760, %v13630_v41 }
 0x278   :  { %11677 = vmatpush1.bf16.msra.mxu0 %v13690_v46  ;;  %v1871_v46 = vand.u32 4294901760, %v1870_v60  ;;  %v1884_v60 = vsub.f32 %v15804_v15, %v15685_v14  ;;  %v15701_v14 = vand.u32 4294901760, %v13626_v37  ;;  %v13797_v39 = vpack.c.bf16 %v1144_v2, %v1137_v7 }
 0x279   :  { %11678 = vmatprep.subr.bf16.mxu0 %v15775_v61  ;;  %v1912_v21 = vsub.f32 %v13630_v41, %v15702_v26  ;;  %v15707_v2 = vand.u32 4294901760, %v13654_v20  ;;  %v15708_v7 = vand.u32 4294901760, %v13656_v51 }
 0x27a   :  { %v13764_v8 = vpack.c.bf16 %v1871_v46, %v1864_v49  ;;  %v15695_v49 = vand.u32 4294901760, %v15808_v36  ;;  %v1885_v46 = vand.u32 4294901760, %v1884_v60  ;;  %v1157_v60 = vsub.f32 %v13626_v37, %v15701_v14 }
 0x27b   :  { %v1171_v26 = vsub.f32 %v13654_v20, %v15707_v2 }
 0x27c   :  { %v1898_v0 = vsub.f32 %v15808_v36, %v15695_v49  ;;  %v13788_v48 = vpack.c.bf16 %v1885_v46, %v1878_v17  ;;  %v1905_v49 = vsub.f32 %v13628_v58, %v15704_v50  ;;  %v1151_v17 = vand.u32 4294901760, %v1150_v42 }
 0x27d   :  { %v1158_v46 = vand.u32 4294901760, %v1157_v60  ;;  %v1164_v42 = vsub.f32 %v13652_v44, %v15703_v10  ;;  %v15709_v60 = vand.u32 4294901760, %v13658_v55  ;;  %v15711_v50 = vand.u32 4294901760, %v13667_v27 }
 0x27e   :  { %v1899_v31 = vand.u32 4294901760, %v1898_v0  ;;  %v1906_v14 = vand.u32 4294901760, %v1905_v49  ;;  %v1913_v0 = vand.u32 4294901760, %v1912_v21 }
 0x27f   :  { %v13810_v40 = vpack.c.bf16 %v1158_v46, %v1151_v17  ;;  %v1165_v49 = vand.u32 4294901760, %v1164_v42  ;;  %v1926_v21 = vsub.f32 %v13658_v55, %v15709_v60  ;;  %v15710_v17 = vand.u32 4294901760, %v13665_v12 }
 0x280   :  { %v13806_v35 = vpack.c.bf16 %v1899_v31, %v1892_v47  ;;  %v1919_v31 = vsub.f32 %v13656_v51, %v15708_v7  ;;  %v13822_v47 = vpack.c.bf16 %v1913_v0, %v1906_v14  ;;  %v1172_v46 = vand.u32 4294901760, %v1171_v26 }
 0x281   :  { %15809 = vst [vmem:[#allocation8_spill] sm:$0xff] %v13810_v40  ;;  %v1927_v2 = vand.u32 4294901760, %v1926_v21  ;;  %v1178_v7 = vsub.f32 %v13665_v12, %v15710_v17  ;;  %v15713_v14 = vand.u32 4294901760, %v13672_v53  ;;  %v1185_v42 = vsub.f32 %v13667_v27, %v15711_v50 }
 0x282   :  { %15810 = vst [vmem:[#allocation9_spill] sm:$0xff] %v13822_v47  ;;  %v1920_v10 = vand.u32 4294901760, %v1919_v31  ;;  %v13834_v0 = vpack.c.bf16 %v1172_v46, %v1165_v49  ;;  %v1933_v26 = vsub.f32 %v13669_v28, %v15712_v52  ;;  %v15714_v17 = vand.u32 4294901760, %v13677_v45 }
 0x283   :  { %v1179_v60 = vand.u32 4294901760, %v1178_v7  ;;  %v1940_v21 = vsub.f32 %v13672_v53, %v15713_v14  ;;  %v1186_v47 = vand.u32 4294901760, %v1185_v42  ;;  %v15715_v46 = vand.u32 4294901760, %v13679_v63 }
 0x284   :  { %15811 = vst [vmem:[#allocation10_spill] sm:$0xff] %v13834_v0  ;;  %v13842_v31 = vpack.c.bf16 %v1927_v2, %v1920_v10  ;;  %v1934_v49 = vand.u32 4294901760, %v1933_v26  ;;  %v15716_v0 = vand.u32 4294901760, %v13681_v34  ;;  %v1192_v52 = vsub.f32 %v13677_v45, %v15714_v17 }
 0x285   :  { %v1941_v50 = vand.u32 4294901760, %v1940_v21  ;;  %v15717_v10 = vand.u32 4294901760, %v13692_v18  ;;  %v13854_v2 = vpack.c.bf16 %v1186_v47, %v1179_v60  ;;  %v1199_v7 = vsub.f32 %v13679_v63, %v15715_v46 }
 0x286   :  { %15812 = vst [vmem:[#allocation11_spill] sm:$0xff] %v13842_v31  ;;  %v1947_v42 = vsub.f32 %v13681_v34, %v15716_v0  ;;  %v1193_v14 = vand.u32 4294901760, %v1192_v52 }
 0x287   :  { %v13862_v26 = vpack.c.bf16 %v1941_v50, %v1934_v49  ;;  %v1954_v21 = vsub.f32 %v13692_v18, %v15717_v10  ;;  %v1200_v17 = vand.u32 4294901760, %v1199_v7 }
 0x288   :  { %v1948_v31 = vand.u32 4294901760, %v1947_v42 }
 0x289   :  { %v1955_v40 = vand.u32 4294901760, %v1954_v21  ;;  %v13867_v60 = vpack.c.bf16 %v1200_v17, %v1193_v14 }
 0x28b   :  { %v13869_v47 = vpack.c.bf16 %v1955_v40, %v1948_v31 }
 0x32a   :  { %v922_v17 = vpop.f32.mrb[0].mxu0 }
 0x32b   :  { %v934_v21 = vand.u32 2147483647, %v922_v17  ;;  %v924_v49 = vpop.f32.mrb[1].mxu0 }
 0x32c   :  { %v935_v10 = vand.u32 2147483647, %v924_v49 }
 0x32d   :  { %v13907_v50 = vand.u32 4294901760, %v934_v21 }
 0x32e   :  { %v958_v40 = vsel %vm956_vm4, %v935_v10, 0  ;;  %v929_v52 = vpop.f32.mrb[2].mxu0 }
 0x32f   :  { %v13911_v14 = vsub.f32 %v934_v21, %v13907_v50  ;;  %v13913_v31 = vand.u32 4294901760, %v958_v40  ;;  %v936_v0 = vand.u32 2147483647, %v929_v52  ;;  %v931_v7 = vpop.f32.mrb[3].mxu0 }
 0x330   :  { %v937_v46 = vand.u32 2147483647, %v931_v7 }
 0x331   :  { %15813 = vst [vmem:[#allocation13_spill] sm:$0xff] %v13911_v14  ;;  %v13916_v42 = vsub.f32 %v958_v40, %v13913_v31  ;;  %v13918_v17 = vand.u32 4294901760, %v936_v0  ;;  %v13921_v49 = vand.u32 4294901760, %v13911_v14 }
 0x332   :  { %v961_v34 = vsel %vm956_vm4, %v937_v46, 0 }
 0x333   :  { %15814 = vst [vmem:[#allocation14_spill] sm:$0xff] %v13916_v42  ;;  %v13925_v10 = vsub.f32 %v936_v0, %v13918_v17  ;;  %v13927_v21 = vand.u32 4294901760, %v961_v34  ;;  %v13930_v18 = vand.u32 4294901760, %v13916_v42  ;;  %v1054_v52 = vsub.f32 %v13911_v14, %v13921_v49 }
 0x335   :  { %15815 = vst [vmem:[#allocation15_spill] sm:$0xff] %v13925_v10  ;;  %15816 = vst [vmem:[#allocation16_spill] sm:$0xff] %v13930_v18  ;;  %v13935_v40 = vsub.f32 %v961_v34, %v13927_v21  ;;  %v1048_v7 = vsub.f32 %v13916_v42, %v13930_v18  ;;  %v13940_v45 = vand.u32 4294901760, %v13925_v10  ;;  %v13947_v63 = vand.u32 4294901760, %v1054_v52 }
 0x337   :  { %15817 = vst [vmem:[#allocation36_spill] sm:$0xff] %v13935_v40  ;;  %v13942_v46 = vand.u32 4294901760, %v1048_v7  ;;  %v13945_v0 = vand.u32 4294901760, %v13935_v40  ;;  %15819 = vst [vmem:[#allocation38_spill] sm:$0xff] %v13947_v63  ;;  %v1069_v28 = vsub.f32 %v13925_v10, %v13940_v45 }
 0x339   :  { %15818 = vst [vmem:[#allocation37_spill] sm:$0xff] %v13942_v46  ;;  %1050 = vmatprep.mubr.f32.mxu1 %v13942_v46  ;;  %1805 = vmatprep.mubr.f32.mxu0 %v13942_v46  ;;  %v1063_v34 = vsub.f32 %v13935_v40, %v13945_v0  ;;  %v13963_v7 = vand.u32 4294901760, %v1069_v28  ;;  %v15823_v28 = vld [vmem:[#allocation9_spill] sm:$0xff]  ;;  %v15868_v46 = vand.u32 4294901760, %v13137_v5 }
 0x33a   :  { %1056 = vmatmul.mubr.f32.vlgmr.msra.gmra.mrb[0].mxu1 %v13947_v63  ;;  %1811 = vmatmul.mubr.f32.vlgmr.msra.gmra.mrb[4].mxu0 %v13947_v63  ;;  %v15867_v63 = vand.u32 4294901760, %v13135_v4 }
 0x33b   :  { %11518 = vmatpush1.bf16.msra.mxu1 %v13717_v22  ;;  %11680 = vmatpush1.bf16.msra.mxu0 %v13726_v57  ;;  %v13959_v52 = vand.u32 4294901760, %v1063_v34  ;;  %15821 = vst [vmem:[#allocation40_spill] sm:$0xff] %v13963_v7  ;;  %v15828_v57 = vpack.c.bf16 %v13167_v13, %v13159_v11  ;;  %v15830_v22 = vpack.c.bf16 %v13206_v29, %v13193_v25 }
 0x33c   :  { %11519 = vmatprep.subr.bf16.mxu1 %v15775_v61  ;;  %11681 = vmatprep.subr.bf16.mxu0 %v15775_v61  ;;  %v15837_v34 = vpack.c.bf16 %v13630_v41, %v13628_v58 }
 0x33d   :  { %15820 = vst [vmem:[#allocation39_spill] sm:$0xff] %v13959_v52  ;;  %1065 = vmatprep.mubr.f32.mxu1 %v13959_v52  ;;  %1820 = vmatprep.mubr.f32.mxu0 %v13959_v52  ;;  %v15866_v52 = vld [vmem:[#allocation34_spill] sm:$0xff] }
 0x33e   :  { %1071 = vmatmul.mubr.f32.gmra.mrb[2].mxu1 %v13963_v7  ;;  %1826 = vmatmul.mubr.f32.gmra.mrb[6].mxu0 %v13963_v7  ;;  %v15865_v7 = vld [vmem:[#allocation30_spill] sm:$0xff] }
 0x33f   :  { %11521 = vmatpush1.bf16.msra.mxu1 %v13728_v19  ;;  %11683 = vmatpush1.bf16.msra.mxu0 %v13744_v33  ;;  %v15825_v19 = vld [vmem:[#allocation11_spill] sm:$0xff]  ;;  %v15832_v33 = vpack.c.bf16 %v15802_v43, %v15801_v1 }
 0x340   :  { %1231 = vmatprep.mubr.f32.mxu1 %v13913_v31  ;;  %1986 = vmatprep.mubr.f32.mxu0 %v13913_v31 }
 0x341   :  { %11522 = vmatprep.subr.bf16.mxu1 %v15775_v61  ;;  %11684 = vmatprep.subr.bf16.mxu0 %v15775_v61 }
 0x343   :  { %11524 = vmatpush1.bf16.msra.mxu1 %v13761_v3  ;;  %11686 = vmatpush1.bf16.msra.mxu0 %v13764_v8  ;;  %v15822_v3 = vld [vmem:[#allocation8_spill] sm:$0xff]  ;;  %v15831_v8 = vpack.c.bf16 %v13219_v32, %v13211_v30 }
 0x344   :  { %11525 = vmatprep.subr.bf16.mxu1 %v15775_v61  ;;  %11687 = vmatprep.subr.bf16.mxu0 %v15775_v61 }
 0x347   :  { %11527 = vmatpush1.bf16.msra.mxu1 %v13772_v38  ;;  %11689 = vmatpush1.bf16.msra.mxu0 %v13788_v48  ;;  %v15824_v48 = vld [vmem:[#allocation10_spill] sm:$0xff]  ;;  %v15829_v38 = vpack.c.bf16 %v13191_v24, %v13186_v23 }
 0x348   :  { %11528 = vmatprep.subr.bf16.mxu1 %v15775_v61  ;;  %11690 = vmatprep.subr.bf16.mxu0 %v15775_v61 }
 0x34b   :  { %11530 = vmatpush1.bf16.msra.mxu1 %v13797_v39  ;;  %11692 = vmatpush1.bf16.msra.mxu0 %v13806_v35  ;;  %v15826_v35 = vpack.c.bf16 %v13137_v5, %v13135_v4  ;;  %v15827_v39 = vpack.c.bf16 %v13155_v9, %v13142_v6  ;;  %v15871_v4 = vand.u32 4294901760, %v13159_v11  ;;  %v15872_v5 = vand.u32 4294901760, %v13167_v13 }
 0x34c   :  { %11531 = vmatprep.subr.bf16.mxu1 %v15775_v61  ;;  %11693 = vmatprep.subr.bf16.mxu0 %v15775_v61  ;;  %v15875_v11 = vand.u32 4294901760, %v13193_v25  ;;  %v15876_v13 = vand.u32 4294901760, %v13206_v29  ;;  %v15881_v25 = vand.u32 4294901760, %v15803_v56  ;;  %v15882_v29 = vand.u32 4294901760, %v15804_v15 }
 0x34f   :  { %11533 = vmatpush1.bf16.msra.mxu1 %v15822_v3  ;;  %11695 = vmatpush1.bf16.msra.mxu0 %v15823_v28  ;;  %v15838_v3 = vpack.c.bf16 %v13654_v20, %v13652_v44  ;;  %v15839_v28 = vpack.c.bf16 %v13658_v55, %v13656_v51 }
 0x350   :  { %11534 = vmatprep.subr.bf16.mxu1 %v15775_v61  ;;  %11696 = vmatprep.subr.bf16.mxu0 %v15775_v61 }
 0x353   :  { %11536 = vmatpush1.bf16.msra.mxu1 %v15824_v48  ;;  %11698 = vmatpush1.bf16.msra.mxu0 %v15825_v19  ;;  %v15840_v48 = vpack.c.bf16 %v13667_v27, %v13665_v12  ;;  %v15841_v19 = vld [vmem:[#allocation29_spill] sm:$0xff] }
 0x354   :  { %11537 = vmatprep.subr.bf16.mxu1 %v15775_v61  ;;  %11699 = vmatprep.subr.bf16.mxu0 %v15775_v61 }
 0x357   :  { %11539 = vmatpush1.bf16.msra.mxu1 %v13854_v2  ;;  %11701 = vmatpush1.bf16.msra.mxu0 %v13862_v26  ;;  %v15833_v2 = vpack.c.bf16 %v15804_v15, %v15803_v56  ;;  %v15834_v26 = vpack.c.bf16 %v15806_v54, %v15805_v62  ;;  %v15887_v56 = vand.u32 4294901760, %v13624_v16  ;;  %v15888_v15 = vand.u32 4294901760, %v13626_v37 }
 0x358   :  { %11540 = vmatprep.subr.bf16.mxu1 %v15775_v61  ;;  %11702 = vmatprep.subr.bf16.mxu0 %v15775_v61 }
 0x35b   :  { %11542 = vmatpush1.bf16.msra.mxu1 %v13867_v60  ;;  %11704 = vmatpush1.bf16.msra.mxu0 %v13869_v47  ;;  %v15835_v60 = vpack.c.bf16 %v15808_v36, %v15807_v59  ;;  %v15836_v47 = vpack.c.bf16 %v13626_v37, %v13624_v16  ;;  %v15893_v16 = vand.u32 4294901760, %v13656_v51  ;;  %v15894_v37 = vand.u32 4294901760, %v13658_v55 }
 0x35c   :  { %11543 = vmatprep.subr.bf16.mxu1 %v15775_v61  ;;  %11705 = vmatprep.subr.bf16.mxu0 %v15775_v61 }
 0x35e   :  { %1233 = vmatmul.mubr.f32.vlgmr.msra.gmra.mrb[0].mxu1 %v13907_v50  ;;  %1988 = vmatmul.mubr.f32.vlgmr.msra.gmra.mrb[4].mxu0 %v13907_v50 }
 0x35f   :  { %1238 = vmatprep.mubr.f32.mxu1 %v13927_v21  ;;  %11545 = vmatpush1.bf16.msra.mxu1 %v15826_v35  ;;  %v15842_v35 = vpack.c.bf16 %v13672_v53, %v15841_v19 }
 0x360   :  { %1993 = vmatprep.mubr.f32.mxu0 %v13927_v21  ;;  %11707 = vmatpush1.bf16.msra.mxu0 %v15827_v39  ;;  %v15843_v39 = vld [vmem:[#allocation32_spill] sm:$0xff] }
 0x361   :  { %11546 = vmatprep.subr.bf16.mxu1 %v15775_v61  ;;  %11708 = vmatprep.subr.bf16.mxu0 %v15775_v61  ;;  %v15900_v55 = vand.u32 4294901760, %v15843_v39 }
 0x362   :  { %1240 = vmatmul.mubr.f32.gmra.mrb[2].mxu1 %v13918_v17  ;;  %1995 = vmatmul.mubr.f32.gmra.mrb[6].mxu0 %v13918_v17 }
 0x363   :  { %11548 = vmatpush1.bf16.msra.mxu1 %v15828_v57  ;;  %1347 = vmatprep.mubr.f32.mxu1 %v13916_v42  ;;  %v15844_v57 = vld [vmem:[#allocation31_spill] sm:$0xff] }
 0x364   :  { %11710 = vmatpush1.bf16.msra.mxu0 %v15829_v38  ;;  %2102 = vmatprep.mubr.f32.mxu0 %v13916_v42  ;;  %v15845_v38 = vpack.c.bf16 %v15843_v39, %v15844_v57  ;;  %v15864_v42 = vld [vmem:[#allocation28_spill] sm:$0xff]  ;;  %v15899_v51 = vand.u32 4294901760, %v15844_v57  ;;  %v15905_v57 = vld [vmem:[#allocation27_spill] sm:$0xff] }
 0x365   :  { %11549 = vmatprep.subr.bf16.mxu1 %v15775_v61  ;;  %11711 = vmatprep.subr.bf16.mxu0 %v15775_v61  ;;  %v10019_v39 = vld [vmem:[%s15744_s20 + $0x120] sm:$0xff] }
 0x367   :  { %11551 = vmatpush1.bf16.msra.mxu1 %v15830_v22  ;;  %v15846_v22 = vld [vmem:[#allocation35_spill] sm:$0xff] }
 0x368   :  { %11713 = vmatpush1.bf16.msra.mxu0 %v15831_v8  ;;  %11552 = vmatprep.subr.bf16.mxu1 %v15775_v61  ;;  %v15847_v8 = vld [vmem:[#allocation33_spill] sm:$0xff] }
 0x369   :  { %11714 = vmatprep.subr.bf16.mxu0 %v15775_v61 }
 0x36b   :  { %11554 = vmatpush1.bf16.msra.mxu1 %v15832_v33  ;;  %v15848_v33 = vpack.c.bf16 %v15846_v22, %v15847_v8 }
 0x36c   :  { %11716 = vmatpush1.bf16.msra.mxu0 %v15833_v2  ;;  %11555 = vmatprep.subr.bf16.mxu1 %v15775_v61  ;;  %v15849_v2 = vld [vmem:[#allocation5_spill] sm:$0xff] }
 0x36d   :  { %11717 = vmatprep.subr.bf16.mxu0 %v15775_v61 }
 0x36f   :  { %11557 = vmatpush1.bf16.msra.mxu1 %v15834_v26  ;;  %v15850_v26 = vld [vmem:[#allocation18_spill] sm:$0xff] }
 0x370   :  { %11719 = vmatpush1.bf16.msra.mxu0 %v15835_v60  ;;  %11558 = vmatprep.subr.bf16.mxu1 %v15775_v61  ;;  %v15851_v60 = vld [vmem:[#allocation6_spill] sm:$0xff] }
 0x371   :  { %11720 = vmatprep.subr.bf16.mxu0 %v15775_v61 }
 0x373   :  { %11560 = vmatpush1.bf16.msra.mxu1 %v15836_v47  ;;  %v15852_v47 = vld [vmem:[#allocation19_spill] sm:$0xff] }
 0x374   :  { %11722 = vmatpush1.bf16.msra.mxu0 %v15837_v34  ;;  %11561 = vmatprep.subr.bf16.mxu1 %v15775_v61  ;;  %v15853_v34 = vld [vmem:[#allocation7_spill] sm:$0xff] }
 0x375   :  { %11723 = vmatprep.subr.bf16.mxu0 %v15775_v61 }
 0x377   :  { %11563 = vmatpush1.bf16.msra.mxu1 %v15838_v3  ;;  %v15854_v3 = vld [vmem:[#allocation20_spill] sm:$0xff] }
 0x378   :  { %11725 = vmatpush1.bf16.msra.mxu0 %v15839_v28  ;;  %11564 = vmatprep.subr.bf16.mxu1 %v15775_v61  ;;  %v15855_v28 = vld [vmem:[#allocation12_spill] sm:$0xff] }
 0x379   :  { %11726 = vmatprep.subr.bf16.mxu0 %v15775_v61 }
 0x37b   :  { %11566 = vmatpush1.bf16.msra.mxu1 %v15840_v48  ;;  %v15856_v48 = vld [vmem:[#allocation21_spill] sm:$0xff] }
 0x37c   :  { %11728 = vmatpush1.bf16.msra.mxu0 %v15842_v35  ;;  %11567 = vmatprep.subr.bf16.mxu1 %v15775_v61  ;;  %v15857_v35 = vld [vmem:[#allocation17_spill] sm:$0xff] }
 0x37d   :  { %11729 = vmatprep.subr.bf16.mxu0 %v15775_v61 }
 0x37f   :  { %11569 = vmatpush1.bf16.msra.mxu1 %v15845_v38  ;;  %v15858_v38 = vld [vmem:[#allocation22_spill] sm:$0xff] }
 0x380   :  { %11731 = vmatpush1.bf16.msra.mxu0 %v15848_v33  ;;  %11570 = vmatprep.subr.bf16.mxu1 %v15775_v61  ;;  %v15859_v33 = vld [vmem:[#allocation23_spill] sm:$0xff] }
 0x381   :  { %11732 = vmatprep.subr.bf16.mxu0 %v15775_v61 }
 0x382   :  { %1350 = vmatmul.mubr.f32.vlgmr.msra.gmra.mrb[0].mxu1 %v13911_v14 }
 0x383   :  { %2105 = vmatmul.mubr.f32.vlgmr.msra.gmra.mrb[4].mxu0 %v13911_v14  ;;  %1356 = vmatprep.mubr.f32.mxu1 %v13935_v40  ;;  %v15863_v14 = vld [vmem:[#allocation27_spill] sm:$0xff] }
 0x384   :  { %11572 = vmatpush1.bf16.msra.mxu1 %v15849_v2  ;;  %2111 = vmatprep.mubr.f32.mxu0 %v13935_v40  ;;  %v15862_v40 = vld [vmem:[#allocation26_spill] sm:$0xff] }
 0x385   :  { %11734 = vmatpush1.bf16.msra.mxu0 %v15850_v26  ;;  %11573 = vmatprep.subr.bf16.mxu1 %v15775_v61 }
 0x386   :  { %1359 = vmatmul.mubr.f32.gmra.mrb[2].mxu1 %v13925_v10  ;;  %11735 = vmatprep.subr.bf16.mxu0 %v15775_v61 }
 0x387   :  { %2114 = vmatmul.mubr.f32.gmra.mrb[6].mxu0 %v13925_v10  ;;  %1449 = vmatprep.mubr.f32.mxu1 %v13930_v18  ;;  %v15861_v10 = vld [vmem:[#allocation25_spill] sm:$0xff] }
 0x388   :  { %11575 = vmatpush1.bf16.msra.mxu1 %v15851_v60  ;;  %2204 = vmatprep.mubr.f32.mxu0 %v13930_v18  ;;  %v15860_v18 = vld [vmem:[#allocation24_spill] sm:$0xff] }
 0x389   :  { %11737 = vmatpush1.bf16.msra.mxu0 %v15852_v47  ;;  %11576 = vmatprep.subr.bf16.mxu1 %v15775_v61 }
 0x38a   :  { %11738 = vmatprep.subr.bf16.mxu0 %v15775_v61 }
 0x38c   :  { %11578 = vmatpush1.bf16.msra.mxu1 %v15853_v34 }
 0x38d   :  { %11740 = vmatpush1.bf16.msra.mxu0 %v15854_v3  ;;  %11579 = vmatprep.subr.bf16.mxu1 %v15775_v61 }
 0x38e   :  { %11741 = vmatprep.subr.bf16.mxu0 %v15775_v61 }
 0x390   :  { %11581 = vmatpush1.bf16.msra.mxu1 %v15855_v28 }
 0x391   :  { %11743 = vmatpush1.bf16.msra.mxu0 %v15856_v48  ;;  %11582 = vmatprep.subr.bf16.mxu1 %v15775_v61 }
 0x392   :  { %11744 = vmatprep.subr.bf16.mxu0 %v15775_v61 }
 0x394   :  { %11584 = vmatpush1.bf16.msra.mxu1 %v15857_v35 }
 0x395   :  { %11746 = vmatpush1.bf16.msra.mxu0 %v15858_v38  ;;  %11585 = vmatprep.subr.bf16.mxu1 %v15775_v61 }
 0x396   :  { %11747 = vmatprep.subr.bf16.mxu0 %v15775_v61 }
 0x398   :  { %11587 = vmatpush1.bf16.msra.mxu1 %v15859_v33 }
 0x399   :  { %11749 = vmatpush1.bf16.msra.mxu0 %v15860_v18  ;;  %11588 = vmatprep.subr.bf16.mxu1 %v15775_v61 }
 0x39a   :  { %11750 = vmatprep.subr.bf16.mxu0 %v15775_v61 }
 0x39c   :  { %11590 = vmatpush1.bf16.msra.mxu1 %v15861_v10 }
 0x39d   :  { %11752 = vmatpush1.bf16.msra.mxu0 %v15862_v40  ;;  %11591 = vmatprep.subr.bf16.mxu1 %v15775_v61  ;;  %v11598_v40 = vpack.c.bf16 %v15868_v46, %v15867_v63  ;;  %v11601_v63 = vpack.c.bf16 %v15872_v5, %v15871_v4  ;;  %v15880_v46 = vand.u32 4294901760, %v15802_v43  ;;  %v11769_v5 = vpack.c.bf16 %v15882_v29, %v15881_v25  ;;  %v10027_v29 = vld [vmem:[%s15744_s20 + $0x160] sm:$0xff] }
 0x39e   :  { %11753 = vmatprep.subr.bf16.mxu0 %v15775_v61  ;;  %v15886_v43 = vand.u32 4294901760, %v15808_v36  ;;  %v15892_v36 = vand.u32 4294901760, %v13654_v20  ;;  %v15898_v20 = vand.u32 4294901760, %v13672_v53  ;;  %v15903_v53 = vld [vmem:[#allocation25_spill] sm:$0xff] }
 0x3a0   :  { %11593 = vmatpush1.bf16.msra.mxu1 %v15863_v14  ;;  %v15869_v14 = vand.u32 4294901760, %v13142_v6  ;;  %v15873_v6 = vand.u32 4294901760, %v13186_v23  ;;  %v15877_v23 = vand.u32 4294901760, %v13211_v30  ;;  %v15883_v30 = vand.u32 4294901760, %v15805_v62 }
 0x3a1   :  { %11755 = vmatpush1.bf16.msra.mxu0 %v15864_v42  ;;  %11594 = vmatprep.subr.bf16.mxu1 %v15775_v61  ;;  %v15870_v42 = vand.u32 4294901760, %v13155_v9  ;;  %v15874_v9 = vand.u32 4294901760, %v13191_v24  ;;  %v15878_v24 = vand.u32 4294901760, %v13219_v32  ;;  %v15884_v32 = vand.u32 4294901760, %v15806_v54 }
 0x3a2   :  { %11756 = vmatprep.subr.bf16.mxu0 %v15775_v61  ;;  %v15889_v54 = vand.u32 4294901760, %v13628_v58  ;;  %v15890_v62 = vand.u32 4294901760, %v13630_v41  ;;  %v15895_v58 = vand.u32 4294901760, %v13665_v12  ;;  %v15896_v41 = vand.u32 4294901760, %v13667_v27 }
 0x3a3   :  { %v11760_v10 = vpack.c.bf16 %v15870_v42, %v15869_v14  ;;  %v11763_v14 = vpack.c.bf16 %v15874_v9, %v15873_v6  ;;  %v11604_v42 = vpack.c.bf16 %v15876_v13, %v15875_v11  ;;  %v11613_v9 = vpack.c.bf16 %v15888_v15, %v15887_v56 }
 0x3a4   :  { %11596 = vmatpush1.bf16.msra.mxu1 %v15865_v7  ;;  %v11778_v13 = vpack.c.bf16 %v15894_v37, %v15893_v16  ;;  %v15901_v12 = vand.u32 4294901760, %v15847_v8  ;;  %v15902_v27 = vand.u32 4294901760, %v15846_v22  ;;  %v15906_v22 = vld [vmem:[#allocation28_spill] sm:$0xff]  ;;  %v2476_v8 = vand.u32 4294901760, %v10019_v39  ;;  %v14351_v16 = vld [vmem:[%s15744_s20 + $0x190] sm:$0xff] }
 0x3a5   :  { %11758 = vmatpush1.bf16.msra.mxu0 %v15866_v52  ;;  %11597 = vmatprep.subr.bf16.mxu1 %v15775_v61  ;;  %v14356_v37 = vld [vmem:[%s15744_s20 + $0x198] sm:$0xff] }
 0x3a6   :  { %11759 = vmatprep.subr.bf16.mxu0 %v15775_v61 }
 0x3a7   :  { %1453 = vmatmul.mubr.f32.vlgmr.msra.gmra.mrb[0].mxu1 %v13921_v49 }
 0x3a8   :  { %2208 = vmatmul.mubr.f32.vlgmr.msra.gmra.mrb[4].mxu0 %v13921_v49  ;;  %1460 = vmatprep.mubr.f32.mxu1 %v13945_v0 }
 0x3a9   :  { %11599 = vmatpush1.bf16.msra.mxu1 %v11598_v40  ;;  %2215 = vmatprep.mubr.f32.mxu0 %v13945_v0  ;;  %v15879_v40 = vand.u32 4294901760, %v15801_v1  ;;  %v15885_v1 = vand.u32 4294901760, %v15807_v59  ;;  %v15891_v59 = vand.u32 4294901760, %v13652_v44  ;;  %v15897_v44 = vand.u32 4294901760, %v15841_v19  ;;  %v15904_v19 = vld [vmem:[#allocation26_spill] sm:$0xff] }
 0x3aa   :  { %11761 = vmatpush1.bf16.msra.mxu0 %v11760_v10  ;;  %11600 = vmatprep.subr.bf16.mxu1 %v15775_v61  ;;  %v11766_v10 = vpack.c.bf16 %v15878_v24, %v15877_v23  ;;  %v11622_v24 = vpack.c.bf16 %v15900_v55, %v15899_v51  ;;  %v14374_v51 = vld [vmem:[%s15744_s20 + $0x1a0] sm:$0xff]  ;;  %v14379_v55 = vld [vmem:[%s15744_s20 + $0x1a8] sm:$0xff] }
 0x3ab   :  { %1464 = vmatmul.mubr.f32.gmra.mrb[2].mxu1 %v13940_v45  ;;  %11762 = vmatprep.subr.bf16.mxu0 %v15775_v61  ;;  %v11607_v4 = vpack.c.bf16 %v15880_v46, %v15879_v40  ;;  %v11772_v6 = vpack.c.bf16 %v15886_v43, %v15885_v1  ;;  %v11616_v11 = vpack.c.bf16 %v15892_v36, %v15891_v59  ;;  %v15907_v40 = vld [vmem:[#allocation37_spill] sm:$0xff]  ;;  %v10029_v1 = vld [vmem:[%s15744_s20 + $0x170] sm:$0xff]  ;;  %v10030_v43 = vld [vmem:[%s15744_s20 + $0x178] sm:$0xff] }
 0x3ac   :  { %2219 = vmatmul.mubr.f32.gmra.mrb[6].mxu0 %v13940_v45  ;;  %1588 = vmatprep.mubr.f32.mxu1 %v13913_v31  ;;  %v11781_v23 = vpack.c.bf16 %v15898_v20, %v15897_v44  ;;  %v2506_v56 = vand.u32 4294901760, %v10029_v1  ;;  %v2509_v15 = vand.u32 4294901760, %v10030_v43 }
 0x3ad   :  { %11602 = vmatpush1.bf16.msra.mxu1 %v11601_v63  ;;  %2343 = vmatprep.mubr.f32.mxu0 %v13913_v31  ;;  %v11610_v63 = vpack.c.bf16 %v15884_v32, %v15883_v30  ;;  %v2500_v32 = vand.u32 4294901760, %v10027_v29 }
 0x3ae   :  { %11764 = vmatpush1.bf16.msra.mxu0 %v11763_v14  ;;  %11603 = vmatprep.subr.bf16.mxu1 %v15775_v61  ;;  %v11775_v14 = vpack.c.bf16 %v15890_v62, %v15889_v54  ;;  %v14337_v54 = vld [vmem:[%s15744_s20 + $0x188] sm:$0xff]  ;;  %v14339_v62 = vsub.f32 %v10019_v39, %v2476_v8  ;;  %v14344_v59 = vpack.c.bf16 %v2509_v15, %v2506_v56  ;;  %v2527_v39 = vand.u32 4294901760, %v14379_v55 }
 0x3af   :  { %11765 = vmatprep.subr.bf16.mxu0 %v15775_v61 }
 0x3b0   :  { %v2591_v20 = vand.u32 4294901760, %v14339_v62 }
 0x3b1   :  { %11605 = vmatpush1.bf16.msra.mxu1 %v11604_v42  ;;  %v11619_v42 = vpack.c.bf16 %v15896_v41, %v15895_v58  ;;  %v2518_v41 = vand.u32 4294901760, %v14351_v16 }
 0x3b2   :  { %11767 = vmatpush1.bf16.msra.mxu0 %v11766_v10  ;;  %11606 = vmatprep.subr.bf16.mxu1 %v15775_v61  ;;  %v11784_v10 = vpack.c.bf16 %v15902_v27, %v15901_v12 }
 0x3b3   :  { %11768 = vmatprep.subr.bf16.mxu0 %v15775_v61 }
 0x3b5   :  { %11608 = vmatpush1.bf16.msra.mxu1 %v11607_v4 }
 0x3b6   :  { %11770 = vmatpush1.bf16.msra.mxu0 %v11769_v5  ;;  %11609 = vmatprep.subr.bf16.mxu1 %v15775_v61  ;;  %v10028_v5 = vld [vmem:[%s15744_s20 + $0x168] sm:$0xff] }
 0x3b7   :  { %11771 = vmatprep.subr.bf16.mxu0 %v15775_v61 }
 0x3b9   :  { %11611 = vmatpush1.bf16.msra.mxu1 %v11610_v63  ;;  %v2503_v63 = vand.u32 4294901760, %v10028_v5 }
 0x3ba   :  { %11773 = vmatpush1.bf16.msra.mxu0 %v11772_v6  ;;  %11612 = vmatprep.subr.bf16.mxu1 %v15775_v61 }
 0x3bb   :  { %11774 = vmatprep.subr.bf16.mxu0 %v15775_v61  ;;  %v14326_v6 = vpack.c.bf16 %v2503_v63, %v2500_v32 }
 0x3bd   :  { %11614 = vmatpush1.bf16.msra.mxu1 %v11613_v9  ;;  %v14332_v9 = vld [vmem:[%s15744_s20 + $0x180] sm:$0xff] }
 0x3be   :  { %11776 = vmatpush1.bf16.msra.mxu0 %v11775_v14  ;;  %11615 = vmatprep.subr.bf16.mxu1 %v15775_v61  ;;  %v2512_v36 = vand.u32 4294901760, %v14332_v9 }
 0x3bf   :  { %11777 = vmatprep.subr.bf16.mxu0 %v15775_v61 }
 0x3c1   :  { %11617 = vmatpush1.bf16.msra.mxu1 %v11616_v11  ;;  %v2515_v11 = vand.u32 4294901760, %v14337_v54 }
 0x3c2   :  { %11779 = vmatpush1.bf16.msra.mxu0 %v11778_v13  ;;  %11618 = vmatprep.subr.bf16.mxu1 %v15775_v61 }
 0x3c3   :  { %11780 = vmatprep.subr.bf16.mxu0 %v15775_v61  ;;  %v14366_v44 = vpack.c.bf16 %v2515_v11, %v2512_v36 }
 0x3c5   :  { %11620 = vmatpush1.bf16.msra.mxu1 %v11619_v42  ;;  %v2521_v42 = vand.u32 4294901760, %v14356_v37 }
 0x3c6   :  { %11782 = vmatpush1.bf16.msra.mxu0 %v11781_v23  ;;  %11621 = vmatprep.subr.bf16.mxu1 %v15775_v61 }
 0x3c7   :  { %11783 = vmatprep.subr.bf16.mxu0 %v15775_v61  ;;  %v14389_v27 = vpack.c.bf16 %v2521_v42, %v2518_v41 }
 0x3c9   :  { %11623 = vmatpush1.bf16.msra.mxu1 %v11622_v24 }
 0x3ca   :  { %11785 = vmatpush1.bf16.msra.mxu0 %v11784_v10  ;;  %11624 = vmatprep.subr.bf16.mxu1 %v15775_v61 }
 0x3cb   :  { %11786 = vmatprep.subr.bf16.mxu0 %v15775_v61 }
 0x3cc   :  { %1590 = vmatmul.mubr.f32.vlgmr.msra.gmra.mrb[0].mxu1 %v13907_v50 }
 0x3cd   :  { %2345 = vmatmul.mubr.f32.vlgmr.msra.gmra.mrb[4].mxu0 %v13907_v50  ;;  %1595 = vmatprep.mubr.f32.mxu1 %v13927_v21 }
 0x3ce   :  { %11626 = vmatpush1.bf16.msra.mxu1 %v15849_v2  ;;  %2350 = vmatprep.mubr.f32.mxu0 %v13927_v21 }
 0x3cf   :  { %11788 = vmatpush1.bf16.msra.mxu0 %v15850_v26  ;;  %11627 = vmatprep.subr.bf16.mxu1 %v15775_v61  ;;  %v10021_v26 = vld [vmem:[%s15744_s20 + $0x130] sm:$0xff] }
 0x3d0   :  { %1597 = vmatmul.mubr.f32.gmra.mrb[2].mxu1 %v13918_v17  ;;  %11789 = vmatprep.subr.bf16.mxu0 %v15775_v61 }
 0x3d1   :  { %2352 = vmatmul.mubr.f32.gmra.mrb[6].mxu0 %v13918_v17  ;;  %1685 = vmatprep.mubr.f32.mxu1 %v13913_v31 }
 0x3d2   :  { %11629 = vmatpush1.bf16.msra.mxu1 %v15851_v60  ;;  %2440 = vmatprep.mubr.f32.mxu0 %v13913_v31  ;;  %v10022_v60 = vld [vmem:[%s15744_s20 + $0x138] sm:$0xff] }
 0x3d3   :  { %11791 = vmatpush1.bf16.msra.mxu0 %v15852_v47  ;;  %11630 = vmatprep.subr.bf16.mxu1 %v15775_v61 }
 0x3d4   :  { %11792 = vmatprep.subr.bf16.mxu0 %v15775_v61 }
 0x3d6   :  { %11632 = vmatpush1.bf16.msra.mxu1 %v15853_v34  ;;  %v2482_v34 = vand.u32 4294901760, %v10021_v26 }
 0x3d7   :  { %11794 = vmatpush1.bf16.msra.mxu0 %v15854_v3  ;;  %11633 = vmatprep.subr.bf16.mxu1 %v15775_v61  ;;  %v2485_v3 = vand.u32 4294901760, %v10022_v60 }
 0x3d8   :  { %11795 = vmatprep.subr.bf16.mxu0 %v15775_v61  ;;  %v14359_v13 = vsub.f32 %v10021_v26, %v2482_v34 }
 0x3d9   :  { %v14361_v58 = vsub.f32 %v10022_v60, %v2485_v3 }
 0x3da   :  { %11635 = vmatpush1.bf16.msra.mxu1 %v15855_v28  ;;  %v10023_v28 = vld [vmem:[%s15744_s20 + $0x140] sm:$0xff]  ;;  %v2605_v10 = vand.u32 4294901760, %v14359_v13 }
 0x3db   :  { %11797 = vmatpush1.bf16.msra.mxu0 %v15856_v48  ;;  %11636 = vmatprep.subr.bf16.mxu1 %v15775_v61  ;;  %v10024_v48 = vld [vmem:[%s15744_s20 + $0x148] sm:$0xff] }
 0x3dc   :  { %11798 = vmatprep.subr.bf16.mxu0 %v15775_v61 }
 0x3de   :  { %11638 = vmatpush1.bf16.msra.mxu1 %v15857_v35  ;;  %v2491_v35 = vand.u32 4294901760, %v10024_v48 }
 0x3df   :  { %11800 = vmatpush1.bf16.msra.mxu0 %v15858_v38  ;;  %11639 = vmatprep.subr.bf16.mxu1 %v15775_v61  ;;  %v10025_v38 = vld [vmem:[%s15744_s20 + $0x150] sm:$0xff] }
 0x3e0   :  { %11801 = vmatprep.subr.bf16.mxu0 %v15775_v61  ;;  %v2494_v4 = vand.u32 4294901760, %v10025_v38  ;;  %v14383_v12 = vsub.f32 %v10024_v48, %v2491_v35 }
 0x3e2   :  { %11641 = vmatpush1.bf16.msra.mxu1 %v15859_v33  ;;  %v10026_v33 = vld [vmem:[%s15744_s20 + $0x158] sm:$0xff]  ;;  %v15738_v60 = vand.u32 4294901760, %v14383_v12 }
 0x3e3   :  { %11803 = vmatpush1.bf16.msra.mxu0 %v15860_v18  ;;  %11642 = vmatprep.subr.bf16.mxu1 %v15775_v61  ;;  %v10020_v18 = vld [vmem:[%s15744_s20 + $0x128] sm:$0xff]  ;;  %v2497_v25 = vand.u32 4294901760, %v10026_v33  ;;  %s9993_s20 = sshll.u32 %s12951_s21, 4  ;;  %s9994_s20 = int_to_ptr.vmem [resolvable:$true] %s9993_s20 }
 0x3e4   :  { %11804 = vmatprep.subr.bf16.mxu0 %v15775_v61  ;;  %v2479_v2 = vand.u32 4294901760, %v10020_v18  ;;  %s12903_s2 = scalar_lea.vmem %s9994_s20, 32  ;;  %p12908_p1 = scmp.lt.s32.totalorder %s9994_s20, %s9994_s20 }
 0x3e5   :  { %v14316_v30 = vpack.c.bf16 %v2497_v25, %v2494_v4  ;;  %p12904_p0 = scmp.ne.s32.totalorder %s9994_s20, %s12903_s2  ;;  %p12909_p2 = scmp.lt.s32.totalorder %s12903_s2, %s12903_s2 }
 0x3e6   :  { %11644 = vmatpush1.bf16.msra.mxu1 %v15903_v53  ;;  %v14280_v47 = vpack.c.bf16 %v2479_v2, %v2476_v8  ;;  %v14341_v14 = vsub.f32 %v10020_v18, %v2479_v2  ;;  %v2612_v53 = vand.u32 4294901760, %v14361_v58  ;;  %v2592_v18 = vsub.f32 %v14339_v62, %v2591_v20 }
 0x3e7   :  { %11806 = vmatpush1.bf16.msra.mxu0 %v15904_v19  ;;  %11645 = vmatprep.subr.bf16.mxu1 %v15775_v61  ;;  %v2524_v19 = vand.u32 4294901760, %v14374_v51  ;;  %v2606_v8 = vsub.f32 %v14359_v13, %v2605_v10  ;;  %p12910_p3 = por %p12909_p2, %p12908_p1 }
 0x3e8   :  { %11807 = vmatprep.subr.bf16.mxu0 %v15775_v61  ;;  %v2598_v23 = vand.u32 4294901760, %v14341_v14  ;;  %v2613_v2 = vsub.f32 %v14361_v58, %v2612_v53 }
 0x3e9   :  { %p12911_p4 = pnand %p12910_p3, %p12904_p0 }
 0x3ea   :  { %11647 = vmatpush1.bf16.msra.mxu1 %v15905_v57  ;;  %v2599_v57 = vsub.f32 %v14341_v14, %v2598_v23 }
 0x3eb   :  { %11809 = vmatpush1.bf16.msra.mxu0 %v15906_v22  ;;  %11648 = vmatprep.subr.bf16.mxu1 %v15775_v61  ;;  %v14403_v22 = vsub.f32 %v10025_v38, %v2494_v4  ;;  %v2614_v38 = vand.u32 4294901760, %v2613_v2  ;;  %v14431_v4 = vsub.f32 %v10028_v5, %v2503_v63  ;;  %v15909_v5 = vld [vmem:[#allocation39_spill] sm:$0xff] }
 0x3ec   :  { %11810 = vmatprep.subr.bf16.mxu0 %v15775_v61  ;;  %v2600_v48 = vand.u32 4294901760, %v2599_v57  ;;  %v14439_v57 = vsub.f32 %v10030_v43, %v2509_v15  ;;  %v14456_v15 = vsub.f32 %v14337_v54, %v2515_v11 }
 0x3ed   :  { %v2654_v43 = vand.u32 4294901760, %v14431_v4 }
 0x3ee   :  { %11650 = vmatpush1.bf16.msra.mxu1 %v15865_v7  ;;  %v2488_v7 = vand.u32 4294901760, %v10023_v28 }
 0x3ef   :  { %11812 = vmatpush1.bf16.msra.mxu0 %v15866_v52  ;;  %11813 = vmatprep.subr.bf16.mxu1 %v15775_v61  ;;  %v14293_v52 = vpack.c.bf16 %v2485_v3, %v2482_v34  ;;  %v14413_v34 = vsub.f32 %v10026_v33, %v2497_v25  ;;  %v14420_v3 = vpack.c.bf16 %v2527_v39, %v2524_v19 }
 0x3f0   :  { %v14306_v46 = vpack.c.bf16 %v2491_v35, %v2488_v7  ;;  %v14381_v24 = vsub.f32 %v10023_v28, %v2488_v7  ;;  %v2593_v28 = vand.u32 4294901760, %v2592_v18  ;;  %v14423_v7 = vsub.f32 %v10027_v29, %v2500_v32 }
 0x3f1   :  { %1687 = vmatmul.mubr.f32.vlgmr.msra.gmra.mrb[0].mxu1 %v13907_v50  ;;  %v2607_v35 = vand.u32 4294901760, %v2606_v8  ;;  %v2633_v18 = vand.u32 4294901760, %v14403_v22  ;;  %v2640_v29 = vand.u32 4294901760, %v14413_v34  ;;  %v14437_v32 = vsub.f32 %v10029_v1, %v2506_v56  ;;  %v15908_v8 = vld [vmem:[#allocation38_spill] sm:$0xff] }
 0x3f2   :  { %2442 = vmatmul.mubr.f32.vlgmr.msra.gmra.mrb[4].mxu0 %v13907_v50  ;;  %1692 = vmatprep.mubr.f32.mxu1 %v13927_v21  ;;  %v15737_v26 = vand.u32 4294901760, %v14381_v24  ;;  %v11841_v25 = vpack.c.bf16 %v2600_v48, %v2593_v28  ;;  %v2647_v1 = vand.u32 4294901760, %v14423_v7  ;;  %v14453_v56 = vsub.f32 %v14332_v9, %v2512_v36  ;;  %v15910_v48 = vld [vmem:[#allocation40_spill] sm:$0xff] }
 0x3f3   :  { %2447 = vmatprep.mubr.f32.mxu0 %v13927_v21  ;;  %11815 = vmatpush1.bf16.msra.mxu1 %v14280_v47  ;;  %v11844_v2 = vpack.c.bf16 %v2614_v38, %v2607_v35  ;;  %v2634_v63 = vsub.f32 %v14403_v22, %v2633_v18  ;;  %v2641_v28 = vsub.f32 %v14413_v34, %v2640_v29  ;;  %v2661_v38 = vand.u32 4294901760, %v14437_v32 }
 0x3f4   :  { %11816 = vmatprep.subr.bf16.mxu1 %v15775_v61  ;;  %v2620_v33 = vsub.f32 %v14381_v24, %v15737_v26  ;;  %v2648_v9 = vsub.f32 %v14423_v7, %v2647_v1  ;;  %v2655_v54 = vsub.f32 %v14431_v4, %v2654_v43  ;;  %v14472_v36 = vsub.f32 %v14351_v16, %v2518_v41 }
 0x3f5   :  { %1694 = vmatmul.mubr.f32.gmra.mrb[2].mxu1 %v13918_v17  ;;  %v2662_v11 = vsub.f32 %v14437_v32, %v2661_v38 }
 0x3f6   :  { %2449 = vmatmul.mubr.f32.gmra.mrb[6].mxu0 %v13918_v17  ;;  %2562 = vmatprep.mubr.f32.mxu1 %v15907_v40  ;;  %v2627_v40 = vsub.f32 %v14383_v12, %v15738_v60  ;;  %v2621_v26 = vand.u32 4294901760, %v2620_v33  ;;  %v15739_v33 = vand.u32 4294901760, %v14439_v57  ;;  %v2649_v41 = vand.u32 4294901760, %v2648_v9 }
 0x3f7   :  { %11818 = vmatpush1.bf16.msra.mxu1 %v14293_v52 }
 0x3f8   :  { %11819 = vmatprep.subr.bf16.mxu1 %v15775_v61  ;;  %v2628_v60 = vand.u32 4294901760, %v2627_v40  ;;  %v2635_v40 = vand.u32 4294901760, %v2634_v63  ;;  %v14491_v63 = vsub.f32 %v14374_v51, %v2524_v19  ;;  %v2689_v51 = vand.u32 4294901760, %v14472_v36 }
 0x3fa   :  { %v11847_v35 = vpack.c.bf16 %v2628_v60, %v2621_v26  ;;  %v2669_v26 = vsub.f32 %v14439_v57, %v15739_v33  ;;  %v2675_v60 = vand.u32 4294901760, %v14453_v56 }
 0x3fb   :  { %11821 = vmatpush1.bf16.msra.mxu1 %v14306_v46 }
 0x3fc   :  { %11822 = vmatprep.subr.bf16.mxu1 %v15775_v61  ;;  %v2676_v33 = vsub.f32 %v14453_v56, %v2675_v60 }
 0x3ff   :  { %11824 = vmatpush1.bf16.msra.mxu1 %v14316_v30 }
 0x400   :  { %11825 = vmatprep.subr.bf16.mxu1 %v15775_v61 }
 0x403   :  { %11827 = vmatpush1.bf16.msra.mxu1 %v14326_v6 }
 0x404   :  { %11828 = vmatprep.subr.bf16.mxu1 %v15775_v61 }
 0x407   :  { %11830 = vmatpush1.bf16.msra.mxu1 %v14344_v59 }
 0x408   :  { %11831 = vmatprep.subr.bf16.mxu1 %v15775_v61 }
 0x40b   :  { %11833 = vmatpush1.bf16.msra.mxu1 %v14366_v44 }
 0x40c   :  { %11834 = vmatprep.subr.bf16.mxu1 %v15775_v61 }
 0x40f   :  { %11836 = vmatpush1.bf16.msra.mxu1 %v14389_v27 }
 0x410   :  { %11837 = vmatprep.subr.bf16.mxu1 %v15775_v61 }
 0x413   :  { %11839 = vmatpush1.bf16.msra.mxu1 %v14420_v3 }
 0x414   :  { %11840 = vmatprep.subr.bf16.mxu1 %v15775_v61 }
 0x416   :  { %2568 = vmatmul.mubr.f32.vlgmr.msra.gmra.mrb[4].mxu1 %v15908_v8  ;;  %v2682_v8 = vand.u32 4294901760, %v14456_v15 }
 0x417   :  { %2577 = vmatprep.mubr.f32.mxu1 %v15909_v5  ;;  %11842 = vmatpush1.bf16.msra.mxu1 %v11841_v25  ;;  %v2642_v25 = vand.u32 4294901760, %v2641_v28  ;;  %v2656_v5 = vand.u32 4294901760, %v2655_v54  ;;  %v2663_v28 = vand.u32 4294901760, %v2662_v11  ;;  %v2690_v54 = vsub.f32 %v14472_v36, %v2689_v51 }
 0x418   :  { %11843 = vmatprep.subr.bf16.mxu1 %v15775_v61 }
 0x419   :  { %v11850_v16 = vpack.c.bf16 %v2642_v25, %v2635_v40  ;;  %v2677_v25 = vand.u32 4294901760, %v2676_v33 }
 0x41a   :  { %2583 = vmatmul.mubr.f32.gmra.mrb[6].mxu1 %v15910_v48  ;;  %v2670_v48 = vand.u32 4294901760, %v2669_v26 }
 0x41b   :  { %11845 = vmatpush1.bf16.msra.mxu1 %v11844_v2  ;;  %2743 = vmatprep.mubr.f32.mxu1 %v13913_v31  ;;  %v14485_v2 = vsub.f32 %v14356_v37, %v2521_v42  ;;  %v2683_v37 = vsub.f32 %v14456_v15, %v2682_v8  ;;  %v14502_v42 = vsub.f32 %v14379_v55, %v2527_v39  ;;  %v2703_v39 = vand.u32 4294901760, %v14491_v63 }
 0x41c   :  { %11846 = vmatprep.subr.bf16.mxu1 %v15775_v61  ;;  %v11856_v40 = vpack.c.bf16 %v2670_v48, %v2663_v28 }
 0x41d   :  { %v2696_v19 = vand.u32 4294901760, %v14485_v2  ;;  %v2684_v9 = vand.u32 4294901760, %v2683_v37  ;;  %v2710_v11 = vand.u32 4294901760, %v14502_v42 }
 0x41f   :  { %11848 = vmatpush1.bf16.msra.mxu1 %v11847_v35  ;;  %v11853_v35 = vpack.c.bf16 %v2656_v5, %v2649_v41  ;;  %v2697_v55 = vsub.f32 %v14485_v2, %v2696_v19  ;;  %v11859_v26 = vpack.c.bf16 %v2684_v9, %v2677_v25  ;;  %v2704_v41 = vsub.f32 %v14491_v63, %v2703_v39  ;;  %v15911_v9 = vld [vmem:[#allocation14_spill] sm:$0xff] }
 0x420   :  { %11849 = vmatprep.subr.bf16.mxu1 %v15775_v61  ;;  %v2711_v5 = vsub.f32 %v14502_v42, %v2710_v11  ;;  %v11871_v25 = vpack.c.bf16 %v14361_v58, %v14359_v13  ;;  %v15918_v13 = vand.u32 4294901760, %v14439_v57 }
 0x421   :  { %v2698_v33 = vand.u32 4294901760, %v2697_v55  ;;  %v2705_v48 = vand.u32 4294901760, %v2704_v41  ;;  %v11877_v55 = vpack.c.bf16 %v14413_v34, %v14403_v22  ;;  %v11889_v41 = vpack.c.bf16 %v14485_v2, %v14472_v36 }
 0x422   :  { %v2712_v37 = vand.u32 4294901760, %v2711_v5  ;;  %v11892_v5 = vpack.c.bf16 %v14502_v42, %v14491_v63  ;;  %v11937_v58 = vpack.c.bf16 %v15918_v13, %v2661_v38 }
 0x423   :  { %11851 = vmatpush1.bf16.msra.mxu1 %v11850_v16  ;;  %v2691_v16 = vand.u32 4294901760, %v2690_v54  ;;  %v11874_v54 = vpack.c.bf16 %v14383_v12, %v14381_v24 }
 0x424   :  { %11852 = vmatprep.subr.bf16.mxu1 %v15775_v61 }
 0x425   :  { %v11862_v28 = vpack.c.bf16 %v2698_v33, %v2691_v16  ;;  %v11883_v16 = vpack.c.bf16 %v14439_v57, %v14437_v32  ;;  %v11886_v33 = vpack.c.bf16 %v14456_v15, %v14453_v56 }
 0x427   :  { %11854 = vmatpush1.bf16.msra.mxu1 %v11853_v35  ;;  %v11865_v35 = vpack.c.bf16 %v2712_v37, %v2705_v48  ;;  %v15913_v48 = vld [vmem:[#allocation36_spill] sm:$0xff]  ;;  %v15914_v37 = vld [vmem:[#allocation15_spill] sm:$0xff] }
 0x428   :  { %11855 = vmatprep.subr.bf16.mxu1 %v15775_v61 }
 0x42b   :  { %11857 = vmatpush1.bf16.msra.mxu1 %v11856_v40  ;;  %v11868_v40 = vpack.c.bf16 %v14341_v14, %v14339_v62  ;;  %v15916_v62 = vand.u32 4294901760, %v14381_v24  ;;  %v15917_v14 = vand.u32 4294901760, %v14383_v12  ;;  %v11946_v24 = vpack.c.bf16 %v2710_v11, %v2703_v39 }
 0x42c   :  { %11858 = vmatprep.subr.bf16.mxu1 %v15775_v61 }
 0x42f   :  { %11860 = vmatpush1.bf16.msra.mxu1 %v11859_v26  ;;  %v11880_v26 = vpack.c.bf16 %v14431_v4, %v14423_v7 }
 0x430   :  { %11861 = vmatprep.subr.bf16.mxu1 %v15775_v61 }
 0x433   :  { %11863 = vmatpush1.bf16.msra.mxu1 %v11862_v28  ;;  %v15912_v28 = vld [vmem:[#allocation13_spill] sm:$0xff] }
 0x434   :  { %11864 = vmatprep.subr.bf16.mxu1 %v15775_v61 }
 0x437   :  { %11866 = vmatpush1.bf16.msra.mxu1 %v11865_v35  ;;  %v15915_v35 = vld [vmem:[#allocation16_spill] sm:$0xff] }
 0x438   :  { %11867 = vmatprep.subr.bf16.mxu1 %v15775_v61 }
 0x43a   :  { %2745 = vmatmul.mubr.f32.vlgmr.msra.gmra.mrb[4].mxu1 %v13907_v50 }
 0x43b   :  { %2750 = vmatprep.mubr.f32.mxu1 %v13927_v21  ;;  %11869 = vmatpush1.bf16.msra.mxu1 %v11868_v40  ;;  %v11922_v40 = vpack.c.bf16 %v2598_v23, %v2591_v20  ;;  %v11940_v20 = vpack.c.bf16 %v2682_v8, %v2675_v60  ;;  %v11943_v23 = vpack.c.bf16 %v2696_v19, %v2689_v51 }
 0x43c   :  { %11870 = vmatprep.subr.bf16.mxu1 %v15775_v61 }
 0x43e   :  { %2752 = vmatmul.mubr.f32.gmra.mrb[6].mxu1 %v13918_v17 }
 0x43f   :  { %11872 = vmatpush1.bf16.msra.mxu1 %v11871_v25  ;;  %2859 = vmatprep.mubr.f32.mxu1 %v15911_v9  ;;  %v11925_v25 = vpack.c.bf16 %v2612_v53, %v2605_v10 }
 0x440   :  { %11873 = vmatprep.subr.bf16.mxu1 %v15775_v61 }
 0x443   :  { %11875 = vmatpush1.bf16.msra.mxu1 %v11874_v54 }
 0x444   :  { %11876 = vmatprep.subr.bf16.mxu1 %v15775_v61 }
 0x447   :  { %11878 = vmatpush1.bf16.msra.mxu1 %v11877_v55 }
 0x448   :  { %11879 = vmatprep.subr.bf16.mxu1 %v15775_v61 }
 0x44b   :  { %11881 = vmatpush1.bf16.msra.mxu1 %v11880_v26 }
 0x44c   :  { %11882 = vmatprep.subr.bf16.mxu1 %v15775_v61 }
 0x44f   :  { %11884 = vmatpush1.bf16.msra.mxu1 %v11883_v16 }
 0x450   :  { %11885 = vmatprep.subr.bf16.mxu1 %v15775_v61 }
 0x453   :  { %11887 = vmatpush1.bf16.msra.mxu1 %v11886_v33 }
 0x454   :  { %11888 = vmatprep.subr.bf16.mxu1 %v15775_v61 }
 0x457   :  { %11890 = vmatpush1.bf16.msra.mxu1 %v11889_v41 }
 0x458   :  { %11891 = vmatprep.subr.bf16.mxu1 %v15775_v61 }
 0x45b   :  { %11893 = vmatpush1.bf16.msra.mxu1 %v11892_v5 }
 0x45c   :  { %11894 = vmatprep.subr.bf16.mxu1 %v15775_v61 }
 0x45e   :  { %2862 = vmatmul.mubr.f32.vlgmr.msra.gmra.mrb[4].mxu1 %v15912_v28 }
 0x45f   :  { %2868 = vmatprep.mubr.f32.mxu1 %v15913_v48  ;;  %11896 = vmatpush1.bf16.msra.mxu1 %v14280_v47 }
 0x460   :  { %11897 = vmatprep.subr.bf16.mxu1 %v15775_v61 }
 0x462   :  { %2871 = vmatmul.mubr.f32.gmra.mrb[6].mxu1 %v15914_v37 }
 0x463   :  { %11899 = vmatpush1.bf16.msra.mxu1 %v14293_v52  ;;  %2961 = vmatprep.mubr.f32.mxu1 %v15915_v35 }
 0x464   :  { %11900 = vmatprep.subr.bf16.mxu1 %v15775_v61 }
 0x467   :  { %11902 = vmatpush1.bf16.msra.mxu1 %v14306_v46 }
 0x468   :  { %11903 = vmatprep.subr.bf16.mxu1 %v15775_v61 }
 0x46b   :  { %11905 = vmatpush1.bf16.msra.mxu1 %v14316_v30 }
 0x46c   :  { %11906 = vmatprep.subr.bf16.mxu1 %v15775_v61 }
 0x46f   :  { %11908 = vmatpush1.bf16.msra.mxu1 %v14326_v6 }
 0x470   :  { %11909 = vmatprep.subr.bf16.mxu1 %v15775_v61 }
 0x473   :  { %11911 = vmatpush1.bf16.msra.mxu1 %v14344_v59 }
 0x474   :  { %11912 = vmatprep.subr.bf16.mxu1 %v15775_v61 }
 0x477   :  { %11914 = vmatpush1.bf16.msra.mxu1 %v14366_v44 }
 0x478   :  { %11915 = vmatprep.subr.bf16.mxu1 %v15775_v61 }
 0x47b   :  { %11917 = vmatpush1.bf16.msra.mxu1 %v14389_v27 }
 0x47c   :  { %11918 = vmatprep.subr.bf16.mxu1 %v15775_v61 }
 0x47f   :  { %11920 = vmatpush1.bf16.msra.mxu1 %v14420_v3 }
 0x480   :  { %11921 = vmatprep.subr.bf16.mxu1 %v15775_v61 }
 0x482   :  { %2965 = vmatmul.mubr.f32.vlgmr.msra.gmra.mrb[4].mxu1 %v13921_v49  ;;  %v11928_v49 = vpack.c.bf16 %v15917_v14, %v15916_v62 }
 0x483   :  { %2972 = vmatprep.mubr.f32.mxu1 %v13945_v0  ;;  %11923 = vmatpush1.bf16.msra.mxu1 %v11922_v40  ;;  %v11931_v0 = vpack.c.bf16 %v2640_v29, %v2633_v18  ;;  %v3288_v40 = vld [vmem:[%s15592_s3] sm:$0xff] }
 0x484   :  { %11924 = vmatprep.subr.bf16.mxu1 %v15775_v61  ;;  %v3304_v62 = vsel %vm3302_vm15, %v3288_v40, 0 }
 0x486   :  { %2976 = vmatmul.mubr.f32.gmra.mrb[6].mxu1 %v13940_v45  ;;  %v11934_v45 = vpack.c.bf16 %v2654_v43, %v2647_v1 }
 0x487   :  { %11926 = vmatpush1.bf16.msra.mxu1 %v11925_v25  ;;  %3100 = vmatprep.mubr.f32.mxu1 %v13913_v31 }
 0x488   :  { %11927 = vmatprep.subr.bf16.mxu1 %v15775_v61 }
 0x48b   :  { %11929 = vmatpush1.bf16.msra.mxu1 %v11928_v49  ;;  %v14661_v49 = vand.u32 4294901760, %v3304_v62 }
 0x48c   :  { %11930 = vmatprep.subr.bf16.mxu1 %v15775_v61 }
 0x48f   :  { %11932 = vmatpush1.bf16.msra.mxu1 %v11931_v0 }
 0x490   :  { %11933 = vmatprep.subr.bf16.mxu1 %v15775_v61 }
 0x493   :  { %11935 = vmatpush1.bf16.msra.mxu1 %v11934_v45 }
 0x494   :  { %11936 = vmatprep.subr.bf16.mxu1 %v15775_v61 }
 0x497   :  { %11938 = vmatpush1.bf16.msra.mxu1 %v11937_v58  ;;  %v14666_v58 = vsub.f32 %v3304_v62, %v14661_v49 }
 0x498   :  { %11939 = vmatprep.subr.bf16.mxu1 %v15775_v61 }
 0x49b   :  { %11941 = vmatpush1.bf16.msra.mxu1 %v11940_v20 }
 0x49c   :  { %11942 = vmatprep.subr.bf16.mxu1 %v15775_v61 }
 0x49f   :  { %11944 = vmatpush1.bf16.msra.mxu1 %v11943_v23 }
 0x4a0   :  { %11945 = vmatprep.subr.bf16.mxu1 %v15775_v61 }
 0x4a3   :  { %11947 = vmatpush1.bf16.msra.mxu1 %v11946_v24  ;;  %v3386_v24 = vand.u32 4294901760, %v14666_v58 }
 0x4a4   :  { %11948 = vmatprep.subr.bf16.mxu1 %v15775_v61 }
 0x4a6   :  { %3102 = vmatmul.mubr.f32.vlgmr.msra.gmra.mrb[4].mxu1 %v13907_v50 }
 0x4a7   :  { %3107 = vmatprep.mubr.f32.mxu1 %v13927_v21  ;;  %11950 = vmatpush1.bf16.msra.mxu1 %v14280_v47 }
 0x4a8   :  { %11951 = vmatprep.subr.bf16.mxu1 %v15775_v61 }
 0x4aa   :  { %3109 = vmatmul.mubr.f32.gmra.mrb[6].mxu1 %v13918_v17 }
 0x4ab   :  { %11953 = vmatpush1.bf16.msra.mxu1 %v14293_v52  ;;  %3197 = vmatprep.mubr.f32.mxu1 %v13913_v31 }
 0x4ac   :  { %11954 = vmatprep.subr.bf16.mxu1 %v15775_v61 }
 0x4af   :  { %11956 = vmatpush1.bf16.msra.mxu1 %v14306_v46 }
 0x4b0   :  { %11957 = vmatprep.subr.bf16.mxu1 %v15775_v61 }
 0x4b3   :  { %11959 = vmatpush1.bf16.msra.mxu1 %v14316_v30 }
 0x4b4   :  { %11960 = vmatprep.subr.bf16.mxu1 %v15775_v61 }
 0x4b7   :  { %11962 = vmatpush1.bf16.msra.mxu1 %v14326_v6 }
 0x4b8   :  { %11963 = vmatprep.subr.bf16.mxu1 %v15775_v61 }
 0x4bb   :  { %11965 = vmatpush1.bf16.msra.mxu1 %v14344_v59 }
 0x4bc   :  { %11966 = vmatprep.subr.bf16.mxu1 %v15775_v61 }
 0x4bf   :  { %11968 = vmatpush1.bf16.msra.mxu1 %v14366_v44 }
 0x4c0   :  { %11969 = vmatprep.subr.bf16.mxu1 %v15775_v61 }
 0x4c3   :  { %11971 = vmatpush1.bf16.msra.mxu1 %v14389_v27 }
 0x4c4   :  { %v1688_v31 = vpop.f32.mrb[0].mxu1  ;;  %11972 = vmatprep.subr.bf16.mxu1 %v15775_v61 }
 0x4c5   :  { %v2443_v47 = vpop.f32.mrb[4].mxu0  ;;  %v1690_v52 = vpop.f32.mrb[1].mxu1 }
 0x4c6   :  { %v2454_v46 = vmax.f32 %v1688_v31, %v2443_v47  ;;  %v2445_v30 = vpop.f32.mrb[5].mxu0  ;;  %v3387_v52 = vsub.f32 %v14666_v58, %v3386_v24 }
 0x4c7   :  { %11974 = vmatpush1.bf16.msra.mxu1 %v14420_v3 }
 0x4c8   :  { %v1695_v6 = vpop.f32.mrb[2].mxu1 }
 0x4c9   :  { %v2450_v12 = vpop.f32.mrb[6].mxu0  ;;  %v1697_v59 = vpop.f32.mrb[3].mxu1 }
 0x4ca   :  { %v2455_v10 = vmax.f32 %v1695_v6, %v2450_v12  ;;  %v2452_v53 = vpop.f32.mrb[7].mxu0  ;;  %3199 = vmatmul.mubr.f32.vlgmr.msra.gmra.mrb[4].mxu1 %v13907_v50  ;;  %v3388_v6 = vand.u32 4294901760, %v3387_v52 }
 0x4cb   :  { %3204 = vmatprep.mubr.f32.mxu1 %v13927_v21 }
 0x4cc   :  { %10549 = vmatprep.mubr.f32.mxu0 %v3388_v6 }
 0x4ce   :  { %3206 = vmatmul.mubr.f32.gmra.mrb[6].mxu1 %v13918_v17 }
 0x59d   :  { %v3200_v44 = vpop.f32.mrb[4].mxu1 }
 0x59e   :  { %v3211_v27 = vmax.f32 %v2454_v46, %v3200_v44  ;;  %v3202_v22 = vpop.f32.mrb[5].mxu1  ;;  %v3291_v44 = vld [vmem:[%s15593_s4 + $0x8] sm:$0xff] }
 0x59f   :  { %v3289_v22 = vld [vmem:[%s15592_s3 + $0x8] sm:$0xff] }
 0x5a0   :  { %v3214_v34 = vsel %vm3213_vm8, %v3211_v27, 0.0 }
 0x5a1   :  { %3215 = vadd.xlane.f32.xlu1 %v3214_v34  ;;  %v3207_v7 = vpop.f32.mrb[6].mxu1  ;;  %v12947_v34 = vmov 0  }
 0x5a2   :  { %v3212_v3 = vmax.f32 %v2455_v10, %v3207_v7  ;;  %v3209_v4 = vpop.f32.mrb[7].mxu1  ;;  %12863 = vset.pattern.permute.xlu0 %v12947_v34  ;;  %12862 = vset.pattern.permute.xlu1 %v12947_v34 }
 0x5a4   :  { %v3217_v18 = vsel %vm3213_vm8, %v3212_v3, 0.0 }
 0x5a5   :  { %3218 = vadd.xlane.f32.xlu0 %v3217_v18 }
 0x62e   :  { %v3216_v29 = vpop.xlane.xlu1 %3215 }
 0x62f   :  { %v3221_v32 = vmul.f32 0.020833334, %v3216_v29 }
 0x631   :  { %v3223_v50 = vsub.f32 %v3211_v27, %v3221_v32  ;;  %v3290_v27 = vld [vmem:[%s15593_s4] sm:$0xff] }
 0x632   :  { %v3219_v57 = vpop.xlane.xlu0 %3218 }
 0x633   :  { %v3222_v21 = vmul.f32 0.020833334, %v3219_v57  ;;  %v3225_v1 = vmul.f32 %v3223_v50, %v3223_v50 }
 0x635   :  { %v3224_v17 = vsub.f32 %v3212_v3, %v3222_v21  ;;  %v3227_v43 = vsel %vm3213_vm8, %v3225_v1, 0.0  ;;  %v3307_v3 = vsel %vm3302_vm15, %v3289_v22, 0 }
 0x636   :  { %3228 = vadd.xlane.f32.xlu0 %v3227_v43  ;;  %v14699_v32 = vand.u32 4294901760, %v3307_v3 }
 0x637   :  { %v3226_v56 = vmul.f32 %v3224_v17, %v3224_v17 }
 0x639   :  { %v3230_v15 = vsel %vm3213_vm8, %v3226_v56, 0.0 }
 0x63a   :  { %3231 = vadd.xlane.f32.xlu1 %v3230_v15  ;;  %v14708_v15 = vsub.f32 %v3307_v3, %v14699_v32 }
 0x6c3   :  { %v3229_v38 = vpop.xlane.xlu0 %3228 }
 0x6c4   :  { %v3234_v36 = vmul.f32 0.021276595, %v3229_v38 }
 0x6c6   :  { %12873 = vrsqrt.f32 %v3234_v36  ;;  %vm3238_vm10 = vcmp.eq.f32.partialorder %v3234_v36, inf  ;;  %v3241_v42 = vand.u32 2147483648, %v3234_v36  ;;  %vm3240_vm11 = vcmp.eq.f32.partialorder %v3234_v36, 0.0 }
 0x6c7   :  { %v3232_v60 = vpop.xlane.xlu1 %3231 }
 0x6c8   :  { %v3235_v8 = vmul.f32 0.021276595, %v3232_v60 }
 0x6ca   :  { %12875 = vrsqrt.f32 %v3235_v8  ;;  %vm3245_vm12 = vcmp.eq.f32.partialorder %v3235_v8, inf  ;;  %v3248_v54 = vand.u32 2147483648, %v3235_v8  ;;  %vm3247_vm13 = vcmp.eq.f32.partialorder %v3235_v8, 0.0 }
 0x6d0   :  { %v12874_v2 = vpop.eup %12873 }
 0x6d1   :  { %v3237_v63 = vmul.f32 %v12874_v2, %v3234_v36 }
 0x6d3   :  { %v3239_v51 = vsel %vm3238_vm10, %v3234_v36, %v3237_v63 }
 0x6d4   :  { %v12876_v19 = vpop.eup %12875  ;;  %v3242_v39 = vsel %vm3240_vm11, %v3241_v42, %v3239_v51  ;;  %vm6320_vm11 = vcmask 80896  }
 0x6d5   :  { %v3250_v11 = vadd.f32 1e-06, %v3242_v39  ;;  %v3244_v9 = vmul.f32 %v12876_v19, %v3235_v8  ;;  %v3396_v39 = vand.u32 4294901760, %v14708_v15 }
 0x6d7   :  { %12877 = vrcp.f32 %v3250_v11  ;;  %v3246_v55 = vsel %vm3245_vm12, %v3235_v8, %v3244_v9 }
 0x6d8   :  { %v3249_v26 = vsel %vm3247_vm13, %v3248_v54, %v3246_v55 }
 0x6d9   :  { %v3251_v16 = vadd.f32 1e-06, %v3249_v26 }
 0x6db   :  { %12879 = vrcp.f32 %v3251_v16 }
 0x6e1   :  { %v12878_v33 = vpop.eup %12877 }
 0x6e2   :  { %v3253_v41 = vmul.f32 %v12878_v33, %v3223_v50 }
 0x6e4   :  { %vm3256_vm14 = vcmp.ge.f32.partialorder %v3253_v41, 0.0  ;;  %v3258_v5 = vmul.f32 0.01, %v3253_v41 }
 0x6e5   :  { %v12880_v28 = vpop.eup %12879 }
 0x6e6   :  { %v3260_v48 = vsel %vm3256_vm14, %v3253_v41, %v3258_v5  ;;  %v3255_v37 = vmul.f32 %v12880_v28, %v3224_v17  ;;  %v3397_v28 = vsub.f32 %v14708_v15, %v3396_v39 }
 0x6e7   :  { %3264 = vrot.lane.b32.xlu0 %v3260_v48, %s12935_s22  ;;  %v3310_v35 = vand.u32 4294901760, %v3260_v48 }
 0x6e8   :  { %vm3257_vm2 = vcmp.ge.f32.partialorder %v3255_v37, 0.0  ;;  %v3259_v25 = vmul.f32 0.01, %v3255_v37 }
 0x6e9   :  { %v3406_v14 = vsub.f32 %v3260_v48, %v3310_v35 }
 0x6ea   :  { %v3261_v0 = vsel %vm3257_vm2, %v3255_v37, %v3259_v25 }
 0x6eb   :  { %3266 = vrot.lane.b32.xlu1 %v3261_v0, %s12935_s22  ;;  %v3313_v45 = vand.u32 4294901760, %v3261_v0  ;;  %3272 = vrot.lane.b32.xlu0 %v3261_v0, %s12929_s30  ;;  %v3407_v13 = vand.u32 4294901760, %v3406_v14 }
 0x6ed   :  { %v14668_v20 = vpack.c.bf16 %v3313_v45, %v3310_v35  ;;  %v3413_v23 = vsub.f32 %v3261_v0, %v3313_v45  ;;  %v3408_v31 = vsub.f32 %v3406_v14, %v3407_v13 }
 0x6ef   :  { %3270 = vrot.lane.b32.xlu1 %v3260_v48, %s12929_s30  ;;  %3278 = vrot.lane.b32.xlu0 %v3261_v0, %s12937_s23  ;;  %v3414_v47 = vand.u32 4294901760, %v3413_v23  ;;  %v14676_v46 = vpack.c.bf16 %v3413_v23, %v3406_v14  ;;  %v3409_v59 = vand.u32 4294901760, %v3408_v31 }
 0x6f0   :  { %11976 = vmatprep.subr.bf16.mxu0 %v14668_v20 }
 0x6f1   :  { %11978 = vmatpush3.bf16.msra.mxu0 %v14668_v20  ;;  %v3415_v30 = vsub.f32 %v3413_v23, %v3414_v47  ;;  %v14680_v12 = vpack.c.bf16 %v3414_v47, %v3407_v13  ;;  %v3398_v13 = vand.u32 4294901760, %v3397_v28  ;;  %v3919_v28 = vld [vmem:[%s15594_s5 + $0x20] sm:$0xff] }
 0x6f3   :  { %3276 = vrot.lane.b32.xlu1 %v3260_v48, %s12937_s23  ;;  %3284 = vrot.lane.b32.xlu0 %v3261_v0, %s15919_s24  ;;  %v3416_v10 = vand.u32 4294901760, %v3415_v30 }
 0x6f5   :  { %v14684_v53 = vpack.c.bf16 %v3416_v10, %v3409_v59 }
 0x6f7   :  { %3282 = vrot.lane.b32.xlu1 %v3260_v48, %s15919_s24  ;;  %3299 = vperm.xlu0 %12863, %v3291_v44  }
 0x6fb   :  { %3294 = vperm.xlu1 %12862, %v3290_v27  }
 0x759   :  { %v3265_v7 = vpop.permute.xlu0 %3264 }
 0x75a   :  { %v3316_v4 = vand.u32 4294901760, %v3265_v7 }
 0x75c   :  { %v14701_v57 = vsub.f32 %v3265_v7, %v3316_v4 }
 0x75d   :  { %v3267_v18 = vpop.permute.xlu1 %3266  ;;  %v3273_v29 = vpop.permute.xlu0 %3272 }
 0x75e   :  { %v3319_v50 = vand.u32 4294901760, %v3267_v18  ;;  %v3325_v21 = vand.u32 4294901760, %v3273_v29  ;;  %v3421_v60 = vand.u32 4294901760, %v14701_v57 }
 0x760   :  { %v14703_v1 = vpack.c.bf16 %v3319_v50, %v3316_v4  ;;  %v14705_v17 = vsub.f32 %v3267_v18, %v3319_v50  ;;  %v14713_v8 = vsub.f32 %v3273_v29, %v3325_v21  ;;  %v3422_v14 = vsub.f32 %v14701_v57, %v3421_v60 }
 0x761   :  { %v3271_v43 = vpop.permute.xlu1 %3270  ;;  %v3279_v56 = vpop.permute.xlu0 %3278 }
 0x762   :  { %v3428_v38 = vand.u32 4294901760, %v14705_v17  ;;  %v3322_v36 = vand.u32 4294901760, %v3271_v43  ;;  %11980 = vmatprep.subr.bf16.mxu0 %v14703_v1  ;;  %v3331_v2 = vand.u32 4294901760, %v3279_v56  ;;  %v3442_v26 = vand.u32 4294901760, %v14713_v8 }
 0x763   :  { %11982 = vmatpush3.bf16.msra.mxu0 %v14703_v1  ;;  %v3423_v59 = vand.u32 4294901760, %v3422_v14 }
 0x764   :  { %v14716_v63 = vpack.c.bf16 %v3325_v21, %v3322_v36  ;;  %v14718_v42 = vsub.f32 %v3271_v43, %v3322_v36  ;;  %v14721_v11 = vpack.c.bf16 %v3428_v38, %v3421_v60  ;;  %v14726_v16 = vsub.f32 %v3279_v56, %v3331_v2 }
 0x765   :  { %v3277_v51 = vpop.permute.xlu1 %3276  ;;  %v3285_v19 = vpop.permute.xlu0 %3284  ;;  %v3429_v37 = vsub.f32 %v14705_v17, %v3428_v38  ;;  %v3443_v6 = vsub.f32 %v14713_v8, %v3442_v26 }
 0x766   :  { %v3435_v9 = vand.u32 4294901760, %v14718_v42  ;;  %v3328_v54 = vand.u32 4294901760, %v3277_v51  ;;  %v3337_v55 = vand.u32 4294901760, %v3285_v19  ;;  %11984 = vmatprep.subr.bf16.mxu0 %v14716_v63  ;;  %v3456_v62 = vand.u32 4294901760, %v14726_v16 }
 0x767   :  { %11986 = vmatpush3.bf16.msra.mxu0 %v14716_v63  ;;  %v3430_v30 = vand.u32 4294901760, %v3429_v37  ;;  %v3444_v3 = vand.u32 4294901760, %v3443_v6  ;;  %v12023_v60 = vpack.c.bf16 %v14713_v8, %v14718_v42  ;;  %v3918_v8 = vld [vmem:[%s15594_s5 + $0x18] sm:$0xff]  ;;  %v10041_v37 = vld [vmem:[%s15594_s5 + $0x50] sm:$0xff] }
 0x768   :  { %v14729_v33 = vpack.c.bf16 %v3331_v2, %v3328_v54  ;;  %v3448_v41 = vsub.f32 %v3277_v51, %v3328_v54  ;;  %v14734_v48 = vpack.c.bf16 %v3442_v26, %v3435_v9  ;;  %v3469_v40 = vsub.f32 %v3285_v19, %v3337_v55  ;;  %v10042_v26 = vld [vmem:[%s15594_s5 + $0x58] sm:$0xf] }
 0x769   :  { %v3283_v5 = vpop.permute.xlu1 %3282  ;;  %v3436_v31 = vsub.f32 %v14718_v42, %v3435_v9  ;;  %v11999_v27 = vpack.c.bf16 %v3430_v30, %v3423_v59  ;;  %v3457_v7 = vsub.f32 %v14726_v16, %v3456_v62  ;;  %v3941_v19 = vand.u32 4294901760, %v3918_v8 }
 0x76a   :  { %v3449_v35 = vand.u32 4294901760, %v3448_v41  ;;  %v3334_v25 = vand.u32 4294901760, %v3283_v5  ;;  %11988 = vmatprep.subr.bf16.mxu0 %v14729_v33  ;;  %v3470_v47 = vand.u32 4294901760, %v3469_v40  ;;  %v12027_v2 = vpack.c.bf16 %v14726_v16, %v3448_v41 }
 0x76b   :  { %11990 = vmatpush3.bf16.msra.mxu0 %v14729_v33  ;;  %v3437_v22 = vand.u32 4294901760, %v3436_v31  ;;  %v3458_v21 = vand.u32 4294901760, %v3457_v7  ;;  %v4508_v14 = vand.u32 4294901760, %v10041_v37  ;;  %v4045_v6 = vsub.f32 %v3918_v8, %v3941_v19 }
 0x76c   :  { %v14741_v0 = vpack.c.bf16 %v3337_v55, %v3334_v25  ;;  %v3462_v45 = vsub.f32 %v3283_v5, %v3334_v25  ;;  %v14743_v23 = vpack.c.bf16 %v3456_v62, %v3449_v35  ;;  %v3450_v44 = vsub.f32 %v3448_v41, %v3449_v35  ;;  %v3920_v55 = vld [vmem:[%s15594_s5 + $0x28] sm:$0xf] }
 0x76d   :  { %v12003_v18 = vpack.c.bf16 %v3444_v3, %v3437_v22  ;;  %v3471_v50 = vsub.f32 %v3469_v40, %v3470_v47  ;;  %v4493_v35 = vsel %vm273_vm7, %v10042_v26, 0  ;;  %v3944_v25 = vand.u32 4294901760, %v3919_v28 }
 0x76e   :  { %v3463_v52 = vand.u32 4294901760, %v3462_v45  ;;  %11992 = vmatprep.subr.bf16.mxu0 %v14741_v0  ;;  %v3451_v29 = vand.u32 4294901760, %v3450_v44  ;;  %v12031_v51 = vpack.c.bf16 %v3469_v40, %v3462_v45  ;;  %v4046_v7 = vand.u32 4294901760, %v4045_v6 }
 0x76f   :  { %11994 = vmatpush3.bf16.msra.mxu0 %v14741_v0  ;;  %v3472_v38 = vand.u32 4294901760, %v3471_v50 }
 0x770   :  { %11996 = vmatprep.subr.bf16.mxu0 %v14684_v53  ;;  %v14750_v10 = vpack.c.bf16 %v3470_v47, %v3463_v52  ;;  %v3464_v4 = vsub.f32 %v3462_v45, %v3463_v52  ;;  %v12007_v43 = vpack.c.bf16 %v3458_v21, %v3451_v29 }
 0x772   :  { %10550 = vmatmul.mubr.f32.vlgmr.msra.gmra.mrb[8].mxu0 %v3398_v13  ;;  %v3465_v56 = vand.u32 4294901760, %v3464_v4 }
 0x773   :  { %11998 = vmatpush3.bf16.msra.mxu0 %v14684_v53  ;;  %10572 = vmatprep.mubr.f32.mxu0 %v14661_v49  ;;  %v12019_v53 = vpack.c.bf16 %v14705_v17, %v14701_v57 }
 0x774   :  { %12000 = vmatprep.subr.bf16.mxu0 %v11999_v27  ;;  %v12011_v36 = vpack.c.bf16 %v3472_v38, %v3465_v56  ;;  %v4047_v56 = vsub.f32 %v4045_v6, %v4046_v7 }
 0x777   :  { %12002 = vmatpush3.bf16.msra.mxu0 %v11999_v27 }
 0x778   :  { %12004 = vmatprep.subr.bf16.mxu0 %v12003_v18 }
 0x77b   :  { %12006 = vmatpush3.bf16.msra.mxu0 %v12003_v18 }
 0x77c   :  { %12008 = vmatprep.subr.bf16.mxu0 %v12007_v43 }
 0x77f   :  { %12010 = vmatpush3.bf16.msra.mxu0 %v12007_v43 }
 0x780   :  { %12012 = vmatprep.subr.bf16.mxu0 %v12011_v36 }
 0x783   :  { %12014 = vmatpush3.bf16.msra.mxu0 %v12011_v36 }
 0x784   :  { %12016 = vmatprep.subr.bf16.mxu0 %v14676_v46 }
 0x786   :  { %10573 = vmatmul.mubr.f32.vlgmr.msra.gmra.mrb[8].mxu0 %v14699_v32 }
 0x787   :  { %12018 = vmatpush3.bf16.msra.mxu0 %v14676_v46  ;;  %10595 = vmatprep.mubr.f32.mxu0 %v14666_v58  ;;  %v3916_v58 = vld [vmem:[%s15594_s5 + $0x8] sm:$0xff] }
 0x788   :  { %12020 = vmatprep.subr.bf16.mxu0 %v12019_v53  ;;  %v3935_v46 = vand.u32 4294901760, %v3916_v58 }
 0x78b   :  { %12022 = vmatpush3.bf16.msra.mxu0 %v12019_v53 }
 0x78c   :  { %12024 = vmatprep.subr.bf16.mxu0 %v12023_v60 }
 0x78f   :  { %12026 = vmatpush3.bf16.msra.mxu0 %v12023_v60 }
 0x790   :  { %12028 = vmatprep.subr.bf16.mxu0 %v12027_v2 }
 0x793   :  { %12030 = vmatpush3.bf16.msra.mxu0 %v12027_v2  ;;  %v4052_v2 = vsub.f32 %v3919_v28, %v3944_v25 }
 0x794   :  { %12032 = vmatprep.subr.bf16.mxu0 %v12031_v51 }
 0x797   :  { %12034 = vmatpush3.bf16.msra.mxu0 %v12031_v51 }
 0x798   :  { %12036 = vmatprep.subr.bf16.mxu0 %v14668_v20 }
 0x79a   :  { %10596 = vmatmul.mubr.f32.vlgmr.msra.gmra.mrb[8].mxu0 %v14708_v15  ;;  %v3917_v15 = vld [vmem:[%s15594_s5 + $0x10] sm:$0xff] }
 0x79b   :  { %12038 = vmatpush3.bf16.msra.mxu0 %v14668_v20  ;;  %10618 = vmatprep.mubr.f32.mxu0 %v3386_v24  ;;  %v3938_v42 = vand.u32 4294901760, %v3917_v15 }
 0x79c   :  { %12040 = vmatprep.subr.bf16.mxu0 %v14703_v1 }
 0x79d   :  { %v14835_v54 = vpack.c.bf16 %v3941_v19, %v3938_v42  ;;  %v4038_v30 = vsub.f32 %v3917_v15, %v3938_v42 }
 0x79f   :  { %12042 = vmatpush3.bf16.msra.mxu0 %v14703_v1  ;;  %v4039_v22 = vand.u32 4294901760, %v4038_v30 }
 0x7a0   :  { %12044 = vmatprep.subr.bf16.mxu0 %v14716_v63 }
 0x7a1   :  { %v4040_v43 = vsub.f32 %v4038_v30, %v4039_v22 }
 0x7a3   :  { %12046 = vmatpush3.bf16.msra.mxu0 %v14716_v63 }
 0x7a4   :  { %12048 = vmatprep.subr.bf16.mxu0 %v14729_v33 }
 0x7a7   :  { %12050 = vmatpush3.bf16.msra.mxu0 %v14729_v33 }
 0x7a8   :  { %12052 = vmatprep.subr.bf16.mxu0 %v14741_v0 }
 0x7ab   :  { %12054 = vmatpush3.bf16.msra.mxu0 %v14741_v0 }
 0x7ac   :  { %12056 = vmatprep.subr.bf16.mxu0 %v14680_v12 }
 0x7ae   :  { %10619 = vmatmul.mubr.f32.vlgmr.msra.gmra.mrb[8].mxu0 %v3396_v39  ;;  %v10040_v39 = vld [vmem:[%s15594_s5 + $0x48] sm:$0xff] }
 0x7af   :  { %12058 = vmatpush3.bf16.msra.mxu0 %v14680_v12  ;;  %10641 = vmatprep.mubr.f32.mxu0 %v14661_v49  ;;  %v10038_v12 = vld [vmem:[%s15594_s5 + $0x38] sm:$0xff]  ;;  %v4505_v9 = vand.u32 4294901760, %v10040_v39 }
 0x7b0   :  { %12060 = vmatprep.subr.bf16.mxu0 %v14721_v11 }
 0x7b1   :  { %v4609_v4 = vsub.f32 %v10040_v39, %v4505_v9 }
 0x7b3   :  { %12062 = vmatpush3.bf16.msra.mxu0 %v14721_v11  ;;  %v4610_v36 = vand.u32 4294901760, %v4609_v4 }
 0x7b4   :  { %12064 = vmatprep.subr.bf16.mxu0 %v14734_v48 }
 0x7b7   :  { %12066 = vmatpush3.bf16.msra.mxu0 %v14734_v48  ;;  %v3929_v48 = vsel %vm273_vm7, %v3920_v55, 0 }
 0x7b8   :  { %12068 = vmatprep.subr.bf16.mxu0 %v14743_v23  ;;  %v3947_v62 = vand.u32 4294901760, %v3929_v48 }
 0x7ba   :  { %v14869_v47 = vpack.c.bf16 %v3947_v62, %v3944_v25  ;;  %v4059_v51 = vsub.f32 %v3929_v48, %v3947_v62 }
 0x7bb   :  { %12070 = vmatpush3.bf16.msra.mxu0 %v14743_v23 }
 0x7bc   :  { %12072 = vmatprep.subr.bf16.mxu0 %v14750_v10 }
 0x7bf   :  { %12074 = vmatpush3.bf16.msra.mxu0 %v14750_v10 }
 0x7c0   :  { %12076 = vmatprep.subr.bf16.mxu0 %v14668_v20 }
 0x7c2   :  { %10642 = vmatmul.mubr.f32.vlgmr.msra.gmra.mrb[8].mxu0 %v14699_v32 }
 0x7c3   :  { %12078 = vmatpush3.bf16.msra.mxu0 %v14668_v20  ;;  %10664 = vmatprep.mubr.f32.mxu0 %v14661_v49  ;;  %v3915_v49 = vld [vmem:[%s15594_s5] sm:$0xff]  ;;  %v10037_v20 = vld [vmem:[%s15594_s5 + $0x30] sm:$0xff] }
 0x7c4   :  { %12080 = vmatprep.subr.bf16.mxu0 %v14703_v1  ;;  %v3932_v24 = vand.u32 4294901760, %v3915_v49  ;;  %v4496_v57 = vand.u32 4294901760, %v10037_v20 }
 0x7c6   :  { %v14843_v16 = vsub.f32 %v3915_v49, %v3932_v24  ;;  %v14847_v41 = vsub.f32 %v10037_v20, %v4496_v57  ;;  %v4041_v49 = vand.u32 4294901760, %v4040_v43 }
 0x7c7   :  { %12082 = vmatpush3.bf16.msra.mxu0 %v14703_v1  ;;  %v14815_v1 = vpack.c.bf16 %v3935_v46, %v3932_v24  ;;  %v4611_v24 = vsub.f32 %v4609_v4, %v4610_v36 }
 0x7c8   :  { %12084 = vmatprep.subr.bf16.mxu0 %v14716_v63  ;;  %v4025_v45 = vand.u32 4294901760, %v14843_v16  ;;  %v4589_v23 = vand.u32 4294901760, %v14847_v41 }
 0x7ca   :  { %v4026_v59 = vsub.f32 %v14843_v16, %v4025_v45  ;;  %v4590_v44 = vsub.f32 %v14847_v41, %v4589_v23 }
 0x7cb   :  { %12086 = vmatpush3.bf16.msra.mxu0 %v14716_v63  ;;  %v10039_v63 = vld [vmem:[%s15594_s5 + $0x40] sm:$0xff] }
 0x7cc   :  { %12088 = vmatprep.subr.bf16.mxu0 %v14729_v33  ;;  %v4502_v11 = vand.u32 4294901760, %v10039_v63  ;;  %v4027_v18 = vand.u32 4294901760, %v4026_v59  ;;  %v4591_v50 = vand.u32 4294901760, %v4590_v44  ;;  %v12127_v44 = vpack.c.bf16 %v4059_v51, %v4052_v2 }
 0x7ce   :  { %v14849_v5 = vpack.c.bf16 %v4505_v9, %v4502_v11  ;;  %v4602_v3 = vsub.f32 %v10039_v63, %v4502_v11  ;;  %v4612_v63 = vand.u32 4294901760, %v4611_v24  ;;  %v10046_v24 = vld [vmem:[%s15594_s5 + $0x78] sm:$0xff] }
 0x7cf   :  { %12090 = vmatpush3.bf16.msra.mxu0 %v14729_v33  ;;  %v14845_v33 = vsub.f32 %v3916_v58, %v3935_v46  ;;  %v4048_v58 = vand.u32 4294901760, %v4047_v56  ;;  %v4053_v46 = vand.u32 4294901760, %v4052_v2 }
 0x7d0   :  { %12092 = vmatprep.subr.bf16.mxu0 %v14741_v0  ;;  %v4603_v38 = vand.u32 4294901760, %v4602_v3 }
 0x7d1   :  { %v4032_v13 = vand.u32 4294901760, %v14845_v33  ;;  %v12111_v15 = vpack.c.bf16 %v4048_v58, %v4041_v49  ;;  %v4054_v42 = vsub.f32 %v4052_v2, %v4053_v46 }
 0x7d2   :  { %v4604_v20 = vsub.f32 %v4602_v3, %v4603_v38 }
 0x7d3   :  { %12094 = vmatpush3.bf16.msra.mxu0 %v14741_v0  ;;  %v4511_v0 = vand.u32 4294901760, %v4493_v35  ;;  %v4033_v10 = vsub.f32 %v14845_v33, %v4032_v13  ;;  %v4055_v55 = vand.u32 4294901760, %v4054_v42 }
 0x7d4   :  { %12096 = vmatprep.subr.bf16.mxu0 %v14815_v1  ;;  %v4605_v8 = vand.u32 4294901760, %v4604_v20  ;;  %v10045_v20 = vld [vmem:[%s15594_s5 + $0x70] sm:$0xff] }
 0x7d5   :  { %v14871_v52 = vpack.c.bf16 %v4511_v0, %v4508_v14  ;;  %v4034_v29 = vand.u32 4294901760, %v4033_v10 }
 0x7d6   :  { %10665 = vmatmul.mubr.f32.vlgmr.msra.gmra.mrb[8].mxu0 %v14699_v32  ;;  %v4499_v32 = vand.u32 4294901760, %v10038_v12  ;;  %v12183_v9 = vpack.c.bf16 %v4612_v63, %v4605_v8 }
 0x7d7   :  { %12098 = vmatpush3.bf16.msra.mxu0 %v14815_v1  ;;  %v14889_v53 = vpack.c.bf16 %v4034_v29, %v4027_v18  ;;  %v14903_v18 = vpack.c.bf16 %v4032_v13, %v4025_v45 }
 0x7d8   :  { %v14817_v17 = vpack.c.bf16 %v4499_v32, %v4496_v57  ;;  %v14859_v40 = vsub.f32 %v10038_v12, %v4499_v32  ;;  %12100 = vmatprep.subr.bf16.mxu0 %v14835_v54  ;;  %v4060_v12 = vand.u32 4294901760, %v4059_v51  ;;  %v4616_v57 = vsub.f32 %v10041_v37, %v4508_v14 }
 0x7d9   :  { %v4623_v32 = vsub.f32 %v4493_v35, %v4511_v0  ;;  %v12119_v37 = vpack.c.bf16 %v14845_v33, %v14843_v16  ;;  %v12123_v14 = vpack.c.bf16 %v4045_v6, %v4038_v30  ;;  %v12195_v0 = vpack.c.bf16 %v4609_v4, %v4602_v3  ;;  %v3300_v3 = vpop.permute.xlu0 %3299  ;;  %v3295_v16 = vpop.permute.xlu1 %3294 }
 0x7da   :  { %12168 = vmatprep.subr.bf16.mxu1 %v14817_v17  ;;  %v4596_v31 = vand.u32 4294901760, %v14859_v40  ;;  %v4061_v19 = vsub.f32 %v4059_v51, %v4060_v12  ;;  %v4617_v39 = vand.u32 4294901760, %v4616_v57  ;;  %v12191_v35 = vpack.c.bf16 %v14859_v40, %v14847_v41 }
 0x7db   :  { %12170 = vmatpush3.bf16.msra.mxu1 %v14817_v17  ;;  %12102 = vmatpush3.bf16.msra.mxu0 %v14835_v54  ;;  %v4624_v11 = vand.u32 4294901760, %v4623_v32  ;;  %v14915_v30 = vpack.c.bf16 %v4060_v12, %v4053_v46 }
 0x7dc   :  { %12172 = vmatprep.subr.bf16.mxu1 %v14849_v5  ;;  %v4597_v27 = vsub.f32 %v14859_v40, %v4596_v31  ;;  %12104 = vmatprep.subr.bf16.mxu0 %v14869_v47  ;;  %v4062_v26 = vand.u32 4294901760, %v4061_v19  ;;  %v4618_v28 = vsub.f32 %v4616_v57, %v4617_v39  ;;  %v14909_v29 = vpack.c.bf16 %v4596_v31, %v4589_v23 }
 0x7dd   :  { %v4625_v48 = vsub.f32 %v4623_v32, %v4624_v11  ;;  %v14917_v6 = vpack.c.bf16 %v4624_v11, %v4617_v39 }
 0x7de   :  { %v4598_v21 = vand.u32 4294901760, %v4597_v27  ;;  %v12115_v25 = vpack.c.bf16 %v4062_v26, %v4055_v55  ;;  %v4619_v62 = vand.u32 4294901760, %v4618_v28  ;;  %v12199_v27 = vpack.c.bf16 %v4623_v32, %v4616_v57 }
 0x7df   :  { %12174 = vmatpush3.bf16.msra.mxu1 %v14849_v5  ;;  %12106 = vmatpush3.bf16.msra.mxu0 %v14869_v47  ;;  %v4626_v59 = vand.u32 4294901760, %v4625_v48  ;;  %v5068_v57 = vand.u32 4294901760, %v10045_v20  ;;  %v5071_v32 = vand.u32 4294901760, %v10046_v24 }
 0x7e0   :  { %12176 = vmatprep.subr.bf16.mxu1 %v14871_v52  ;;  %v14891_v60 = vpack.c.bf16 %v4598_v21, %v4591_v50  ;;  %12108 = vmatprep.subr.bf16.mxu0 %v14889_v53  ;;  %v14911_v50 = vpack.c.bf16 %v4046_v7, %v4039_v22  ;;  %v14913_v21 = vpack.c.bf16 %v4610_v36, %v4603_v38 }
 0x7e1   :  { %v12187_v10 = vpack.c.bf16 %v4626_v59, %v4619_v62  ;;  %v15027_v19 = vsub.f32 %v10045_v20, %v5068_v57  ;;  %v15029_v39 = vsub.f32 %v10046_v24, %v5071_v32 }
 0x7e3   :  { %12178 = vmatpush3.bf16.msra.mxu1 %v14871_v52  ;;  %v5169_v26 = vand.u32 4294901760, %v15027_v19  ;;  %v5176_v28 = vand.u32 4294901760, %v15029_v39 }
 0x7e4   :  { %12180 = vmatprep.subr.bf16.mxu1 %v14891_v60 }
 0x8a9   :  { %v10666_v4 = vpop.f32.mrb[8].mxu0 }
 0x8aa   :  { %v12629_v33 = vadd.f32 %v10666_v4, %v3300_v3  ;;  %v3905_v45 = vpop.f32.mrb[9].mxu0  ;;  %v12267_v3 = vpack.c.bf16 %v15029_v39, %v15027_v19 }
 0x8ab   :  { %v12630_v13 = vadd.f32 %v3905_v45, %v3295_v16 }
 0x8ac   :  { %v3926_v41 = vsel %vm3921_vm3, %v12629_v33, 0  ;;  %v12291_v33 = vpack.c.bf16 %v5176_v28, %v5169_v26 }
 0x8ad   :  { %v14919_v43 = vand.u32 4294901760, %v3926_v41  ;;  %v3923_v40 = vsel %vm3921_vm3, %v12630_v13, 0 }
 0x8ae   :  { %v14921_v23 = vand.u32 4294901760, %v3923_v40 }
 0x8af   :  { %v14924_v31 = vsub.f32 %v3926_v41, %v14919_v43 }
 0x8b0   :  { %v14927_v22 = vsub.f32 %v3923_v40, %v14921_v23 }
 0x8b1   :  { %v14930_v7 = vand.u32 4294901760, %v14924_v31 }
 0x8b2   :  { %v14933_v56 = vand.u32 4294901760, %v14927_v22 }
 0x8b3   :  { %v4015_v38 = vsub.f32 %v14924_v31, %v14930_v7 }
 0x8b4   :  { %v4005_v36 = vsub.f32 %v14927_v22, %v14933_v56 }
 0x8b5   :  { %v14941_v51 = vand.u32 4294901760, %v4015_v38 }
 0x8b6   :  { %v14939_v2 = vand.u32 4294901760, %v4005_v36 }
 0x8b8   :  { %10679 = vmatprep.mubr.f32.mxu0 %v14939_v2  ;;  %10769 = vmatprep.mubr.f32.mxu1 %v14939_v2 }
 0x8b9   :  { %10680 = vmatmul.mubr.f32.vlgmr.msra.gmra.mrb[10].mxu0 %v14941_v51  ;;  %10770 = vmatmul.mubr.f32.vlgmr.msra.gmra.mrb[8].mxu1 %v14941_v51 }
 0x8ba   :  { %12110 = vmatpush3.bf16.msra.mxu0 %v14889_v53  ;;  %12182 = vmatpush3.bf16.msra.mxu1 %v14891_v60  ;;  %v10043_v53 = vld [vmem:[%s15594_s5 + $0x60] sm:$0xff]  ;;  %v10044_v60 = vld [vmem:[%s15594_s5 + $0x68] sm:$0xff] }
 0x8bb   :  { %10694 = vmatprep.mubr.f32.mxu0 %v14921_v23  ;;  %10784 = vmatprep.mubr.f32.mxu1 %v14921_v23  ;;  %v5062_v49 = vand.u32 4294901760, %v10043_v53  ;;  %v5065_v58 = vand.u32 4294901760, %v10044_v60 }
 0x8bc   :  { %12112 = vmatprep.subr.bf16.mxu0 %v12111_v15  ;;  %12184 = vmatprep.subr.bf16.mxu1 %v12183_v9 }
 0x8bd   :  { %v15004_v46 = vsub.f32 %v10043_v53, %v5062_v49  ;;  %v15006_v12 = vsub.f32 %v10044_v60, %v5065_v58  ;;  %v15025_v42 = vpack.c.bf16 %v5065_v58, %v5062_v49 }
 0x8be   :  { %12114 = vmatpush3.bf16.msra.mxu0 %v12111_v15  ;;  %12186 = vmatpush3.bf16.msra.mxu1 %v12183_v9  ;;  %v10047_v15 = vld [vmem:[%s15594_s5 + $0x80] sm:$0xff]  ;;  %v15033_v9 = vpack.c.bf16 %v5071_v32, %v5068_v57 }
 0x8bf   :  { %12116 = vmatprep.subr.bf16.mxu0 %v12115_v25  ;;  %12188 = vmatprep.subr.bf16.mxu1 %v12187_v10  ;;  %v5155_v8 = vand.u32 4294901760, %v15004_v46  ;;  %v5162_v63 = vand.u32 4294901760, %v15006_v12 }
 0x8c1   :  { %v5163_v55 = vsub.f32 %v15006_v12, %v5162_v63  ;;  %v12287_v4 = vpack.c.bf16 %v5162_v63, %v5155_v8 }
 0x8c2   :  { %12118 = vmatpush3.bf16.msra.mxu0 %v12115_v25  ;;  %12190 = vmatpush3.bf16.msra.mxu1 %v12187_v10  ;;  %v5177_v10 = vsub.f32 %v15029_v39, %v5176_v28 }
 0x8c3   :  { %12120 = vmatprep.subr.bf16.mxu0 %v12119_v37  ;;  %12192 = vmatprep.subr.bf16.mxu1 %v12191_v35  ;;  %v5164_v59 = vand.u32 4294901760, %v5163_v55 }
 0x8c5   :  { %10695 = vmatmul.mubr.f32.vlgmr.msra.gmra.mrb[10].mxu0 %v14919_v43  ;;  %10785 = vmatmul.mubr.f32.vlgmr.msra.gmra.mrb[8].mxu1 %v14919_v43 }
 0x8c6   :  { %12122 = vmatpush3.bf16.msra.mxu0 %v12119_v37  ;;  %10709 = vmatprep.mubr.f32.mxu0 %v14927_v22 }
 0x8c7   :  { %12194 = vmatpush3.bf16.msra.mxu1 %v12191_v35  ;;  %10799 = vmatprep.mubr.f32.mxu1 %v14927_v22 }
 0x8c8   :  { %12124 = vmatprep.subr.bf16.mxu0 %v12123_v14  ;;  %12196 = vmatprep.subr.bf16.mxu1 %v12195_v0 }
 0x8ca   :  { %12126 = vmatpush3.bf16.msra.mxu0 %v12123_v14 }
 0x8cb   :  { %12198 = vmatpush3.bf16.msra.mxu1 %v12195_v0  ;;  %12128 = vmatprep.subr.bf16.mxu0 %v12127_v44 }
 0x8cc   :  { %12200 = vmatprep.subr.bf16.mxu1 %v12199_v27 }
 0x8ce   :  { %12130 = vmatpush3.bf16.msra.mxu0 %v12127_v44  ;;  %v5178_v44 = vand.u32 4294901760, %v5177_v10 }
 0x8cf   :  { %12202 = vmatpush3.bf16.msra.mxu1 %v12199_v27  ;;  %12132 = vmatprep.subr.bf16.mxu0 %v14815_v1 }
 0x8d0   :  { %12204 = vmatprep.subr.bf16.mxu1 %v14817_v17 }
 0x8d1   :  { %10710 = vmatmul.mubr.f32.vlgmr.msra.gmra.mrb[10].mxu0 %v14924_v31 }
 0x8d2   :  { %10800 = vmatmul.mubr.f32.vlgmr.msra.gmra.mrb[8].mxu1 %v14924_v31  ;;  %12134 = vmatpush3.bf16.msra.mxu0 %v14815_v1 }
 0x8d3   :  { %10724 = vmatprep.mubr.f32.mxu0 %v14933_v56  ;;  %12206 = vmatpush3.bf16.msra.mxu1 %v14817_v17 }
 0x8d4   :  { %10814 = vmatprep.mubr.f32.mxu1 %v14933_v56  ;;  %12136 = vmatprep.subr.bf16.mxu0 %v14835_v54 }
 0x8d5   :  { %12208 = vmatprep.subr.bf16.mxu1 %v14849_v5 }
 0x8d6   :  { %12138 = vmatpush3.bf16.msra.mxu0 %v14835_v54 }
 0x8d7   :  { %12210 = vmatpush3.bf16.msra.mxu1 %v14849_v5  ;;  %12140 = vmatprep.subr.bf16.mxu0 %v14869_v47 }
 0x8d8   :  { %12212 = vmatprep.subr.bf16.mxu1 %v14871_v52 }
 0x8da   :  { %12142 = vmatpush3.bf16.msra.mxu0 %v14869_v47 }
 0x8db   :  { %12214 = vmatpush3.bf16.msra.mxu1 %v14871_v52  ;;  %12144 = vmatprep.subr.bf16.mxu0 %v14903_v18 }
 0x8dc   :  { %12216 = vmatprep.subr.bf16.mxu1 %v14909_v29 }
 0x8dd   :  { %10725 = vmatmul.mubr.f32.vlgmr.msra.gmra.mrb[10].mxu0 %v14930_v7 }
 0x8de   :  { %10815 = vmatmul.mubr.f32.vlgmr.msra.gmra.mrb[8].mxu1 %v14930_v7  ;;  %12146 = vmatpush3.bf16.msra.mxu0 %v14903_v18 }
 0x8df   :  { %10739 = vmatprep.mubr.f32.mxu0 %v14921_v23  ;;  %12218 = vmatpush3.bf16.msra.mxu1 %v14909_v29 }
 0x8e0   :  { %10829 = vmatprep.mubr.f32.mxu1 %v14921_v23  ;;  %12148 = vmatprep.subr.bf16.mxu0 %v14911_v50 }
 0x8e1   :  { %12220 = vmatprep.subr.bf16.mxu1 %v14913_v21 }
 0x8e2   :  { %12150 = vmatpush3.bf16.msra.mxu0 %v14911_v50 }
 0x8e3   :  { %12222 = vmatpush3.bf16.msra.mxu1 %v14913_v21  ;;  %12152 = vmatprep.subr.bf16.mxu0 %v14915_v30 }
 0x8e4   :  { %12224 = vmatprep.subr.bf16.mxu1 %v14917_v6 }
 0x8e6   :  { %12154 = vmatpush3.bf16.msra.mxu0 %v14915_v30 }
 0x8e7   :  { %12226 = vmatpush3.bf16.msra.mxu1 %v14917_v6  ;;  %12156 = vmatprep.subr.bf16.mxu0 %v14815_v1  ;;  %v12263_v6 = vpack.c.bf16 %v15006_v12, %v15004_v46 }
 0x8e8   :  { %12228 = vmatprep.subr.bf16.mxu1 %v14817_v17 }
 0x8e9   :  { %10740 = vmatmul.mubr.f32.vlgmr.msra.gmra.mrb[10].mxu0 %v14919_v43 }
 0x8ea   :  { %10830 = vmatmul.mubr.f32.vlgmr.msra.gmra.mrb[8].mxu1 %v14919_v43  ;;  %12158 = vmatpush3.bf16.msra.mxu0 %v14815_v1  ;;  %v10048_v1 = vld [vmem:[%s15594_s5 + $0x88] sm:$0xf] }
 0x8eb   :  { %10754 = vmatprep.mubr.f32.mxu0 %v14921_v23  ;;  %12230 = vmatpush3.bf16.msra.mxu1 %v14817_v17  ;;  %v5059_v17 = vsel %vm273_vm7, %v10048_v1, 0  ;;  %vm5617_vm7 = vcmask 113664  }
 0x8ec   :  { %10844 = vmatprep.mubr.f32.mxu1 %v14921_v23  ;;  %12160 = vmatprep.subr.bf16.mxu0 %v14835_v54  ;;  %v5077_v11 = vand.u32 4294901760, %v5059_v17 }
 0x8ed   :  { %12232 = vmatprep.subr.bf16.mxu1 %v14849_v5 }
 0x8ee   :  { %12162 = vmatpush3.bf16.msra.mxu0 %v14835_v54  ;;  %v5074_v54 = vand.u32 4294901760, %v10047_v15 }
 0x8ef   :  { %12234 = vmatpush3.bf16.msra.mxu1 %v14849_v5  ;;  %12164 = vmatprep.subr.bf16.mxu0 %v14869_v47  ;;  %v5156_v5 = vsub.f32 %v15004_v46, %v5155_v8 }
 0x8f0   :  { %12236 = vmatprep.subr.bf16.mxu1 %v14871_v52  ;;  %v5182_v48 = vsub.f32 %v10047_v15, %v5074_v54  ;;  %v15048_v25 = vpack.c.bf16 %v5077_v11, %v5074_v54 }
 0x8f1   :  { %v5157_v62 = vand.u32 4294901760, %v5156_v5 }
 0x8f2   :  { %12166 = vmatpush3.bf16.msra.mxu0 %v14869_v47  ;;  %v5189_v47 = vsub.f32 %v5059_v17, %v5077_v11  ;;  %v5183_v37 = vand.u32 4294901760, %v5182_v48 }
 0x8f3   :  { %12238 = vmatpush3.bf16.msra.mxu1 %v14871_v52  ;;  %12240 = vmatprep.subr.bf16.mxu0 %v15025_v42  ;;  %v5170_v52 = vsub.f32 %v15027_v19, %v5169_v26  ;;  %v12251_v14 = vpack.c.bf16 %v5164_v59, %v5157_v62 }
 0x8f4   :  { %v5190_v35 = vand.u32 4294901760, %v5189_v47  ;;  %v5184_v27 = vsub.f32 %v5182_v48, %v5183_v37  ;;  %v12271_v16 = vpack.c.bf16 %v5189_v47, %v5182_v48 }
 0x8f5   :  { %10755 = vmatmul.mubr.f32.vlgmr.msra.gmra.mrb[10].mxu0 %v14919_v43  ;;  %v5171_v0 = vand.u32 4294901760, %v5170_v52 }
 0x8f6   :  { %10845 = vmatmul.mubr.f32.vlgmr.msra.gmra.mrb[8].mxu1 %v14919_v43  ;;  %12242 = vmatpush3.bf16.msra.mxu0 %v15025_v42  ;;  %v5191_v18 = vsub.f32 %v5189_v47, %v5190_v35  ;;  %v5185_v50 = vand.u32 4294901760, %v5184_v27  ;;  %v12295_v45 = vpack.c.bf16 %v5190_v35, %v5183_v37 }
 0x8f7   :  { %10859 = vmatprep.mubr.f32.mxu0 %v14939_v2  ;;  %12244 = vmatprep.subr.bf16.mxu0 %v15033_v9  ;;  %v12255_v29 = vpack.c.bf16 %v5178_v44, %v5171_v0 }
 0x8f8   :  { %v5192_v21 = vand.u32 4294901760, %v5191_v18 }
 0x8fa   :  { %12246 = vmatpush3.bf16.msra.mxu0 %v15033_v9  ;;  %v12259_v30 = vpack.c.bf16 %v5192_v21, %v5185_v50 }
 0x8fb   :  { %12248 = vmatprep.subr.bf16.mxu0 %v15048_v25 }
 0x8fe   :  { %12250 = vmatpush3.bf16.msra.mxu0 %v15048_v25 }
 0x8ff   :  { %12252 = vmatprep.subr.bf16.mxu0 %v12251_v14 }
 0x901   :  { %10860 = vmatmul.mubr.f32.vlgmr.msra.gmra.mrb[12].mxu0 %v14941_v51 }
 0x902   :  { %12254 = vmatpush3.bf16.msra.mxu0 %v12251_v14  ;;  %10874 = vmatprep.mubr.f32.mxu0 %v14921_v23  ;;  %v5692_v14 = vld [vmem:[%s15595_s6] sm:$0xff] }
 0x903   :  { %12256 = vmatprep.subr.bf16.mxu0 %v12255_v29  ;;  %v5707_v44 = vsel %vm3302_vm15, %v5692_v14, 0 }
 0x904   :  { %v15098_v18 = vand.u32 4294901760, %v5707_v44 }
 0x906   :  { %12258 = vmatpush3.bf16.msra.mxu0 %v12255_v29  ;;  %10980 = vmatprep.mubr.f32.mxu1 %v15098_v18 }
 0x907   :  { %12260 = vmatprep.subr.bf16.mxu0 %v12259_v30 }
 0x90a   :  { %12262 = vmatpush3.bf16.msra.mxu0 %v12259_v30  ;;  %v15105_v30 = vsub.f32 %v5707_v44, %v15098_v18 }
 0x90b   :  { %12264 = vmatprep.subr.bf16.mxu0 %v12263_v6 }
 0x90d   :  { %10875 = vmatmul.mubr.f32.vlgmr.msra.gmra.mrb[12].mxu0 %v14919_v43 }
 0x90e   :  { %12266 = vmatpush3.bf16.msra.mxu0 %v12263_v6  ;;  %10889 = vmatprep.mubr.f32.mxu0 %v14927_v22 }
 0x90f   :  { %12268 = vmatprep.subr.bf16.mxu0 %v12267_v3 }
 0x912   :  { %12270 = vmatpush3.bf16.msra.mxu0 %v12267_v3 }
 0x913   :  { %12272 = vmatprep.subr.bf16.mxu0 %v12271_v16 }
 0x916   :  { %12274 = vmatpush3.bf16.msra.mxu0 %v12271_v16 }
 0x917   :  { %12276 = vmatprep.subr.bf16.mxu0 %v15025_v42 }
 0x919   :  { %10890 = vmatmul.mubr.f32.vlgmr.msra.gmra.mrb[12].mxu0 %v14924_v31 }
 0x91a   :  { %12278 = vmatpush3.bf16.msra.mxu0 %v15025_v42  ;;  %10904 = vmatprep.mubr.f32.mxu0 %v14933_v56 }
 0x91b   :  { %12280 = vmatprep.subr.bf16.mxu0 %v15033_v9 }
 0x91e   :  { %12282 = vmatpush3.bf16.msra.mxu0 %v15033_v9 }
 0x91f   :  { %12284 = vmatprep.subr.bf16.mxu0 %v15048_v25 }
 0x922   :  { %12286 = vmatpush3.bf16.msra.mxu0 %v15048_v25 }
 0x923   :  { %12288 = vmatprep.subr.bf16.mxu0 %v12287_v4 }
 0x925   :  { %10905 = vmatmul.mubr.f32.vlgmr.msra.gmra.mrb[12].mxu0 %v14930_v7 }
 0x926   :  { %12290 = vmatpush3.bf16.msra.mxu0 %v12287_v4  ;;  %10919 = vmatprep.mubr.f32.mxu0 %v14921_v23  ;;  %v5789_v4 = vand.u32 4294901760, %v15105_v30 }
 0x927   :  { %12292 = vmatprep.subr.bf16.mxu0 %v12291_v33 }
 0x92a   :  { %12294 = vmatpush3.bf16.msra.mxu0 %v12291_v33 }
 0x92b   :  { %12296 = vmatprep.subr.bf16.mxu0 %v12295_v45 }
 0x92e   :  { %12298 = vmatpush3.bf16.msra.mxu0 %v12295_v45 }
 0x92f   :  { %12300 = vmatprep.subr.bf16.mxu0 %v15025_v42 }
 0x931   :  { %10920 = vmatmul.mubr.f32.vlgmr.msra.gmra.mrb[12].mxu0 %v14919_v43 }
 0x932   :  { %12302 = vmatpush3.bf16.msra.mxu0 %v15025_v42  ;;  %10934 = vmatprep.mubr.f32.mxu0 %v14921_v23 }
 0x933   :  { %12304 = vmatprep.subr.bf16.mxu0 %v15033_v9 }
 0x936   :  { %12306 = vmatpush3.bf16.msra.mxu0 %v15033_v9 }
 0x937   :  { %12308 = vmatprep.subr.bf16.mxu0 %v15048_v25 }
 0x93a   :  { %12310 = vmatpush3.bf16.msra.mxu0 %v15048_v25 }
 0x93d   :  { %10935 = vmatmul.mubr.f32.vlgmr.msra.gmra.mrb[12].mxu0 %v14919_v43 }
 0x9c8   :  { %v10756_v13 = vpop.f32.mrb[10].mxu0 }
 0x9c9   :  { %v10846_v41 = vpop.f32.mrb[8].mxu1  ;;  %v4475_v40 = vpop.f32.mrb[11].mxu0 }
 0x9ca   :  { %v5050_v31 = vmax.f32 %v10756_v13, %v10846_v41  ;;  %v5039_v22 = vpop.f32.mrb[9].mxu1  ;;  %v5790_v41 = vsub.f32 %v15105_v30, %v5789_v4 }
 0x9cb   :  { %v5049_v7 = vmax.f32 %v4475_v40, %v5039_v22  ;;  %v5694_v40 = vld [vmem:[%s15596_s7] sm:$0xff] }
 0x9cc   :  { %v5791_v22 = vand.u32 4294901760, %v5790_v41 }
 0x9ce   :  { %10957 = vmatprep.mubr.f32.mxu0 %v5791_v22 }
 0xa10   :  { %v10936_v56 = vpop.f32.mrb[12].mxu0 }
 0xa11   :  { %v5616_v38 = vmax.f32 %v5050_v31, %v10936_v56  ;;  %v5605_v23 = vpop.f32.mrb[13].mxu0  ;;  %v5695_v56 = vld [vmem:[%s15596_s7 + $0x8] sm:$0xff] }
 0xa12   :  { %v5615_v36 = vmax.f32 %v5049_v7, %v5605_v23 }
 0xa13   :  { %v5621_v2 = vsel %vm5617_vm7, %v5616_v38, 0.0 }
 0xa14   :  { %5622 = vadd.xlane.f32.xlu0 %v5621_v2  ;;  %v5618_v51 = vsel %vm5617_vm7, %v5615_v36, 0.0 }
 0xa15   :  { %5619 = vadd.xlane.f32.xlu1 %v5618_v51 }
 0xaa1   :  { %v5623_v53 = vpop.xlane.xlu0 %5622 }
 0xaa2   :  { %v5626_v60 = vmul.f32 0.071428575, %v5623_v53  ;;  %v5620_v43 = vpop.xlane.xlu1 %5619 }
 0xaa3   :  { %v5625_v49 = vmul.f32 0.071428575, %v5620_v43 }
 0xaa4   :  { %v5628_v58 = vsub.f32 %v5616_v38, %v5626_v60  ;;  %v5693_v38 = vld [vmem:[%s15595_s6 + $0x8] sm:$0xff] }
 0xaa5   :  { %v5627_v20 = vsub.f32 %v5615_v36, %v5625_v49  ;;  %v5710_v2 = vsel %vm3302_vm15, %v5693_v38, 0 }
 0xaa6   :  { %v5630_v24 = vmul.f32 %v5628_v58, %v5628_v58  ;;  %v15134_v43 = vand.u32 4294901760, %v5710_v2 }
 0xaa7   :  { %v5629_v46 = vmul.f32 %v5627_v20, %v5627_v20 }
 0xaa8   :  { %v5634_v12 = vsel %vm5617_vm7, %v5630_v24, 0.0 }
 0xaa9   :  { %5635 = vadd.xlane.f32.xlu0 %v5634_v12  ;;  %v5631_v1 = vsel %vm5617_vm7, %v5629_v46, 0.0  ;;  %vm12950_vm7 = vmmov 0  }
 0xaaa   :  { %5632 = vadd.xlane.f32.xlu1 %v5631_v1 }
 0xb36   :  { %v5636_v57 = vpop.xlane.xlu0 %5635 }
 0xb37   :  { %v5639_v32 = vmul.f32 0.07692308, %v5636_v57  ;;  %v5633_v15 = vpop.xlane.xlu1 %5632  ;;  %v15142_v57 = vsub.f32 %v5710_v2, %v15134_v43 }
 0xb38   :  { %v5638_v17 = vmul.f32 0.07692308, %v5633_v15 }
 0xb39   :  { %12881 = vrsqrt.f32 %v5639_v32  ;;  %vm5649_vm5 = vcmp.eq.f32.partialorder %v5639_v32, inf  ;;  %v5652_v19 = vand.u32 2147483648, %v5639_v32  ;;  %vm5651_vm6 = vcmp.eq.f32.partialorder %v5639_v32, 0.0 }
 0xb3a   :  { %12883 = vrsqrt.f32 %v5638_v17  ;;  %vm5642_vm9 = vcmp.eq.f32.partialorder %v5638_v17, inf  ;;  %v5645_v11 = vand.u32 2147483648, %v5638_v17  ;;  %vm5644_vm1 = vcmp.eq.f32.partialorder %v5638_v17, 0.0 }
 0xb43   :  { %v12882_v8 = vpop.eup %12881 }
 0xb44   :  { %v12884_v63 = vpop.eup %12883  ;;  %v5648_v42 = vmul.f32 %v12882_v8, %v5639_v32 }
 0xb45   :  { %v5641_v39 = vmul.f32 %v12884_v63, %v5638_v17 }
 0xb46   :  { %v5650_v54 = vsel %vm5649_vm5, %v5639_v32, %v5648_v42 }
 0xb47   :  { %v5653_v9 = vsel %vm5651_vm6, %v5652_v19, %v5650_v54  ;;  %v5643_v5 = vsel %vm5642_vm9, %v5638_v17, %v5641_v39  ;;  %vm8450_vm9 = vcmask 261120  }
 0xb48   :  { %v5655_v55 = vadd.f32 1e-06, %v5653_v9  ;;  %v5646_v26 = vsel %vm5644_vm1, %v5645_v11, %v5643_v5  ;;  %v5799_v5 = vand.u32 4294901760, %v15142_v57 }
 0xb49   :  { %v5654_v28 = vadd.f32 1e-06, %v5646_v26 }
 0xb4a   :  { %12885 = vrcp.f32 %v5655_v55  ;;  %v5800_v14 = vsub.f32 %v15142_v57, %v5799_v5 }
 0xb4b   :  { %12887 = vrcp.f32 %v5654_v28 }
 0xb54   :  { %v12886_v48 = vpop.eup %12885 }
 0xb55   :  { %v12888_v47 = vpop.eup %12887  ;;  %v5659_v25 = vmul.f32 %v12886_v48, %v5628_v58 }
 0xb56   :  { %v5657_v62 = vmul.f32 %v12888_v47, %v5627_v20 }
 0xb57   :  { %vm5661_vm8 = vcmp.ge.f32.partialorder %v5659_v25, 0.0  ;;  %v5663_v59 = vmul.f32 0.01, %v5659_v25 }
 0xb58   :  { %vm5660_vm10 = vcmp.ge.f32.partialorder %v5657_v62, 0.0  ;;  %v5662_v52 = vmul.f32 0.01, %v5657_v62 }
 0xb59   :  { %v5665_v10 = vsel %vm5661_vm8, %v5659_v25, %v5663_v59 }
 0xb5a   :  { %5670 = vrot.lane.b32.xlu0 %v5665_v10, %s12935_s22  ;;  %v5716_v37 = vand.u32 4294901760, %v5665_v10  ;;  %5676 = vrot.lane.b32.xlu1 %v5665_v10, %s12929_s30  ;;  %v5664_v35 = vsel %vm5660_vm10, %v5657_v62, %v5662_v52 }
 0xb5b   :  { %v5713_v0 = vand.u32 4294901760, %v5664_v35 }
 0xb5c   :  { %v5816_v27 = vsub.f32 %v5665_v10, %v5716_v37 }
 0xb5d   :  { %v15100_v29 = vpack.c.bf16 %v5716_v37, %v5713_v0  ;;  %v5809_v50 = vsub.f32 %v5664_v35, %v5713_v0 }
 0xb5e   :  { %5680 = vrot.lane.b32.xlu0 %v5664_v35, %s12937_s23  ;;  %5668 = vrot.lane.b32.xlu1 %v5664_v35, %s12935_s22  ;;  %v5817_v21 = vand.u32 4294901760, %v5816_v27 }
 0xb5f   :  { %12312 = vmatprep.subr.bf16.mxu0 %v15100_v29  ;;  %v5810_v6 = vand.u32 4294901760, %v5809_v50  ;;  %v15108_v3 = vpack.c.bf16 %v5816_v27, %v5809_v50 }
 0xb60   :  { %12314 = vmatpush3.bf16.msra.mxu0 %v15100_v29  ;;  %v5818_v16 = vsub.f32 %v5816_v27, %v5817_v21 }
 0xb61   :  { %v5811_v33 = vsub.f32 %v5809_v50, %v5810_v6  ;;  %v15113_v45 = vpack.c.bf16 %v5817_v21, %v5810_v6 }
 0xb62   :  { %5686 = vrot.lane.b32.xlu0 %v5664_v35, %s15919_s24  ;;  %5674 = vrot.lane.b32.xlu1 %v5664_v35, %s12929_s30  ;;  %v5819_v13 = vand.u32 4294901760, %v5818_v16 }
 0xb63   :  { %v5812_v31 = vand.u32 4294901760, %v5811_v33 }
 0xb65   :  { %v12331_v7 = vpack.c.bf16 %v5819_v13, %v5812_v31 }
 0xb66   :  { %5698 = vperm.xlu0 %12863, %v5694_v40   ;;  %5682 = vrot.lane.b32.xlu1 %v5665_v10, %s12937_s23 }
 0xb67   :  { %12332 = vmatprep.subr.bf16.mxu1 %v12331_v7 }
 0xb68   :  { %12334 = vmatpush3.bf16.msra.mxu1 %v12331_v7  ;;  %v5801_v7 = vand.u32 4294901760, %v5800_v14 }
 0xb6a   :  { %5688 = vrot.lane.b32.xlu1 %v5665_v10, %s15919_s24 }
 0xb6e   :  { %5703 = vperm.xlu1 %12862, %v5695_v56  }
 0xbcc   :  { %v5671_v23 = vpop.permute.xlu0 %5670  ;;  %v5677_v36 = vpop.permute.xlu1 %5676 }
 0xbcd   :  { %v5722_v51 = vand.u32 4294901760, %v5671_v23  ;;  %v5728_v53 = vand.u32 4294901760, %v5677_v36 }
 0xbcf   :  { %v15132_v60 = vsub.f32 %v5671_v23, %v5722_v51  ;;  %v15136_v49 = vsub.f32 %v5677_v36, %v5728_v53 }
 0xbd0   :  { %v5681_v58 = vpop.permute.xlu0 %5680  ;;  %v5669_v20 = vpop.permute.xlu1 %5668 }
 0xbd1   :  { %v5731_v24 = vand.u32 4294901760, %v5681_v58  ;;  %v5719_v46 = vand.u32 4294901760, %v5669_v20  ;;  %v5831_v12 = vand.u32 4294901760, %v15132_v60  ;;  %v5845_v32 = vand.u32 4294901760, %v15136_v49 }
 0xbd3   :  { %v15139_v1 = vpack.c.bf16 %v5722_v51, %v5719_v46  ;;  %v15145_v15 = vsub.f32 %v5681_v58, %v5731_v24  ;;  %v15147_v17 = vsub.f32 %v5669_v20, %v5719_v46  ;;  %v5832_v39 = vsub.f32 %v15132_v60, %v5831_v12 }
 0xbd4   :  { %v5687_v8 = vpop.permute.xlu0 %5686  ;;  %v5675_v63 = vpop.permute.xlu1 %5674  ;;  %v5846_v55 = vsub.f32 %v15136_v49, %v5845_v32 }
 0xbd5   :  { %v5737_v42 = vand.u32 4294901760, %v5687_v8  ;;  %v5725_v19 = vand.u32 4294901760, %v5675_v63  ;;  %12316 = vmatprep.subr.bf16.mxu0 %v15139_v1  ;;  %v5824_v54 = vand.u32 4294901760, %v15147_v17  ;;  %v5852_v26 = vand.u32 4294901760, %v15145_v15 }
 0xbd6   :  { %12318 = vmatpush3.bf16.msra.mxu0 %v15139_v1  ;;  %v5833_v52 = vand.u32 4294901760, %v5832_v39  ;;  %v5847_v50 = vand.u32 4294901760, %v5846_v55 }
 0xbd7   :  { %v15155_v11 = vpack.c.bf16 %v5728_v53, %v5725_v19  ;;  %v5837_v9 = vsub.f32 %v5675_v63, %v5725_v19  ;;  %v5825_v28 = vsub.f32 %v15147_v17, %v5824_v54  ;;  %v5865_v47 = vsub.f32 %v5687_v8, %v5737_v42 }
 0xbd8   :  { %v5683_v48 = vpop.permute.xlu1 %5682  ;;  %v5853_v0 = vsub.f32 %v15145_v15, %v5852_v26 }
 0xbd9   :  { %v5838_v25 = vand.u32 4294901760, %v5837_v9  ;;  %v5734_v62 = vand.u32 4294901760, %v5683_v48  ;;  %12320 = vmatprep.subr.bf16.mxu0 %v15155_v11  ;;  %v5826_v59 = vand.u32 4294901760, %v5825_v28  ;;  %v5866_v6 = vand.u32 4294901760, %v5865_v47 }
 0xbda   :  { %12322 = vmatpush3.bf16.msra.mxu0 %v15155_v11  ;;  %v5854_v36 = vand.u32 4294901760, %v5853_v0  ;;  %v12359_v8 = vpack.c.bf16 %v15136_v49, %v5837_v9 }
 0xbdb   :  { %v5839_v10 = vsub.f32 %v5837_v9, %v5838_v25  ;;  %v15165_v37 = vpack.c.bf16 %v5734_v62, %v5731_v24  ;;  %v5858_v35 = vsub.f32 %v5683_v48, %v5734_v62  ;;  %v12335_v27 = vpack.c.bf16 %v5833_v52, %v5826_v59 }
 0xbdc   :  { %v5689_v44 = vpop.permute.xlu1 %5688  ;;  %v15171_v21 = vpack.c.bf16 %v5845_v32, %v5838_v25  ;;  %v5867_v38 = vsub.f32 %v5865_v47, %v5866_v6  ;;  %v12355_v32 = vpack.c.bf16 %v15132_v60, %v15147_v17 }
 0xbdd   :  { %v5859_v16 = vand.u32 4294901760, %v5858_v35  ;;  %v5740_v33 = vand.u32 4294901760, %v5689_v44  ;;  %12324 = vmatprep.subr.bf16.mxu0 %v15165_v37  ;;  %v5840_v13 = vand.u32 4294901760, %v5839_v10  ;;  %12336 = vmatprep.subr.bf16.mxu1 %v12335_v27  ;;  %v12363_v63 = vpack.c.bf16 %v5858_v35, %v15145_v15 }
 0xbde   :  { %12326 = vmatpush3.bf16.msra.mxu0 %v15165_v37  ;;  %12338 = vmatpush3.bf16.msra.mxu1 %v12335_v27  ;;  %v5868_v20 = vand.u32 4294901760, %v5867_v38 }
 0xbdf   :  { %v5860_v41 = vsub.f32 %v5858_v35, %v5859_v16  ;;  %v15175_v40 = vpack.c.bf16 %v5740_v33, %v5737_v42  ;;  %v5872_v31 = vsub.f32 %v5689_v44, %v5740_v33  ;;  %v12339_v22 = vpack.c.bf16 %v5847_v50, %v5840_v13  ;;  %v10050_v33 = vld [vmem:[%s15597_s8 + $0x18] sm:$0x3]  ;;  %v10049_v13 = vld [vmem:[%s15597_s8 + $0x10] sm:$0xff] }
 0xbe0   :  { %v12403_v56 = vpack.c.bf16 %v5859_v16, %v5852_v26 }
 0xbe1   :  { %v5873_v23 = vand.u32 4294901760, %v5872_v31  ;;  %12328 = vmatprep.subr.bf16.mxu0 %v15175_v40  ;;  %12340 = vmatprep.subr.bf16.mxu1 %v12339_v22  ;;  %v5861_v2 = vand.u32 4294901760, %v5860_v41  ;;  %v12367_v42 = vpack.c.bf16 %v5872_v31, %v5865_v47  ;;  %v6836_v41 = vsel %vm72_vm0, %v10050_v33, 0 }
 0xbe2   :  { %12330 = vmatpush3.bf16.msra.mxu0 %v15175_v40  ;;  %12342 = vmatpush3.bf16.msra.mxu1 %v12339_v22 }
 0xbe3   :  { %v5874_v51 = vsub.f32 %v5872_v31, %v5873_v23  ;;  %v12343_v53 = vpack.c.bf16 %v5861_v2, %v5854_v36  ;;  %v12407_v58 = vpack.c.bf16 %v5873_v23, %v5866_v6  ;;  %v6842_v31 = vand.u32 4294901760, %v6836_v41 }
 0xbe5   :  { %10958 = vmatmul.mubr.f32.vlgmr.msra.gmra.mrb[14].mxu0 %v5801_v7  ;;  %12344 = vmatprep.subr.bf16.mxu1 %v12343_v53  ;;  %v5875_v24 = vand.u32 4294901760, %v5874_v51  ;;  %v5699_v26 = vpop.permute.xlu0 %5698  ;;  %v6934_v7 = vsub.f32 %v6836_v41, %v6842_v31 }
 0xbe6   :  { %12346 = vmatpush3.bf16.msra.mxu1 %v12343_v53 }
 0xbe7   :  { %v12347_v46 = vpack.c.bf16 %v5875_v24, %v5868_v20  ;;  %v6935_v38 = vand.u32 4294901760, %v6934_v7  ;;  %v10052_v24 = vld [vmem:[%s15597_s8 + $0x28] sm:$0x3] }
 0xbe9   :  { %12348 = vmatprep.subr.bf16.mxu1 %v12347_v46  ;;  %v6936_v2 = vsub.f32 %v6934_v7, %v6935_v38 }
 0xbea   :  { %12350 = vmatpush3.bf16.msra.mxu1 %v12347_v46 }
 0xbeb   :  { %12352 = vmatprep.subr.bf16.mxu1 %v15108_v3  ;;  %v6937_v53 = vand.u32 4294901760, %v6936_v2 }
 0xbed   :  { %10981 = vmatmul.mubr.f32.vlgmr.msra.gmra.mrb[10].mxu1 %v15134_v43  ;;  %v5704_v55 = vpop.permute.xlu1 %5703 }
 0xbee   :  { %12354 = vmatpush3.bf16.msra.mxu1 %v15108_v3  ;;  %11003 = vmatprep.mubr.f32.mxu1 %v15105_v30  ;;  %v12395_v30 = vpack.c.bf16 %v5831_v12, %v5824_v54 }
 0xbef   :  { %12356 = vmatprep.subr.bf16.mxu1 %v12355_v32 }
 0xbf2   :  { %12358 = vmatpush3.bf16.msra.mxu1 %v12355_v32  ;;  %v10051_v32 = vld [vmem:[%s15597_s8 + $0x20] sm:$0xff] }
 0xbf3   :  { %12360 = vmatprep.subr.bf16.mxu1 %v12359_v8 }
 0xbf6   :  { %12362 = vmatpush3.bf16.msra.mxu1 %v12359_v8  ;;  %v7346_v8 = vsel %vm72_vm0, %v10052_v24, 0 }
 0xbf7   :  { %12364 = vmatprep.subr.bf16.mxu1 %v12363_v63 }
 0xbfa   :  { %12366 = vmatpush3.bf16.msra.mxu1 %v12363_v63  ;;  %v7349_v63 = vand.u32 4294901760, %v10051_v32 }
 0xbfb   :  { %12368 = vmatprep.subr.bf16.mxu1 %v12367_v42 }
 0xbfe   :  { %12370 = vmatpush3.bf16.msra.mxu1 %v12367_v42  ;;  %v7352_v42 = vand.u32 4294901760, %v7346_v8 }
 0xbff   :  { %12372 = vmatprep.subr.bf16.mxu1 %v15100_v29 }
 0xc01   :  { %11004 = vmatmul.mubr.f32.vlgmr.msra.gmra.mrb[10].mxu1 %v15142_v57 }
 0xc02   :  { %12374 = vmatpush3.bf16.msra.mxu1 %v15100_v29  ;;  %11026 = vmatprep.mubr.f32.mxu1 %v5789_v4 }
 0xc03   :  { %12376 = vmatprep.subr.bf16.mxu1 %v15139_v1 }
 0xc06   :  { %12378 = vmatpush3.bf16.msra.mxu1 %v15139_v1 }
 0xc07   :  { %12380 = vmatprep.subr.bf16.mxu1 %v15155_v11 }
 0xc0a   :  { %12382 = vmatpush3.bf16.msra.mxu1 %v15155_v11 }
 0xc0b   :  { %12384 = vmatprep.subr.bf16.mxu1 %v15165_v37 }
 0xc0e   :  { %12386 = vmatpush3.bf16.msra.mxu1 %v15165_v37 }
 0xc0f   :  { %12388 = vmatprep.subr.bf16.mxu1 %v15175_v40 }
 0xc12   :  { %12390 = vmatpush3.bf16.msra.mxu1 %v15175_v40 }
 0xc13   :  { %12392 = vmatprep.subr.bf16.mxu1 %v15113_v45 }
 0xc15   :  { %11027 = vmatmul.mubr.f32.vlgmr.msra.gmra.mrb[10].mxu1 %v5799_v5 }
 0xc16   :  { %12394 = vmatpush3.bf16.msra.mxu1 %v15113_v45  ;;  %11049 = vmatprep.mubr.f32.mxu1 %v15098_v18 }
 0xc17   :  { %12396 = vmatprep.subr.bf16.mxu1 %v12395_v30 }
 0xc1a   :  { %12398 = vmatpush3.bf16.msra.mxu1 %v12395_v30  ;;  %v7437_v30 = vsub.f32 %v10051_v32, %v7349_v63  ;;  %v12949_v32 = vmov 2  }
 0xc1b   :  { %12400 = vmatprep.subr.bf16.mxu1 %v15171_v21 }
 0xc1e   :  { %12402 = vmatpush3.bf16.msra.mxu1 %v15171_v21 }
 0xc1f   :  { %12404 = vmatprep.subr.bf16.mxu1 %v12403_v56 }
 0xc22   :  { %12406 = vmatpush3.bf16.msra.mxu1 %v12403_v56 }
 0xc23   :  { %12408 = vmatprep.subr.bf16.mxu1 %v12407_v58 }
 0xc26   :  { %12410 = vmatpush3.bf16.msra.mxu1 %v12407_v58 }
 0xc27   :  { %12412 = vmatprep.subr.bf16.mxu1 %v15100_v29 }
 0xc29   :  { %11050 = vmatmul.mubr.f32.vlgmr.msra.gmra.mrb[10].mxu1 %v15134_v43 }
 0xc2a   :  { %12414 = vmatpush3.bf16.msra.mxu1 %v15100_v29  ;;  %11072 = vmatprep.mubr.f32.mxu1 %v15098_v18  ;;  %v6318_v18 = vld [vmem:[%s15597_s8] sm:$0xff]  ;;  %v6319_v29 = vld [vmem:[%s15597_s8 + $0x8] sm:$0x3] }
 0xc2b   :  { %12416 = vmatprep.subr.bf16.mxu1 %v15139_v1  ;;  %v6328_v3 = vsel %vm72_vm0, %v6319_v29, 0  ;;  %v6331_v4 = vand.u32 4294901760, %v6318_v18  ;;  %v7438_v29 = vand.u32 4294901760, %v7437_v30  ;;  %vm7852_vm0 = vcmask 23552  }
 0xc2c   :  { %v6334_v45 = vand.u32 4294901760, %v6328_v3 }
 0xc2d   :  { %v6419_v49 = vsub.f32 %v6318_v18, %v6331_v4  ;;  %v7444_v18 = vsub.f32 %v7346_v8, %v7352_v42 }
 0xc2e   :  { %12418 = vmatpush3.bf16.msra.mxu1 %v15139_v1  ;;  %v15232_v60 = vpack.c.bf16 %v6334_v45, %v6331_v4  ;;  %v6426_v12 = vsub.f32 %v6328_v3, %v6334_v45  ;;  %v12479_v4 = vpack.c.bf16 %v7352_v42, %v7349_v63  ;;  %v7439_v45 = vsub.f32 %v7437_v30, %v7438_v29 }
 0xc2f   :  { %12420 = vmatprep.subr.bf16.mxu1 %v15155_v11  ;;  %v6420_v1 = vand.u32 4294901760, %v6419_v49  ;;  %v7445_v3 = vand.u32 4294901760, %v7444_v18  ;;  %v15920_v63 = vmov 0.0  }
 0xc30   :  { %12432 = vmatprep.subr.bf16.mxu0 %v15232_v60  ;;  %v12439_v54 = vpack.c.bf16 %v6426_v12, %v6419_v49 }
 0xc31   :  { %12434 = vmatpush3.bf16.msra.mxu0 %v15232_v60  ;;  %v6421_v57 = vsub.f32 %v6419_v49, %v6420_v1  ;;  %v7440_v49 = vand.u32 4294901760, %v7439_v45  ;;  %v10053_v45 = vld [vmem:[%s15599_s10 + $0x10] sm:$0xff] }
 0xc32   :  { %12422 = vmatpush3.bf16.msra.mxu1 %v15155_v11 }
 0xc33   :  { %12424 = vmatprep.subr.bf16.mxu1 %v15165_v37  ;;  %v6422_v17 = vand.u32 4294901760, %v6421_v57  ;;  %v12495_v57 = vpack.c.bf16 %v7445_v3, %v7438_v29 }
 0xc36   :  { %12426 = vmatpush3.bf16.msra.mxu1 %v15165_v37 }
 0xc37   :  { %12428 = vmatprep.subr.bf16.mxu1 %v15175_v40 }
 0xc3a   :  { %12430 = vmatpush3.bf16.msra.mxu1 %v15175_v40  ;;  %v6839_v40 = vand.u32 4294901760, %v10049_v13 }
 0xc3b   :  { %12521 = vmatprep.subr.bf16.mxu1 %v15775_v61 }
 0xc3c   :  { %v6927_v22 = vsub.f32 %v10049_v13, %v6839_v40  ;;  %v12455_v23 = vpack.c.bf16 %v6842_v31, %v6839_v40 }
 0xc3d   :  { %11073 = vmatmul.mubr.f32.vlgmr.msra.gmra.mrb[10].mxu1 %v15134_v43  ;;  %v6427_v43 = vand.u32 4294901760, %v6426_v12 }
 0xc3e   :  { %v6928_v56 = vand.u32 4294901760, %v6927_v22  ;;  %v12463_v20 = vpack.c.bf16 %v6934_v7, %v6927_v22  ;;  %11251 = vmatprep.mubr.msk.f32.mxu1 %vm12950_vm7, %v15920_v63 }
 0xc3f   :  { %v6428_v15 = vsub.f32 %v6426_v12, %v6427_v43  ;;  %v12447_v5 = vpack.c.bf16 %v6427_v43, %v6420_v1  ;;  %v12487_v43 = vpack.c.bf16 %v7444_v18, %v7437_v30 }
 0xc40   :  { %v6929_v36 = vsub.f32 %v6927_v22, %v6928_v56  ;;  %v12471_v46 = vpack.c.bf16 %v6935_v38, %v6928_v56 }
 0xc41   :  { %v6429_v19 = vand.u32 4294901760, %v6428_v15 }
 0xc42   :  { %v6930_v51 = vand.u32 4294901760, %v6929_v36 }
 0xc43   :  { %v12435_v39 = vpack.c.bf16 %v6429_v19, %v6422_v17 }
 0xc44   :  { %v12459_v58 = vpack.c.bf16 %v6937_v53, %v6930_v51 }
 0xc45   :  { %12436 = vmatprep.subr.bf16.mxu0 %v12435_v39 }
 0xcb8   :  { %v10959_v11 = vpop.f32.mrb[14].mxu0 }
 0xcb9   :  { %v5793_v9 = vpop.f32.mrb[15].mxu0  ;;  %v5804_v28 = vadd.f32 %v10959_v11, %v5704_v55 }
 0xcba   :  { %v5794_v48 = vadd.f32 %v5793_v9, %v5699_v26 }
 0xd10   :  { %v11074_v47 = vpop.f32.mrb[10].mxu1 }
 0xd11   :  { %v12632_v25 = vadd.f32 %v11074_v47, %v5804_v28  ;;  %v6308_v62 = vpop.f32.mrb[11].mxu1 }
 0xd12   :  { %v12634_v59 = vadd.f32 %v6308_v62, %v5794_v48 }
 0xd13   :  { %v6325_v52 = vsel %vm6320_vm11, %v12632_v25, 0 }
 0xd14   :  { %v15236_v10 = vand.u32 4294901760, %v6325_v52  ;;  %v6322_v37 = vsel %vm6320_vm11, %v12634_v59, 0 }
 0xd15   :  { %v15238_v35 = vand.u32 4294901760, %v6322_v37 }
 0xd16   :  { %v15241_v14 = vsub.f32 %v6325_v52, %v15236_v10 }
 0xd17   :  { %v15244_v0 = vsub.f32 %v6322_v37, %v15238_v35 }
 0xd18   :  { %v15247_v44 = vand.u32 4294901760, %v15241_v14 }
 0xd19   :  { %v15250_v27 = vand.u32 4294901760, %v15244_v0 }
 0xd1a   :  { %v6410_v50 = vsub.f32 %v15241_v14, %v15247_v44 }
 0xd1b   :  { %v6400_v21 = vsub.f32 %v15244_v0, %v15250_v27 }
 0xd1c   :  { %v15258_v16 = vand.u32 4294901760, %v6410_v50 }
 0xd1d   :  { %v15256_v6 = vand.u32 4294901760, %v6400_v21 }
 0xd1f   :  { %11079 = vmatprep.mubr.f32.mxu0 %v15256_v6 }
 0xd20   :  { %11080 = vmatmul.mubr.f32.vlgmr.msra.gmra.mrb[16].mxu0 %v15258_v16 }
 0xd21   :  { %11086 = vmatprep.mubr.f32.mxu0 %v15238_v35  ;;  %12438 = vmatpush3.bf16.msra.mxu0 %v12435_v39 }
 0xd22   :  { %12440 = vmatprep.subr.bf16.mxu0 %v12439_v54 }
 0xd28   :  { %11087 = vmatmul.mubr.f32.vlgmr.msra.gmra.mrb[16].mxu0 %v15236_v10 }
 0xd29   :  { %11093 = vmatprep.mubr.f32.mxu0 %v15244_v0  ;;  %12442 = vmatpush3.bf16.msra.mxu0 %v12439_v54 }
 0xd2a   :  { %12444 = vmatprep.subr.bf16.mxu0 %v15232_v60 }
 0xd30   :  { %11094 = vmatmul.mubr.f32.vlgmr.msra.gmra.mrb[16].mxu0 %v15241_v14 }
 0xd31   :  { %11100 = vmatprep.mubr.f32.mxu0 %v15250_v27  ;;  %12446 = vmatpush3.bf16.msra.mxu0 %v15232_v60 }
 0xd32   :  { %12448 = vmatprep.subr.bf16.mxu0 %v12447_v5 }
 0xd38   :  { %11101 = vmatmul.mubr.f32.vlgmr.msra.gmra.mrb[16].mxu0 %v15247_v44 }
 0xd39   :  { %11107 = vmatprep.mubr.f32.mxu0 %v15238_v35  ;;  %12450 = vmatpush3.bf16.msra.mxu0 %v12447_v5 }
 0xd3a   :  { %12452 = vmatprep.subr.bf16.mxu0 %v15232_v60 }
 0xd40   :  { %11108 = vmatmul.mubr.f32.vlgmr.msra.gmra.mrb[16].mxu0 %v15236_v10 }
 0xd41   :  { %11114 = vmatprep.mubr.f32.mxu0 %v15238_v35  ;;  %12454 = vmatpush3.bf16.msra.mxu0 %v15232_v60  ;;  %v7446_v60 = vsub.f32 %v7444_v18, %v7445_v3 }
 0xd42   :  { %12456 = vmatprep.subr.bf16.mxu0 %v12455_v23 }
 0xd43   :  { %v7447_v12 = vand.u32 4294901760, %v7446_v60  ;;  %v10054_v60 = vld [vmem:[%s15599_s10 + $0x18] sm:$0xff] }
 0xd45   :  { %v12483_v1 = vpack.c.bf16 %v7447_v12, %v7440_v49  ;;  %v7902_v49 = vld [vmem:[%s15599_s10 + $0x8] sm:$0xff]  ;;  %v10055_v12 = vld [vmem:[%s15599_s10 + $0x20] sm:$0xff] }
 0xd48   :  { %11115 = vmatmul.mubr.f32.vlgmr.msra.gmra.mrb[16].mxu0 %v15236_v10 }
 0xd49   :  { %12458 = vmatpush3.bf16.msra.mxu0 %v12455_v23  ;;  %11121 = vmatprep.mubr.f32.mxu0 %v15256_v6 }
 0xd4a   :  { %12460 = vmatprep.subr.bf16.mxu0 %v12459_v58 }
 0xd4c   :  { %11122 = vmatmul.mubr.f32.vlgmr.msra.gmra.mrb[18].mxu0 %v15258_v16 }
 0xd4d   :  { %11128 = vmatprep.mubr.f32.mxu0 %v15238_v35  ;;  %12462 = vmatpush3.bf16.msra.mxu0 %v12459_v58 }
 0xd4e   :  { %12464 = vmatprep.subr.bf16.mxu0 %v12463_v20 }
 0xd54   :  { %11129 = vmatmul.mubr.f32.vlgmr.msra.gmra.mrb[18].mxu0 %v15236_v10 }
 0xd55   :  { %11135 = vmatprep.mubr.f32.mxu0 %v15244_v0  ;;  %12466 = vmatpush3.bf16.msra.mxu0 %v12463_v20 }
 0xd56   :  { %12468 = vmatprep.subr.bf16.mxu0 %v12455_v23 }
 0xd5c   :  { %11136 = vmatmul.mubr.f32.vlgmr.msra.gmra.mrb[18].mxu0 %v15241_v14 }
 0xd5d   :  { %11142 = vmatprep.mubr.f32.mxu0 %v15250_v27  ;;  %12470 = vmatpush3.bf16.msra.mxu0 %v12455_v23 }
 0xd5e   :  { %12472 = vmatprep.subr.bf16.mxu0 %v12471_v46 }
 0xd64   :  { %11143 = vmatmul.mubr.f32.vlgmr.msra.gmra.mrb[18].mxu0 %v15247_v44 }
 0xd65   :  { %11149 = vmatprep.mubr.f32.mxu0 %v15238_v35  ;;  %12474 = vmatpush3.bf16.msra.mxu0 %v12471_v46 }
 0xd66   :  { %12476 = vmatprep.subr.bf16.mxu0 %v12455_v23 }
 0xd6c   :  { %11150 = vmatmul.mubr.f32.vlgmr.msra.gmra.mrb[18].mxu0 %v15236_v10 }
 0xd6d   :  { %11156 = vmatprep.mubr.f32.mxu0 %v15238_v35  ;;  %12478 = vmatpush3.bf16.msra.mxu0 %v12455_v23 }
 0xd6e   :  { %12480 = vmatprep.subr.bf16.mxu0 %v12479_v4 }
 0xd74   :  { %11157 = vmatmul.mubr.f32.vlgmr.msra.gmra.mrb[18].mxu0 %v15236_v10 }
 0xd75   :  { %12482 = vmatpush3.bf16.msra.mxu0 %v12479_v4  ;;  %11163 = vmatprep.mubr.f32.mxu0 %v15256_v6 }
 0xd76   :  { %12484 = vmatprep.subr.bf16.mxu0 %v12483_v1 }
 0xd78   :  { %11164 = vmatmul.mubr.f32.vlgmr.msra.gmra.mrb[20].mxu0 %v15258_v16 }
 0xd79   :  { %11170 = vmatprep.mubr.f32.mxu0 %v15238_v35  ;;  %12486 = vmatpush3.bf16.msra.mxu0 %v12483_v1 }
 0xd7a   :  { %12488 = vmatprep.subr.bf16.mxu0 %v12487_v43 }
 0xd80   :  { %11171 = vmatmul.mubr.f32.vlgmr.msra.gmra.mrb[20].mxu0 %v15236_v10 }
 0xd81   :  { %11177 = vmatprep.mubr.f32.mxu0 %v15244_v0  ;;  %12490 = vmatpush3.bf16.msra.mxu0 %v12487_v43 }
 0xd82   :  { %12492 = vmatprep.subr.bf16.mxu0 %v12479_v4 }
 0xd88   :  { %11178 = vmatmul.mubr.f32.vlgmr.msra.gmra.mrb[20].mxu0 %v15241_v14 }
 0xd89   :  { %11184 = vmatprep.mubr.f32.mxu0 %v15250_v27  ;;  %12494 = vmatpush3.bf16.msra.mxu0 %v12479_v4 }
 0xd8a   :  { %12496 = vmatprep.subr.bf16.mxu0 %v12495_v57 }
 0xd90   :  { %11185 = vmatmul.mubr.f32.vlgmr.msra.gmra.mrb[20].mxu0 %v15247_v44  ;;  %v12948_v44 = vmov 1  }
 0xd91   :  { %11191 = vmatprep.mubr.f32.mxu0 %v15238_v35  ;;  %12498 = vmatpush3.bf16.msra.mxu0 %v12495_v57 }
 0xd92   :  { %12500 = vmatprep.subr.bf16.mxu0 %v12479_v4  ;;  %12864 = vset.pattern.permute.xlu1 %v12948_v44 }
 0xd98   :  { %11192 = vmatmul.mubr.f32.vlgmr.msra.gmra.mrb[20].mxu0 %v15236_v10 }
 0xd99   :  { %11198 = vmatprep.mubr.f32.mxu0 %v15238_v35  ;;  %12502 = vmatpush3.bf16.msra.mxu0 %v12479_v4  ;;  %v7901_v4 = vld [vmem:[%s15599_s10] sm:$0xff] }
 0xd9a   :  { %12503 = vmatprep.subr.bf16.mxu0 %v15775_v61 }
 0xda0   :  { %11199 = vmatmul.mubr.f32.vlgmr.msra.gmra.mrb[20].mxu0 %v15236_v10 }
 0xda1   :  { %11205 = vmatprep.mubr.msk.f32.mxu0 %vm12950_vm7, %v15920_v63 }
 0xe1b   :  { %v11116_v15 = vpop.f32.mrb[16].mxu0 }
 0xe1c   :  { %v6822_v17 = vpop.f32.mrb[17].mxu0 }
 0xe47   :  { %v11158_v19 = vpop.f32.mrb[18].mxu0 }
 0xe48   :  { %v7341_v39 = vmax.f32 %v11116_v15, %v11158_v19  ;;  %v7330_v54 = vpop.f32.mrb[19].mxu0 }
 0xe49   :  { %v7340_v11 = vmax.f32 %v6822_v17, %v7330_v54 }
 0xe73   :  { %v11200_v9 = vpop.f32.mrb[20].mxu0 }
 0xe74   :  { %v7851_v5 = vmax.f32 %v7341_v39, %v11200_v9  ;;  %v7840_v55 = vpop.f32.mrb[21].mxu0  ;;  %v10056_v9 = vld [vmem:[%s15599_s10 + $0x28] sm:$0xff] }
 0xe75   :  { %v7850_v26 = vmax.f32 %v7340_v11, %v7840_v55 }
 0xe76   :  { %v7856_v28 = vsel %vm7852_vm0, %v7851_v5, 0.0 }
 0xe77   :  { %7857 = vadd.xlane.f32.xlu1 %v7856_v28  ;;  %v7853_v48 = vsel %vm7852_vm0, %v7850_v26, 0.0 }
 0xe78   :  { %7854 = vadd.xlane.f32.xlu0 %v7853_v48 }
 0xf04   :  { %v7858_v47 = vpop.xlane.xlu1 %7857 }
 0xf05   :  { %v7861_v25 = vmul.f32 0.33333334, %v7858_v47  ;;  %v7855_v62 = vpop.xlane.xlu0 %7854 }
 0xf06   :  { %v7860_v59 = vmul.f32 0.33333334, %v7855_v62 }
 0xf07   :  { %v7863_v52 = vsub.f32 %v7851_v5, %v7861_v25 }
 0xf08   :  { %v7862_v10 = vsub.f32 %v7850_v26, %v7860_v59 }
 0xf09   :  { %v7865_v14 = vmul.f32 %v7863_v52, %v7863_v52 }
 0xf0a   :  { %v7864_v37 = vmul.f32 %v7862_v10, %v7862_v10 }
 0xf0b   :  { %v7869_v0 = vsel %vm7852_vm0, %v7865_v14, 0.0 }
 0xf0c   :  { %v7866_v35 = vsel %vm7852_vm0, %v7864_v37, 0.0 }
 0xf0d   :  { %7867 = vadd.xlane.f32.xlu0 %v7866_v35 }
 0xf11   :  { %7870 = vadd.xlane.f32.xlu0 %v7869_v0 }
 0xf9a   :  { %v7868_v27 = vpop.xlane.xlu0 %7867 }
 0xf9b   :  { %v7873_v50 = vmul.f32 0.5, %v7868_v27 }
 0xf9d   :  { %12889 = vrsqrt.f32 %v7873_v50  ;;  %vm7877_vm12 = vcmp.eq.f32.partialorder %v7873_v50, inf  ;;  %v7880_v13 = vand.u32 2147483648, %v7873_v50  ;;  %vm7879_vm13 = vcmp.eq.f32.partialorder %v7873_v50, 0.0 }
 0xf9e   :  { %v7871_v21 = vpop.xlane.xlu0 %7870 }
 0xf9f   :  { %v7874_v6 = vmul.f32 0.5, %v7871_v21 }
 0xfa1   :  { %12891 = vrsqrt.f32 %v7874_v6  ;;  %vm7884_vm14 = vcmp.eq.f32.partialorder %v7874_v6, inf  ;;  %v7887_v7 = vand.u32 2147483648, %v7874_v6  ;;  %vm7886_vm15 = vcmp.eq.f32.partialorder %v7874_v6, 0.0 }
 0xfa7   :  { %v12890_v16 = vpop.eup %12889 }
 0xfa8   :  { %v7876_v33 = vmul.f32 %v12890_v16, %v7873_v50 }
 0xfaa   :  { %v7878_v41 = vsel %vm7877_vm12, %v7873_v50, %v7876_v33 }
 0xfab   :  { %v12892_v40 = vpop.eup %12891  ;;  %v7881_v31 = vsel %vm7879_vm13, %v7880_v13, %v7878_v41  ;;  %v8439_v13 = vld [vmem:[%s15601_s12] sm:$0xff]  ;;  %v8440_v41 = vld [vmem:[%s15601_s12 + $0x8] sm:$0xff]  ;;  %vm9985_vm13 = vcmask 123904  }
 0xfac   :  { %v7883_v22 = vmul.f32 %v12892_v40, %v7874_v6  ;;  %v7889_v56 = vadd.f32 1e-06, %v7881_v31  ;;  %v8455_v40 = vand.u32 4294901760, %v8439_v13  ;;  %v8458_v31 = vand.u32 4294901760, %v8440_v41 }
 0xfae   :  { %v7885_v38 = vsel %vm7884_vm14, %v7874_v6, %v7883_v22  ;;  %12893 = vrcp.f32 %v7889_v56  ;;  %v15370_v22 = vpack.c.bf16 %v8458_v31, %v8455_v40  ;;  %v15374_v56 = vsub.f32 %v8440_v41, %v8458_v31  ;;  %v8963_v31 = vld [vmem:[%s15603_s14] sm:$0xff] }
 0xfaf   :  { %v7888_v23 = vsel %vm7886_vm15, %v7887_v7, %v7885_v38  ;;  %v15372_v7 = vsub.f32 %v8439_v13, %v8455_v40  ;;  %v8441_v38 = vld [vmem:[%s15601_s12 + $0x10] sm:$0xff] }
 0xfb0   :  { %v7890_v36 = vadd.f32 1e-06, %v7888_v23  ;;  %v8442_v23 = vld [vmem:[%s15601_s12 + $0x18] sm:$0xff]  ;;  %12523 = vmatpush3.bf16.msra.mxu1 %v15370_v22 }
 0xfb1   :  { %12524 = vmatprep.subr.bf16.mxu1 %v15775_v61 }
 0xfb2   :  { %12895 = vrcp.f32 %v7890_v36  ;;  %v8461_v36 = vand.u32 4294901760, %v8441_v38 }
 0xfb8   :  { %v12894_v2 = vpop.eup %12893 }
 0xfb9   :  { %v7892_v58 = vmul.f32 %v12894_v2, %v7862_v10  ;;  %v8464_v2 = vand.u32 4294901760, %v8442_v23 }
 0xfbb   :  { %v7897_v46 = vmul.f32 0.01, %v7892_v58  ;;  %vm7895_vm3 = vcmp.ge.f32.partialorder %v7892_v58, 0.0 }
 0xfbc   :  { %v12896_v51 = vpop.eup %12895 }
 0xfbd   :  { %v7894_v53 = vmul.f32 %v12896_v51, %v7863_v52  ;;  %v7899_v8 = vsel %vm7895_vm3, %v7892_v58, %v7897_v46  ;;  %v8536_v51 = vand.u32 4294901760, %v15372_v7  ;;  %v15386_v58 = vpack.c.bf16 %v8464_v2, %v8461_v36 }
 0xfbf   :  { %vm7896_vm2 = vcmp.ge.f32.partialorder %v7894_v53, 0.0  ;;  %v7898_v20 = vmul.f32 0.01, %v7894_v53  ;;  %v8537_v46 = vsub.f32 %v15372_v7, %v8536_v51  ;;  %12526 = vmatpush3.bf16.msra.mxu1 %v15386_v58 }
 0xfc0   :  { %12527 = vmatprep.subr.bf16.mxu1 %v15775_v61 }
 0xfc1   :  { %v7900_v24 = vsel %vm7896_vm2, %v7894_v53, %v7898_v20  ;;  %v8543_v53 = vand.u32 4294901760, %v15374_v56  ;;  %v15388_v20 = vsub.f32 %v8441_v38, %v8461_v36 }
 0xfc2   :  { %7923 = vperm.xlu1 %12864, %v7900_v24   ;;  %7910 = vperm.xlu0 %12863, %v7900_v24  }
 0xfc6   :  { %12865 = vset.pattern.permute.xlu1 %v12947_v34  ;;  %12867 = vset.pattern.permute.xlu0 %v12949_v32  ;;  %v7945_v34 = vld [vmem:[%s15598_s9] sm:$0x3] }
 0xfc7   :  { %7905 = vperm.xlu1 %12865, %v7899_v8   ;;  %7934 = vperm.xlu0 %12867, %v7899_v8   ;;  %v7954_v30 = vsel %vm956_vm4, %v7945_v34, 0  ;;  %v8550_v34 = vand.u32 4294901760, %v15388_v20  ;;  %vm15921_vm4 = vcmask 254976  }
 0xfc8   :  { %v8023_v3 = vand.u32 4294901760, %v7954_v30  ;;  %vm15922_vm5 = vmmov %vm15921_vm4 }
 0xfc9   :  { %vm15923_vm1 = vmmov %vm15921_vm4 }
 0xfca   :  { %v8024_v57 = vsub.f32 %v7954_v30, %v8023_v3  ;;  %vm15924_vm8 = vmmov %vm15923_vm1 }
 0xfcb   :  { %12866 = vset.pattern.permute.xlu1 %v12948_v44  ;;  %vm15925_vm11 = vmmov %vm15923_vm1 }
 0xfcc   :  { %7919 = vperm.xlu1 %12866, %v7899_v8   ;;  %v8025_v26 = vand.u32 4294901760, %v8024_v57  ;;  %v8538_v8 = vand.u32 4294901760, %v8537_v46  ;;  %vm15926_vm0 = vmmov %vm15923_vm1 }
 0xfce   :  { %v8026_v59 = vsub.f32 %v8024_v57, %v8025_v26 }
 0xfd0   :  { %12868 = vset.pattern.permute.xlu1 %v12949_v32  ;;  %v8027_v14 = vand.u32 4294901760, %v8026_v59  ;;  %v8544_v32 = vsub.f32 %v15374_v56, %v8543_v53 }
 0xfd1   :  { %7938 = vperm.xlu1 %12868, %v7900_v24   ;;  %v15390_v24 = vsub.f32 %v8442_v23, %v8464_v2  ;;  %v8965_v2 = vld [vmem:[%s15603_s14 + $0x10] sm:$0xff] }
 0xfd3   :  { %v8557_v30 = vand.u32 4294901760, %v15390_v24 }
0x1041   :  { %v7924_v42 = vpop.permute.xlu1 %7923  ;;  %v7911_v18 = vpop.permute.xlu0 %7910 }
0x1042   :  { %v7927_v19 = vmul.f32 %v10054_v60, %v7924_v42  ;;  %v7914_v39 = vmul.f32 %v7911_v18, %v7902_v49  ;;  %v8545_v42 = vand.u32 4294901760, %v8544_v32  ;;  %v12534_v49 = vpack.c.bf16 %v15374_v56, %v15372_v7 }
0x1043   :  { %v8978_v7 = vand.u32 4294901760, %v8963_v31 }
0x1044   :  { %v7929_v28 = vadd.f32 %v7927_v19, %v7914_v39  ;;  %v12528_v18 = vpack.c.bf16 %v8545_v42, %v8538_v8 }
0x1045   :  { %v15444_v23 = vsub.f32 %v8963_v31, %v8978_v7 }
0x1046   :  { %v7906_v29 = vpop.permute.xlu1 %7905  ;;  %v7935_v1 = vpop.permute.xlu0 %7934 }
0x1047   :  { %v7913_v15 = vmul.f32 %v7906_v29, %v7901_v4  ;;  %v7941_v54 = vmul.f32 %v10055_v12, %v7935_v1  ;;  %v8551_v29 = vsub.f32 %v15388_v20, %v8550_v34  ;;  %v12537_v12 = vpack.c.bf16 %v15390_v24, %v15388_v20 }
0x1048   :  { %v12546_v1 = vpack.c.bf16 %v8543_v53, %v8536_v51  ;;  %v8966_v51 = vld [vmem:[%s15603_s14 + $0x18] sm:$0xff]  ;;  %v8984_v53 = vand.u32 4294901760, %v8965_v2  ;;  %v9059_v20 = vand.u32 4294901760, %v15444_v23 }
0x1049   :  { %v8552_v4 = vand.u32 4294901760, %v8551_v29 }
0x104a   :  { %v15460_v32 = vsub.f32 %v8965_v2, %v8984_v53  ;;  %v9060_v42 = vsub.f32 %v15444_v23, %v9059_v20 }
0x104b   :  { %v7920_v43 = vpop.permute.xlu1 %7919 }
0x104c   :  { %v7926_v17 = vmul.f32 %v10053_v45, %v7920_v43  ;;  %v12549_v43 = vpack.c.bf16 %v8557_v30, %v8550_v34  ;;  %v9073_v29 = vand.u32 4294901760, %v15460_v32 }
0x104e   :  { %v7928_v11 = vadd.f32 %v7926_v17, %v7913_v15 }
0x1050   :  { %v7943_v5 = vadd.f32 %v7941_v54, %v7928_v11  ;;  %v7939_v55 = vpop.permute.xlu1 %7938 }
0x1051   :  { %v7942_v48 = vmul.f32 %v10056_v9, %v7939_v55 }
0x1052   :  { %v7957_v47 = vand.u32 4294901760, %v7943_v5 }
0x1053   :  { %v7944_v25 = vadd.f32 %v7942_v48, %v7929_v28 }
0x1054   :  { %v8035_v62 = vsub.f32 %v7943_v5, %v7957_v47 }
0x1055   :  { %v7960_v52 = vand.u32 4294901760, %v7944_v25 }
0x1056   :  { %v8036_v10 = vand.u32 4294901760, %v8035_v62 }
0x1057   :  { %v12504_v37 = vpack.c.bf16 %v7960_v52, %v7957_v47  ;;  %v8042_v35 = vsub.f32 %v7944_v25, %v7960_v52 }
0x1058   :  { %v8037_v44 = vsub.f32 %v8035_v62, %v8036_v10 }
0x1059   :  { %v8043_v0 = vand.u32 4294901760, %v8042_v35  ;;  %12505 = vmatpush3.bf16.msra.mxu0 %v12504_v37  ;;  %v12510_v16 = vpack.c.bf16 %v8042_v35, %v8035_v62 }
0x105a   :  { %12506 = vmatprep.subr.bf16.mxu0 %v15775_v61  ;;  %v8038_v50 = vand.u32 4294901760, %v8037_v44 }
0x105b   :  { %v8044_v27 = vsub.f32 %v8042_v35, %v8043_v0  ;;  %v12516_v33 = vpack.c.bf16 %v8043_v0, %v8036_v10 }
0x105c   :  { %11206 = vmatmul.mubr.f32.vlgmr.msra.gmra.mrb[22].mxu0 %v8027_v14 }
0x105d   :  { %v8045_v21 = vand.u32 4294901760, %v8044_v27  ;;  %11212 = vmatprep.mubr.msk.f32.mxu0 %vm12950_vm7, %v15920_v63 }
0x105f   :  { %v12507_v6 = vpack.c.bf16 %v8045_v21, %v8038_v50 }
0x1061   :  { %12508 = vmatpush3.bf16.msra.mxu0 %v12507_v6 }
0x1062   :  { %12509 = vmatprep.subr.bf16.mxu0 %v15775_v61 }
0x1064   :  { %11213 = vmatmul.mubr.f32.vlgmr.msra.gmra.mrb[22].mxu0 %v8023_v3 }
0x1065   :  { %12511 = vmatpush3.bf16.msra.mxu0 %v12510_v16  ;;  %11219 = vmatprep.mubr.msk.f32.mxu0 %vm12950_vm7, %v15920_v63 }
0x1066   :  { %12512 = vmatprep.subr.bf16.mxu0 %v15775_v61 }
0x106c   :  { %11220 = vmatmul.mubr.f32.vlgmr.msra.gmra.mrb[22].mxu0 %v8024_v57  ;;  %v10057_v57 = vld [vmem:[%s15600_s11] ss:$0 sm:$0xff] }
0x106d   :  { %12514 = vmatpush3.bf16.msra.mxu0 %v12504_v37  ;;  %11226 = vmatprep.mubr.msk.f32.mxu0 %vm12950_vm7, %v15920_v63 }
0x106e   :  { %12515 = vmatprep.subr.bf16.mxu0 %v15775_v61 }
0x1074   :  { %11227 = vmatmul.mubr.f32.vlgmr.msra.gmra.mrb[22].mxu0 %v8025_v26 }
0x1075   :  { %12517 = vmatpush3.bf16.msra.mxu0 %v12516_v33  ;;  %11233 = vmatprep.mubr.msk.f32.mxu0 %vm12950_vm7, %v15920_v63 }
0x1076   :  { %12518 = vmatprep.subr.bf16.mxu0 %v15775_v61 }
0x107c   :  { %11234 = vmatmul.mubr.f32.vlgmr.msra.gmra.mrb[22].mxu0 %v8023_v3 }
0x107d   :  { %12520 = vmatpush3.bf16.msra.mxu0 %v12504_v37  ;;  %11240 = vmatprep.mubr.msk.f32.mxu0 %vm12950_vm7, %v15920_v63 }
0x107e   :  { %12557 = vmatprep.subr.bf16.mxu0 %v15775_v61 }
0x1084   :  { %11241 = vmatmul.mubr.f32.vlgmr.msra.gmra.mrb[22].mxu0 %v8023_v3  ;;  %v8558_v3 = vsub.f32 %v15390_v24, %v8557_v30  ;;  %v9061_v30 = vand.u32 4294901760, %v9060_v42 }
0x1085   :  { %11317 = vmatprep.mubr.msk.f32.mxu0 %vm12950_vm7, %v15920_v63 }
0x1086   :  { %v8559_v45 = vand.u32 4294901760, %v8558_v3 }
0x1088   :  { %v12531_v60 = vpack.c.bf16 %v8559_v45, %v8552_v4  ;;  %v9074_v45 = vsub.f32 %v15460_v32, %v9073_v29 }
0x1157   :  { %v8411_v15 = vpop.f32.mrb[22].mxu0 }
0x1158   :  { %v12635_v17 = vadd.f32 %v10057_v57, %v8411_v15  ;;  %v11242_v19 = vpop.f32.mrb[23].mxu0 }
0x1159   :  { %v10058_v19 = vld [vmem:[%s15602_s13] ss:$0 sm:$0xff] }
0x115a   :  { %v8415_v39 = vsel %vm15921_vm4, %v12635_v17, 0.0 }
0x115b   :  { %v8416_v54 = vrot.slane %v8415_v39, 4 }
0x115d   :  { %v8417_v11 = vadd.f32 %v8416_v54, %v8415_v39 }
0x115f   :  { %v8418_v9 = vrot.slane %v8417_v11, 2 }
0x1161   :  { %v8419_v5 = vadd.f32 %v8418_v9, %v8417_v11 }
0x1163   :  { %v8420_v55 = vrot.slane %v8419_v5, 1 }
0x1165   :  { %v8421_v26 = vadd.f32 %v8420_v55, %v8419_v5 }
0x1167   :  { %v8422_v28 = vmul.f32 0.5, %v8421_v26 }
0x1169   :  { %v8423_v48 = vsub.f32 %v12635_v17, %v8422_v28 }
0x116b   :  { %v8424_v47 = vmul.f32 %v8423_v48, %v8423_v48 }
0x116d   :  { %v8425_v25 = vsel %vm15922_vm5, %v8424_v47, 0.0 }
0x116e   :  { %v8426_v62 = vrot.slane %v8425_v25, 4 }
0x1170   :  { %v8427_v59 = vadd.f32 %v8426_v62, %v8425_v25 }
0x1172   :  { %v8428_v52 = vrot.slane %v8427_v59, 2 }
0x1174   :  { %v8429_v10 = vadd.f32 %v8428_v52, %v8427_v59 }
0x1176   :  { %v8430_v37 = vrot.slane %v8429_v10, 1 }
0x1178   :  { %v8431_v35 = vadd.f32 %v8430_v37, %v8429_v10 }
0x117a   :  { %v8432_v14 = vmul.f32 0.5, %v8431_v35 }
0x117c   :  { %v8433_v0 = vadd.f32 1e-05, %v8432_v14 }
0x117e   :  { %12897 = vrsqrt.f32 %v8433_v0 }
0x1188   :  { %v12898_v44 = vpop.eup %12897 }
0x1189   :  { %v8435_v27 = vmul.f32 %v12898_v44, %v8423_v48 }
0x118b   :  { %vm8436_vm6 = vcmp.ge.f32.partialorder %v8435_v27, 0.0  ;;  %v8437_v50 = vmul.f32 0.01, %v8435_v27 }
0x118d   :  { %v8438_v21 = vsel %vm8436_vm6, %v8435_v27, %v8437_v50 }
0x118e   :  { %v8452_v6 = vsel %vm8450_vm9, %v8438_v21, 0 }
0x118f   :  { %v8523_v16 = vand.u32 4294901760, %v8452_v6 }
0x1191   :  { %v8524_v33 = vsub.f32 %v8452_v6, %v8523_v16 }
0x1193   :  { %v8525_v13 = vand.u32 4294901760, %v8524_v33 }
0x1195   :  { %v8526_v41 = vsub.f32 %v8524_v33, %v8525_v13 }
0x1197   :  { %v8527_v40 = vand.u32 4294901760, %v8526_v41 }
0x1199   :  { %11252 = vmatmul.mubr.f32.vlgmr.msra.gmra.mrb[12].mxu1 %v8527_v40 }
0x119a   :  { %12529 = vmatpush3.bf16.msra.mxu1 %v12528_v18  ;;  %11262 = vmatprep.mubr.msk.f32.mxu1 %vm12950_vm7, %v15920_v63 }
0x119b   :  { %12530 = vmatprep.subr.bf16.mxu1 %v15775_v61 }
0x119e   :  { %12532 = vmatpush3.bf16.msra.mxu1 %v12531_v60 }
0x119f   :  { %12533 = vmatprep.subr.bf16.mxu1 %v15775_v61 }
0x11a1   :  { %11263 = vmatmul.mubr.f32.vlgmr.msra.gmra.mrb[12].mxu1 %v8523_v16 }
0x11a2   :  { %12535 = vmatpush3.bf16.msra.mxu1 %v12534_v49  ;;  %11273 = vmatprep.mubr.msk.f32.mxu1 %vm12950_vm7, %v15920_v63  ;;  %v9075_v49 = vand.u32 4294901760, %v9074_v45 }
0x11a3   :  { %12536 = vmatprep.subr.bf16.mxu1 %v15775_v61 }
0x11a6   :  { %12538 = vmatpush3.bf16.msra.mxu1 %v12537_v12 }
0x11a7   :  { %12539 = vmatprep.subr.bf16.mxu1 %v15775_v61 }
0x11a9   :  { %11274 = vmatmul.mubr.f32.vlgmr.msra.gmra.mrb[12].mxu1 %v8524_v33 }
0x11aa   :  { %12541 = vmatpush3.bf16.msra.mxu1 %v15370_v22  ;;  %11284 = vmatprep.mubr.msk.f32.mxu1 %vm12950_vm7, %v15920_v63 }
0x11ab   :  { %12542 = vmatprep.subr.bf16.mxu1 %v15775_v61 }
0x11ae   :  { %12544 = vmatpush3.bf16.msra.mxu1 %v15386_v58 }
0x11af   :  { %12545 = vmatprep.subr.bf16.mxu1 %v15775_v61 }
0x11b1   :  { %11285 = vmatmul.mubr.f32.vlgmr.msra.gmra.mrb[12].mxu1 %v8525_v13 }
0x11b2   :  { %12547 = vmatpush3.bf16.msra.mxu1 %v12546_v1  ;;  %11295 = vmatprep.mubr.msk.f32.mxu1 %vm12950_vm7, %v15920_v63 }
0x11b3   :  { %12548 = vmatprep.subr.bf16.mxu1 %v15775_v61 }
0x11b6   :  { %12550 = vmatpush3.bf16.msra.mxu1 %v12549_v43 }
0x11b7   :  { %12551 = vmatprep.subr.bf16.mxu1 %v15775_v61 }
0x11b9   :  { %11296 = vmatmul.mubr.f32.vlgmr.msra.gmra.mrb[12].mxu1 %v8523_v16 }
0x11ba   :  { %12553 = vmatpush3.bf16.msra.mxu1 %v15370_v22  ;;  %11306 = vmatprep.mubr.msk.f32.mxu1 %vm12950_vm7, %v15920_v63  ;;  %v8964_v22 = vld [vmem:[%s15603_s14 + $0x8] sm:$0xff] }
0x11bb   :  { %12554 = vmatprep.subr.bf16.mxu1 %v15775_v61  ;;  %v8981_v56 = vand.u32 4294901760, %v8964_v22 }
0x11bd   :  { %v15442_v38 = vpack.c.bf16 %v8981_v56, %v8978_v7  ;;  %v15446_v36 = vsub.f32 %v8964_v22, %v8981_v56  ;;  %v9486_v56 = vld [vmem:[%s15605_s16] sm:$0xff] }
0x11be   :  { %12556 = vmatpush3.bf16.msra.mxu1 %v15386_v58  ;;  %v8987_v58 = vand.u32 4294901760, %v8966_v51 }
0x11bf   :  { %12593 = vmatprep.subr.bf16.mxu1 %v15775_v61  ;;  %12559 = vmatpush3.bf16.msra.mxu0 %v15442_v38  ;;  %v9066_v24 = vand.u32 4294901760, %v15446_v36  ;;  %v12570_v43 = vpack.c.bf16 %v15446_v36, %v15444_v23  ;;  %v9487_v23 = vld [vmem:[%s15605_s16 + $0x8] sm:$0xff] }
0x11c0   :  { %12560 = vmatprep.subr.bf16.mxu0 %v15775_v61  ;;  %v15458_v46 = vpack.c.bf16 %v8987_v58, %v8984_v53  ;;  %v15462_v8 = vsub.f32 %v8966_v51, %v8987_v58  ;;  %v9504_v2 = vand.u32 4294901760, %v9487_v23  ;;  %v9488_v58 = vld [vmem:[%s15605_s16 + $0x10] sm:$0xff] }
0x11c1   :  { %11307 = vmatmul.mubr.f32.vlgmr.msra.gmra.mrb[12].mxu1 %v8523_v16  ;;  %v9067_v34 = vsub.f32 %v15446_v36, %v9066_v24  ;;  %v12582_v15 = vpack.c.bf16 %v9066_v24, %v9059_v20  ;;  %v9501_v36 = vand.u32 4294901760, %v9486_v56  ;;  %v9489_v20 = vld [vmem:[%s15605_s16 + $0x18] sm:$0xff]  ;;  %v9507_v24 = vand.u32 4294901760, %v9488_v58 }
0x11c2   :  { %11383 = vmatprep.mubr.msk.f32.mxu1 %vm12950_vm7, %v15920_v63  ;;  %v9080_v3 = vand.u32 4294901760, %v15462_v8  ;;  %v12573_v57 = vpack.c.bf16 %v15462_v8, %v15460_v32  ;;  %v15515_v53 = vsub.f32 %v9487_v23, %v9504_v2 }
0x11c3   :  { %12562 = vmatpush3.bf16.msra.mxu0 %v15458_v46  ;;  %v9068_v18 = vand.u32 4294901760, %v9067_v34  ;;  %v15511_v51 = vpack.c.bf16 %v9504_v2, %v9501_v36  ;;  %v15529_v34 = vsub.f32 %v9488_v58, %v9507_v24  ;;  %v10060_v2 = vld [vmem:[%s15606_s17] ss:$0 sm:$0xff] }
0x11c4   :  { %12563 = vmatprep.subr.bf16.mxu0 %v15775_v61  ;;  %v9081_v60 = vsub.f32 %v15462_v8, %v9080_v3  ;;  %v12585_v17 = vpack.c.bf16 %v9080_v3, %v9073_v29  ;;  %v9589_v8 = vand.u32 4294901760, %v15515_v53 }
0x11c5   :  { %v12564_v4 = vpack.c.bf16 %v9068_v18, %v9061_v30  ;;  %12595 = vmatpush3.bf16.msra.mxu1 %v15511_v51  ;;  %v9596_v45 = vand.u32 4294901760, %v15529_v34 }
0x11c6   :  { %v9082_v12 = vand.u32 4294901760, %v9081_v60  ;;  %12596 = vmatprep.subr.bf16.mxu1 %v15775_v61  ;;  %v9590_v29 = vsub.f32 %v15515_v53, %v9589_v8 }
0x11c8   :  { %v12567_v1 = vpack.c.bf16 %v9082_v12, %v9075_v49  ;;  %v9597_v12 = vsub.f32 %v15529_v34, %v9596_v45 }
0x1294   :  { %v8935_v39 = vpop.f32.mrb[12].mxu1 }
0x1295   :  { %v12636_v54 = vadd.f32 %v10058_v19, %v8935_v39  ;;  %v11308_v11 = vpop.f32.mrb[13].mxu1 }
0x1296   :  { %v10059_v11 = vld [vmem:[%s15604_s15] ss:$0 sm:$0xff] }
0x1297   :  { %v8939_v9 = vsel %vm15923_vm1, %v12636_v54, 0.0 }
0x1298   :  { %v8940_v5 = vrot.slane %v8939_v9, 4 }
0x129a   :  { %v8941_v55 = vadd.f32 %v8940_v5, %v8939_v9 }
0x129c   :  { %v8942_v26 = vrot.slane %v8941_v55, 2 }
0x129e   :  { %v8943_v28 = vadd.f32 %v8942_v26, %v8941_v55 }
0x12a0   :  { %v8944_v48 = vrot.slane %v8943_v28, 1 }
0x12a2   :  { %v8945_v47 = vadd.f32 %v8944_v48, %v8943_v28 }
0x12a4   :  { %v8946_v25 = vmul.f32 0.5, %v8945_v47 }
0x12a6   :  { %v8947_v62 = vsub.f32 %v12636_v54, %v8946_v25 }
0x12a8   :  { %v8948_v59 = vmul.f32 %v8947_v62, %v8947_v62 }
0x12aa   :  { %v8949_v52 = vsel %vm15924_vm8, %v8948_v59, 0.0 }
0x12ab   :  { %v8950_v10 = vrot.slane %v8949_v52, 4 }
0x12ad   :  { %v8951_v37 = vadd.f32 %v8950_v10, %v8949_v52 }
0x12af   :  { %v8952_v35 = vrot.slane %v8951_v37, 2 }
0x12b1   :  { %v8953_v14 = vadd.f32 %v8952_v35, %v8951_v37 }
0x12b3   :  { %v8954_v0 = vrot.slane %v8953_v14, 1 }
0x12b5   :  { %v8955_v44 = vadd.f32 %v8954_v0, %v8953_v14 }
0x12b7   :  { %v8956_v27 = vmul.f32 0.5, %v8955_v44 }
0x12b9   :  { %v8957_v50 = vadd.f32 1e-05, %v8956_v27 }
0x12bb   :  { %12899 = vrsqrt.f32 %v8957_v50 }
0x12c5   :  { %v12900_v21 = vpop.eup %12899 }
0x12c6   :  { %v8959_v6 = vmul.f32 %v12900_v21, %v8947_v62 }
0x12c8   :  { %vm8960_vm10 = vcmp.ge.f32.partialorder %v8959_v6, 0.0  ;;  %v8961_v16 = vmul.f32 0.01, %v8959_v6 }
0x12ca   :  { %v8962_v33 = vsel %vm8960_vm10, %v8959_v6, %v8961_v16 }
0x12cb   :  { %v8975_v13 = vsel %vm8450_vm9, %v8962_v33, 0 }
0x12cc   :  { %v9046_v41 = vand.u32 4294901760, %v8975_v13 }
0x12ce   :  { %v9047_v40 = vsub.f32 %v8975_v13, %v9046_v41 }
0x12d0   :  { %v9048_v31 = vand.u32 4294901760, %v9047_v40 }
0x12d2   :  { %v9049_v22 = vsub.f32 %v9047_v40, %v9048_v31 }
0x12d4   :  { %v9050_v7 = vand.u32 4294901760, %v9049_v22 }
0x12d6   :  { %11318 = vmatmul.mubr.f32.vlgmr.msra.gmra.mrb[24].mxu0 %v9050_v7 }
0x12d7   :  { %12565 = vmatpush3.bf16.msra.mxu0 %v12564_v4  ;;  %11328 = vmatprep.mubr.msk.f32.mxu0 %vm12950_vm7, %v15920_v63  ;;  %v9591_v4 = vand.u32 4294901760, %v9590_v29 }
0x12d8   :  { %12566 = vmatprep.subr.bf16.mxu0 %v15775_v61 }
0x12db   :  { %12568 = vmatpush3.bf16.msra.mxu0 %v12567_v1 }
0x12dc   :  { %12569 = vmatprep.subr.bf16.mxu0 %v15775_v61 }
0x12de   :  { %11329 = vmatmul.mubr.f32.vlgmr.msra.gmra.mrb[24].mxu0 %v9046_v41 }
0x12df   :  { %12571 = vmatpush3.bf16.msra.mxu0 %v12570_v43  ;;  %11339 = vmatprep.mubr.msk.f32.mxu0 %vm12950_vm7, %v15920_v63  ;;  %v9598_v43 = vand.u32 4294901760, %v9597_v12 }
0x12e0   :  { %12572 = vmatprep.subr.bf16.mxu0 %v15775_v61 }
0x12e3   :  { %12574 = vmatpush3.bf16.msra.mxu0 %v12573_v57 }
0x12e4   :  { %12575 = vmatprep.subr.bf16.mxu0 %v15775_v61 }
0x12e6   :  { %11340 = vmatmul.mubr.f32.vlgmr.msra.gmra.mrb[24].mxu0 %v9047_v40 }
0x12e7   :  { %12577 = vmatpush3.bf16.msra.mxu0 %v15442_v38  ;;  %11350 = vmatprep.mubr.msk.f32.mxu0 %vm12950_vm7, %v15920_v63 }
0x12e8   :  { %12578 = vmatprep.subr.bf16.mxu0 %v15775_v61 }
0x12eb   :  { %12580 = vmatpush3.bf16.msra.mxu0 %v15458_v46 }
0x12ec   :  { %12581 = vmatprep.subr.bf16.mxu0 %v15775_v61 }
0x12ee   :  { %11351 = vmatmul.mubr.f32.vlgmr.msra.gmra.mrb[24].mxu0 %v9048_v31 }
0x12ef   :  { %12583 = vmatpush3.bf16.msra.mxu0 %v12582_v15  ;;  %11361 = vmatprep.mubr.msk.f32.mxu0 %vm12950_vm7, %v15920_v63 }
0x12f0   :  { %12584 = vmatprep.subr.bf16.mxu0 %v15775_v61 }
0x12f3   :  { %12586 = vmatpush3.bf16.msra.mxu0 %v12585_v17 }
0x12f4   :  { %12587 = vmatprep.subr.bf16.mxu0 %v15775_v61 }
0x12f6   :  { %11362 = vmatmul.mubr.f32.vlgmr.msra.gmra.mrb[24].mxu0 %v9046_v41 }
0x12f7   :  { %12589 = vmatpush3.bf16.msra.mxu0 %v15442_v38  ;;  %11372 = vmatprep.mubr.msk.f32.mxu0 %vm12950_vm7, %v15920_v63  ;;  %v15513_v38 = vsub.f32 %v9486_v56, %v9501_v36 }
0x12f8   :  { %12590 = vmatprep.subr.bf16.mxu0 %v15775_v61 }
0x12f9   :  { %v9582_v32 = vand.u32 4294901760, %v15513_v38  ;;  %v12606_v17 = vpack.c.bf16 %v15515_v53, %v15513_v38 }
0x12fb   :  { %12592 = vmatpush3.bf16.msra.mxu0 %v15458_v46  ;;  %v9510_v46 = vand.u32 4294901760, %v9489_v20  ;;  %v9583_v18 = vsub.f32 %v15513_v38, %v9582_v32  ;;  %v12618_v39 = vpack.c.bf16 %v9589_v8, %v9582_v32 }
0x12fd   :  { %v15527_v42 = vpack.c.bf16 %v9510_v46, %v9507_v24  ;;  %v15531_v30 = vsub.f32 %v9489_v20, %v9510_v46  ;;  %v9584_v3 = vand.u32 4294901760, %v9583_v18 }
0x12fe   :  { %11373 = vmatmul.mubr.f32.vlgmr.msra.gmra.mrb[24].mxu0 %v9046_v41 }
0x12ff   :  { %12598 = vmatpush3.bf16.msra.mxu1 %v15527_v42  ;;  %v9603_v60 = vand.u32 4294901760, %v15531_v30  ;;  %v12600_v49 = vpack.c.bf16 %v9591_v4, %v9584_v3  ;;  %v12609_v19 = vpack.c.bf16 %v15531_v30, %v15529_v34 }
0x1300   :  { %12599 = vmatprep.subr.bf16.mxu1 %v15775_v61 }
0x1301   :  { %v9604_v1 = vsub.f32 %v15531_v30, %v9603_v60  ;;  %v12621_v54 = vpack.c.bf16 %v9603_v60, %v9596_v45 }
0x1303   :  { %v9605_v57 = vand.u32 4294901760, %v9604_v1 }
0x1305   :  { %v12603_v15 = vpack.c.bf16 %v9605_v57, %v9598_v43 }
0x13d1   :  { %v9458_v9 = vpop.f32.mrb[24].mxu0 }
0x13d2   :  { %v12637_v5 = vadd.f32 %v10059_v11, %v9458_v9  ;;  %v11374_v55 = vpop.f32.mrb[25].mxu0 }
0x13d4   :  { %v9462_v26 = vsel %vm15925_vm11, %v12637_v5, 0.0 }
0x13d5   :  { %v9463_v28 = vrot.slane %v9462_v26, 4 }
0x13d7   :  { %v9464_v48 = vadd.f32 %v9463_v28, %v9462_v26 }
0x13d9   :  { %v9465_v47 = vrot.slane %v9464_v48, 2 }
0x13db   :  { %v9466_v25 = vadd.f32 %v9465_v47, %v9464_v48 }
0x13dd   :  { %v9467_v62 = vrot.slane %v9466_v25, 1 }
0x13df   :  { %v9468_v59 = vadd.f32 %v9467_v62, %v9466_v25 }
0x13e1   :  { %v9469_v52 = vmul.f32 0.5, %v9468_v59 }
0x13e3   :  { %v9470_v10 = vsub.f32 %v12637_v5, %v9469_v52 }
0x13e5   :  { %v9471_v37 = vmul.f32 %v9470_v10, %v9470_v10 }
0x13e7   :  { %v9472_v35 = vsel %vm15926_vm0, %v9471_v37, 0.0 }
0x13e8   :  { %v9473_v14 = vrot.slane %v9472_v35, 4 }
0x13ea   :  { %v9474_v0 = vadd.f32 %v9473_v14, %v9472_v35 }
0x13ec   :  { %v9475_v44 = vrot.slane %v9474_v0, 2 }
0x13ee   :  { %v9476_v27 = vadd.f32 %v9475_v44, %v9474_v0 }
0x13f0   :  { %v9477_v50 = vrot.slane %v9476_v27, 1 }
0x13f2   :  { %v9478_v21 = vadd.f32 %v9477_v50, %v9476_v27 }
0x13f4   :  { %v9479_v6 = vmul.f32 0.5, %v9478_v21 }
0x13f6   :  { %v9480_v16 = vadd.f32 1e-05, %v9479_v6 }
0x13f8   :  { %12901 = vrsqrt.f32 %v9480_v16 }
0x1402   :  { %v12902_v33 = vpop.eup %12901 }
0x1403   :  { %v9482_v13 = vmul.f32 %v12902_v33, %v9470_v10 }
0x1405   :  { %vm9483_vm12 = vcmp.ge.f32.partialorder %v9482_v13, 0.0  ;;  %v9484_v41 = vmul.f32 0.01, %v9482_v13 }
0x1407   :  { %v9485_v40 = vsel %vm9483_vm12, %v9482_v13, %v9484_v41 }
0x1408   :  { %v9498_v31 = vsel %vm8450_vm9, %v9485_v40, 0 }
0x1409   :  { %v9569_v22 = vand.u32 4294901760, %v9498_v31 }
0x140b   :  { %v9570_v7 = vsub.f32 %v9498_v31, %v9569_v22 }
0x140d   :  { %v9571_v56 = vand.u32 4294901760, %v9570_v7 }
0x140f   :  { %v9572_v23 = vsub.f32 %v9570_v7, %v9571_v56 }
0x1411   :  { %v9573_v36 = vand.u32 4294901760, %v9572_v23 }
0x1413   :  { %11384 = vmatmul.mubr.f32.vlgmr.msra.gmra.mrb[14].mxu1 %v9573_v36 }
0x1414   :  { %12601 = vmatpush3.bf16.msra.mxu1 %v12600_v49  ;;  %11394 = vmatprep.mubr.msk.f32.mxu1 %vm12950_vm7, %v15920_v63 }
0x1415   :  { %12602 = vmatprep.subr.bf16.mxu1 %v15775_v61 }
0x1418   :  { %12604 = vmatpush3.bf16.msra.mxu1 %v12603_v15 }
0x1419   :  { %12605 = vmatprep.subr.bf16.mxu1 %v15775_v61 }
0x141b   :  { %11395 = vmatmul.mubr.f32.vlgmr.msra.gmra.mrb[14].mxu1 %v9569_v22 }
0x141c   :  { %12607 = vmatpush3.bf16.msra.mxu1 %v12606_v17  ;;  %11405 = vmatprep.mubr.msk.f32.mxu1 %vm12950_vm7, %v15920_v63 }
0x141d   :  { %12608 = vmatprep.subr.bf16.mxu1 %v15775_v61 }
0x1420   :  { %12610 = vmatpush3.bf16.msra.mxu1 %v12609_v19 }
0x1421   :  { %12611 = vmatprep.subr.bf16.mxu1 %v15775_v61 }
0x1423   :  { %11406 = vmatmul.mubr.f32.vlgmr.msra.gmra.mrb[14].mxu1 %v9570_v7 }
0x1424   :  { %12613 = vmatpush3.bf16.msra.mxu1 %v15511_v51  ;;  %11416 = vmatprep.mubr.msk.f32.mxu1 %vm12950_vm7, %v15920_v63 }
0x1425   :  { %12614 = vmatprep.subr.bf16.mxu1 %v15775_v61 }
0x1428   :  { %12616 = vmatpush3.bf16.msra.mxu1 %v15527_v42 }
0x1429   :  { %12617 = vmatprep.subr.bf16.mxu1 %v15775_v61 }
0x142b   :  { %11417 = vmatmul.mubr.f32.vlgmr.msra.gmra.mrb[14].mxu1 %v9571_v56 }
0x142c   :  { %12619 = vmatpush3.bf16.msra.mxu1 %v12618_v39  ;;  %11427 = vmatprep.mubr.msk.f32.mxu1 %vm12950_vm7, %v15920_v63 }
0x142d   :  { %12620 = vmatprep.subr.bf16.mxu1 %v15775_v61 }
0x1430   :  { %12622 = vmatpush3.bf16.msra.mxu1 %v12621_v54 }
0x1431   :  { %12623 = vmatprep.subr.bf16.mxu1 %v15775_v61 }
0x1433   :  { %11428 = vmatmul.mubr.f32.vlgmr.msra.gmra.mrb[14].mxu1 %v9569_v22 }
0x1434   :  { %12625 = vmatpush3.bf16.msra.mxu1 %v15511_v51  ;;  %11438 = vmatprep.mubr.msk.f32.mxu1 %vm12950_vm7, %v15920_v63 }
0x1435   :  { %12626 = vmatprep.subr.bf16.mxu1 %v15775_v61 }
0x1438   :  { %12628 = vmatpush3.bf16.msra.mxu1 %v15527_v42 }
0x143b   :  { %11439 = vmatmul.mubr.f32.vlgmr.msra.gmra.mrb[14].mxu1 %v9569_v22 }
0x150e   :  { %v9981_v38 = vpop.f32.mrb[14].mxu1 }
0x150f   :  { %v12638_v53 = vadd.f32 %v10060_v2, %v9981_v38  ;;  %v11440_v58 = vpop.f32.mrb[15].mxu1 }
0x1511   :  { %9986 = vst.msk [vmem:[#allocation2] sm:$0x3] %vm9985_vm13, %v12638_v53 }
0x1512   :  { %12914 = shalt.err (!%p12911_p4)
}
0x1513   :  { %s12915_s12 = scalar_lea.hbm %s15607_s18, 32 }
0x1514   :  { %p12916_p5 = scmp.ne.s32.totalorder %s15607_s18, %s12915_s12  ;;  %p12919_p6 = scmp.lt.u32.totalorder %s12915_s12, %s15607_s18 }
0x1516   :  { %p12921_p7 = pnand %p12919_p6, %p12916_p5 }
0x1518   :  { %12924 = shalt.err (!%p12921_p7)
}
0x1519   :  { %9996 = dma.vmem_to_hbm [thread:$0]  %s9994_s20, 32, %s15607_s18, [#allocation3]  }
0x151a   :  { %12925 = dma.done.wait [#allocation3], 32  }
0x151b   :  { %12926 = vsyncadd [#allocation3], 4294967264 }
0x151c   :  { %10000 = vsyncpa [#allocation3], 1 }

</bundles_post_ra>
